<compile_context>
chip_gen: v7x
topology: tpu7x:2x2x1
jax: 0.10.0
libtpu: 0.0.40
codegen_flags: <defaults>
</compile_context>

<pallas_src>
import functools

import jax
import jax.numpy as jnp
from jax.experimental import pallas as pl
from jax.experimental.pallas import tpu as pltpu


def _primary_caps_kernel(p_ref, w_ref, b_ref, out_ref, *,
                         batch, rows_per_img, num_caps, caps_channels):
    """K-tiled conv-as-matmul with the squash fused into the last-step epilogue.

    p_ref   : (M, TK)  bf16  im2col patch block   (M = batch * out_h * out_w)
    w_ref   : (TK, N)  bf16  fused conv weights   (N = num_caps * caps_channels)
    b_ref   : (1, N)   f32   fused conv biases
    out_ref : (M, N)   f32   resident accumulator / final squashed output
    """
    k = pl.program_id(0)

    @pl.when(k == 0)
    def _init():
        out_ref[...] = jnp.zeros_like(out_ref)

    out_ref[...] += jnp.dot(p_ref[...], w_ref[...],
                            preferred_element_type=jnp.float32)

    @pl.when(k == pl.num_programs(0) - 1)
    def _epilogue():
        f32 = jnp.float32
        y = out_ref[...] + b_ref[...]                  # (M, N) f32 conv outputs
        m, n = y.shape

        # Selector matrices built from 2-D iotas (range compares -> no int division).
        # g[j, c] = 1  iff output column j belongs to capsule c (j in [c*OC, (c+1)*OC)).
        jj = jax.lax.broadcasted_iota(jnp.int32, (n, num_caps), 0)
        cc = jax.lax.broadcasted_iota(jnp.int32, (n, num_caps), 1)
        g = ((jj >= cc * caps_channels) & (jj < (cc + 1) * caps_channels)).astype(f32)
        cc2 = jax.lax.broadcasted_iota(jnp.int32, (num_caps, n), 0)
        jj2 = jax.lax.broadcasted_iota(jnp.int32, (num_caps, n), 1)
        gt = ((jj2 >= cc2 * caps_channels) & (jj2 < (cc2 + 1) * caps_channels)).astype(f32)
        # bsel[r, b] = 1 iff row r belongs to image b (rows are contiguous per image).
        rr = jax.lax.broadcasted_iota(jnp.int32, (m, batch), 0)
        bb = jax.lax.broadcasted_iota(jnp.int32, (m, batch), 1)
        bsel = ((rr >= bb * rows_per_img) & (rr < (bb + 1) * rows_per_img)).astype(f32)
        bb2 = jax.lax.broadcasted_iota(jnp.int32, (batch, m), 0)
        rr2 = jax.lax.broadcasted_iota(jnp.int32, (batch, m), 1)
        bsel_t = ((rr2 >= bb2 * rows_per_img) &
                  (rr2 < (bb2 + 1) * rows_per_img)).astype(f32)

        # squash over dim=1 of the torch (B, 32*6*6, num_caps) view:
        # per-(image, capsule) sum of squares over ALL 32*6*6 entries.
        ysq = y * y
        per_row_cap = jnp.dot(ysq, g, preferred_element_type=f32)          # (M, caps)
        mag_sq = jnp.dot(bsel_t, per_row_cap, preferred_element_type=f32)  # (B, caps)
        # v = u * mag_sq/(1+mag_sq) * 1/mag  ==  u * sqrt(mag_sq)/(1+mag_sq)
        scale = jnp.sqrt(mag_sq) / (1.0 + mag_sq)                          # (B, caps)
        scale_rows = jnp.dot(bsel, scale, preferred_element_type=f32)      # (M, caps)
        scale_full = jnp.dot(scale_rows, gt, preferred_element_type=f32)   # (M, N)
        out_ref[...] = y * scale_full


def _pick_tk(k_total, max_tk=4096):
    """Largest multiple-of-128 divisor of k_total that is <= max_tk (else full K)."""
    best = k_total
    for mult in range(1, k_total // 128 + 1):
        tk = 128 * mult
        if tk > max_tk:
            break
        if k_total % tk == 0:
            best = tk
    return best


def primary_caps_forward(x, weights, biases, *, stride=2):
    """x: (B, C, H, W) f32; weights: list of (OC, C, KS, KS); biases: list of (OC,).

    Returns the squashed capsules, shape (B, OC*out_h*out_w, num_caps) f32,
    matching PrimaryCapsLayer.forward.
    """
    b_sz, c_in, h, w = x.shape
    num_caps = len(weights)
    out_ch = weights[0].shape[0]
    ks = weights[0].shape[2]
    out_hw = (h - ks) // stride + 1
    m = b_sz * out_hw * out_hw
    k_total = ks * ks * c_in
    n = num_caps * out_ch

    # --- im2col (plain-JAX layout plumbing), bf16 to halve DMA ---------------
    x_nhwc = jnp.transpose(x, (0, 2, 3, 1)).astype(jnp.bfloat16)   # (B, H, W, C)
    lim = stride * (out_hw - 1) + 1
    cols = []
    for kh in range(ks):
        for kw in range(ks):
            cols.append(x_nhwc[:, kh:kh + lim:stride, kw:kw + lim:stride, :])
    patches = jnp.stack(cols, axis=3)              # (B, oh, ow, ks*ks, C)
    patches = patches.reshape(m, k_total)          # row = b*oh*ow ; col = (kh*ks+kw)*C + c

    # --- fuse the 8 per-capsule conv weights into one (K, N) matmul operand --
    w_cols, b_cols = [], []
    for wt, bs in zip(weights, biases):
        w_cols.append(jnp.transpose(wt, (2, 3, 1, 0)).reshape(k_total, out_ch))
        b_cols.append(bs)
    w_mat = jnp.concatenate(w_cols, axis=1).astype(jnp.bfloat16)   # (K, N), col = cap*OC + o
    b_vec = jnp.concatenate(b_cols).reshape(1, n).astype(jnp.float32)

    # --- K-tiled matmul + fused squash ---------------------------------------
    tk = _pick_tk(k_total)
    nk = k_total // tk
    kern = functools.partial(_primary_caps_kernel,
                             batch=b_sz, rows_per_img=out_hw * out_hw,
                             num_caps=num_caps, caps_channels=out_ch)
    v = pl.pallas_call(
        kern,
        out_shape=jax.ShapeDtypeStruct((m, n), jnp.float32),
        grid=(nk,),
        in_specs=[
            pl.BlockSpec((m, tk), lambda kk: (0, kk)),
            pl.BlockSpec((tk, n), lambda kk: (kk, 0)),
            pl.BlockSpec((1, n), lambda kk: (0, 0)),
        ],
        out_specs=pl.BlockSpec((m, n), lambda kk: (0, 0)),
        compiler_params=pltpu.CompilerParams(dimension_semantics=("arbitrary",)),
    )(patches, w_mat, b_vec)

    # --- permute to the torch layout (B, OC*oh*ow, num_caps) -----------------
    v = v.reshape(b_sz, out_hw, out_hw, num_caps, out_ch)   # [b, oh, ow, cap, o]
    v = jnp.transpose(v, (0, 4, 1, 2, 3))                   # [b, o, oh, ow, cap]
    return v.reshape(b_sz, out_ch * out_hw * out_hw, num_caps)


def primary_caps_reference(x, weights, biases, *, stride=2):
    """Pure-JAX (f32) reference of PrimaryCapsLayer.forward for validation."""
    us = []
    for wt, bs in zip(weights, biases):
        y = jax.lax.conv_general_dilated(
            x, wt, window_strides=(stride, stride), padding="VALID",
            dimension_numbers=("NCHW", "OIHW", "NCHW"),
            precision=jax.lax.Precision.HIGHEST)
        us.append(y + bs[None, :, None, None])
    u = jnp.stack(us, axis=4)                                # (B, OC, oh, ow, caps)
    b_sz = x.shape[0]
    u = u.reshape(b_sz, u.shape[1] * u.shape[2] * u.shape[3], -1)
    mag_sq = jnp.sum(u * u, axis=1, keepdims=True)
    mag = jnp.sqrt(mag_sq)
    return mag_sq / (1.0 + mag_sq) * (u / mag)


if __name__ == "__main__":
    key = jax.random.PRNGKey(0)
    B, C_IN, H, W = 2, 256, 20, 20            # default module config -> 6x6 conv output
    DIM_CAPS, OUT_CH, KS, STRIDE = 8, 32, 9, 2

    kx, key = jax.random.split(key)
    x = jax.random.normal(kx, (B, C_IN, H, W), jnp.float32)

    # nn.Conv2d default init: U(-1/sqrt(fan_in), 1/sqrt(fan_in)), fan_in = C_IN*KS*KS
    bound = 1.0 / float(C_IN * KS * KS) ** 0.5
    weights, biases = [], []
    for _ in range(DIM_CAPS):
        kw_, kb_, key = jax.random.split(key, 3)
        weights.append(jax.random.uniform(kw_, (OUT_CH, C_IN, KS, KS),
                                          jnp.float32, -bound, bound))
        biases.append(jax.random.uniform(kb_, (OUT_CH,), jnp.float32, -bound, bound))

    fwd = jax.jit(primary_caps_forward)
    out = fwd(x, weights, biases)
    jax.block_until_ready(out)

    assert out.shape == (B, OUT_CH * 6 * 6, DIM_CAPS), out.shape
    assert bool(jnp.all(jnp.isfinite(out)))
    # squash over dim=1 guarantees per-(image, capsule) norm = mag^2/(1+mag^2) < 1
    norms = jnp.sqrt(jnp.sum(out * out, axis=1))
    assert bool(jnp.all(norms < 1.0))

    # loose tolerance: kernel uses bf16 patches/weights with f32 accumulation
    ref = primary_caps_reference(x, weights, biases)
    max_err = float(jnp.max(jnp.abs(out - ref)))
    assert max_err < 2e-2, f"max abs error vs f32 reference: {max_err}"

    print("KERNEL_OK")
</pallas_src>

<mosaic_0001>
module attributes {stable_mosaic.version = 11 : i64} {
  func.func @_primary_caps_kernel(%arg0: i32, %arg1: memref<72x3456xbf16, #tpu.memory_space<vmem>>, %arg2: memref<3456x256xbf16, #tpu.memory_space<vmem>>, %arg3: memref<1x256xf32, #tpu.memory_space<vmem>>, %arg4: memref<72x256xf32, #tpu.memory_space<vmem>>) attributes {dimension_semantics = [#tpu.dimension_semantics<arbitrary>], iteration_bounds = array<i64: 6>, scalar_prefetch = 0 : i64, scratch_operands = 0 : i64, tpu.core_type = #tpu.core_type<tc>, window_params = [{transform_indices = @transform_0, window_bounds = array<i64: 72, 3456>}, {transform_indices = @transform_1, window_bounds = array<i64: 3456, 256>}, {pipeline_mode = #tpu.pipeline_mode<synchronous>, transform_indices = @transform_2, window_bounds = array<i64: 1, 256>}, {pipeline_mode = #tpu.pipeline_mode<synchronous>, transform_indices = @transform_3, window_bounds = array<i64: 72, 256>}]} {
    %c0_i32 = arith.constant 0 : i32
    %0 = arith.cmpi eq, %arg0, %c0_i32 : i32
    %1 = arith.extui %0 : i1 to i32
    %c0_i32_0 = arith.constant 0 : i32
    %2 = arith.cmpi ne, %1, %c0_i32_0 : i32
    scf.if %2 {
      %cst_9 = arith.constant 0.000000e+00 : f32
      %12 = vector.broadcast %cst_9 : f32 to vector<72x256xf32>
      %c0_10 = arith.constant 0 : index
      %c0_11 = arith.constant 0 : index
      %13 = vector.load %arg4[%c0_10, %c0_11] : memref<72x256xf32, #tpu.memory_space<vmem>>, vector<72x256xf32>
      tpu.vector_store %arg4[%c0_10, %c0_11], %12 {strides = array<i32>} : memref<72x256xf32, #tpu.memory_space<vmem>>, vector<72x256xf32>,
    } else {
    }
    %c0 = arith.constant 0 : index
    %c0_1 = arith.constant 0 : index
    %3 = vector.load %arg4[%c0, %c0_1] : memref<72x256xf32, #tpu.memory_space<vmem>>, vector<72x256xf32>
    %c0_2 = arith.constant 0 : index
    %c0_3 = arith.constant 0 : index
    %4 = vector.load %arg1[%c0_2, %c0_3] : memref<72x3456xbf16, #tpu.memory_space<vmem>>, vector<72x3456xbf16>
    %c0_4 = arith.constant 0 : index
    %c0_5 = arith.constant 0 : index
    %5 = vector.load %arg2[%c0_4, %c0_5] : memref<3456x256xbf16, #tpu.memory_space<vmem>>, vector<3456x256xbf16>
    %cst = arith.constant dense<0.000000e+00> : vector<72x256xf32>
    %6 = tpu.matmul %4, %5, %cst {dimension_numbers = #tpu.dot_dimension_numbers<[1], [0], [0], [1], [0, 0, 1, 1], [], []>} : vector<72x3456xbf16>, vector<3456x256xbf16>, vector<72x256xf32> -> vector<72x256xf32>
    %7 = arith.addf %3, %6 : vector<72x256xf32>
    %c0_6 = arith.constant 0 : index
    %c0_7 = arith.constant 0 : index
    %8 = vector.load %arg4[%c0_6, %c0_7] : memref<72x256xf32, #tpu.memory_space<vmem>>, vector<72x256xf32>
    tpu.vector_store %arg4[%c0_6, %c0_7], %7 {strides = array<i32>} : memref<72x256xf32, #tpu.memory_space<vmem>>, vector<72x256xf32>,
    %c5_i32 = arith.constant 5 : i32
    %9 = arith.cmpi eq, %arg0, %c5_i32 : i32
    %10 = arith.extui %9 : i1 to i32
    %c0_i32_8 = arith.constant 0 : i32
    %11 = arith.cmpi ne, %10, %c0_i32_8 : i32
    scf.if %11 {
      %c0_9 = arith.constant 0 : index
      %c0_10 = arith.constant 0 : index
      %12 = vector.load %arg4[%c0_9, %c0_10] : memref<72x256xf32, #tpu.memory_space<vmem>>, vector<72x256xf32>
      %c0_11 = arith.constant 0 : index
      %c0_12 = arith.constant 0 : index
      %13 = vector.load %arg3[%c0_11, %c0_12] : memref<1x256xf32, #tpu.memory_space<vmem>>, vector<1x256xf32>
      %14 = vector.broadcast %13 : vector<1x256xf32> to vector<72x256xf32>
      %15 = arith.addf %12, %14 : vector<72x256xf32>
      %16 = tpu.iota {dimensions = array<i32: 0>} : vector<256x8xi32>
      %17 = tpu.iota {dimensions = array<i32: 1>} : vector<256x8xi32>
      %c32_i32 = arith.constant 32 : i32
      %18 = vector.broadcast %c32_i32 : i32 to vector<256x8xi32>
      %19 = arith.muli %17, %18 : vector<256x8xi32>
      %20 = arith.cmpi sge, %16, %19 : vector<256x8xi32>
      %c1_i32 = arith.constant 1 : i32
      %21 = vector.broadcast %c1_i32 : i32 to vector<256x8xi32>
      %22 = arith.addi %17, %21 : vector<256x8xi32>
      %c32_i32_13 = arith.constant 32 : i32
      %23 = vector.broadcast %c32_i32_13 : i32 to vector<256x8xi32>
      %24 = arith.muli %22, %23 : vector<256x8xi32>
      %25 = arith.cmpi slt, %16, %24 : vector<256x8xi32>
      %26 = arith.andi %20, %25 : vector<256x8xi1>
      %27 = arith.extui %26 : vector<256x8xi1> to vector<256x8xi32>
      %28 = arith.sitofp %27 : vector<256x8xi32> to vector<256x8xf32>
      %29 = tpu.iota {dimensions = array<i32: 0>} : vector<8x256xi32>
      %30 = tpu.iota {dimensions = array<i32: 1>} : vector<8x256xi32>
      %c32_i32_14 = arith.constant 32 : i32
      %31 = vector.broadcast %c32_i32_14 : i32 to vector<8x256xi32>
      %32 = arith.muli %29, %31 : vector<8x256xi32>
      %33 = arith.cmpi sge, %30, %32 : vector<8x256xi32>
      %c1_i32_15 = arith.constant 1 : i32
      %34 = vector.broadcast %c1_i32_15 : i32 to vector<8x256xi32>
      %35 = arith.addi %29, %34 : vector<8x256xi32>
      %c32_i32_16 = arith.constant 32 : i32
      %36 = vector.broadcast %c32_i32_16 : i32 to vector<8x256xi32>
      %37 = arith.muli %35, %36 : vector<8x256xi32>
      %38 = arith.cmpi slt, %30, %37 : vector<8x256xi32>
      %39 = arith.andi %33, %38 : vector<8x256xi1>
      %40 = arith.extui %39 : vector<8x256xi1> to vector<8x256xi32>
      %41 = arith.sitofp %40 : vector<8x256xi32> to vector<8x256xf32>
      %42 = tpu.iota {dimensions = array<i32: 0>} : vector<72x2xi32>
      %43 = tpu.iota {dimensions = array<i32: 1>} : vector<72x2xi32>
      %c36_i32 = arith.constant 36 : i32
      %44 = vector.broadcast %c36_i32 : i32 to vector<72x2xi32>
      %45 = arith.muli %43, %44 : vector<72x2xi32>
      %46 = arith.cmpi sge, %42, %45 : vector<72x2xi32>
      %c1_i32_17 = arith.constant 1 : i32
      %47 = vector.broadcast %c1_i32_17 : i32 to vector<72x2xi32>
      %48 = arith.addi %43, %47 : vector<72x2xi32>
      %c36_i32_18 = arith.constant 36 : i32
      %49 = vector.broadcast %c36_i32_18 : i32 to vector<72x2xi32>
      %50 = arith.muli %48, %49 : vector<72x2xi32>
      %51 = arith.cmpi slt, %42, %50 : vector<72x2xi32>
      %52 = arith.andi %46, %51 : vector<72x2xi1>
      %53 = arith.extui %52 : vector<72x2xi1> to vector<72x2xi32>
      %54 = arith.sitofp %53 : vector<72x2xi32> to vector<72x2xf32>
      %55 = tpu.iota {dimensions = array<i32: 0>} : vector<2x72xi32>
      %56 = tpu.iota {dimensions = array<i32: 1>} : vector<2x72xi32>
      %c36_i32_19 = arith.constant 36 : i32
      %57 = vector.broadcast %c36_i32_19 : i32 to vector<2x72xi32>
      %58 = arith.muli %55, %57 : vector<2x72xi32>
      %59 = arith.cmpi sge, %56, %58 : vector<2x72xi32>
      %c1_i32_20 = arith.constant 1 : i32
      %60 = vector.broadcast %c1_i32_20 : i32 to vector<2x72xi32>
      %61 = arith.addi %55, %60 : vector<2x72xi32>
      %c36_i32_21 = arith.constant 36 : i32
      %62 = vector.broadcast %c36_i32_21 : i32 to vector<2x72xi32>
      %63 = arith.muli %61, %62 : vector<2x72xi32>
      %64 = arith.cmpi slt, %56, %63 : vector<2x72xi32>
      %65 = arith.andi %59, %64 : vector<2x72xi1>
      %66 = arith.extui %65 : vector<2x72xi1> to vector<2x72xi32>
      %67 = arith.sitofp %66 : vector<2x72xi32> to vector<2x72xf32>
      %68 = arith.mulf %15, %15 : vector<72x256xf32>
      %cst_22 = arith.constant dense<0.000000e+00> : vector<72x8xf32>
      %69 = tpu.matmul %68, %28, %cst_22 {dimension_numbers = #tpu.dot_dimension_numbers<[1], [0], [0], [1], [0, 0, 1, 1], [], []>} : vector<72x256xf32>, vector<256x8xf32>, vector<72x8xf32> -> vector<72x8xf32>
      %cst_23 = arith.constant dense<0.000000e+00> : vector<2x8xf32>
      %70 = tpu.matmul %67, %69, %cst_23 {dimension_numbers = #tpu.dot_dimension_numbers<[1], [0], [0], [1], [0, 0, 1, 1], [], []>} : vector<2x72xf32>, vector<72x8xf32>, vector<2x8xf32> -> vector<2x8xf32>
      %71 = math.sqrt %70 : vector<2x8xf32>
      %cst_24 = arith.constant 1.000000e+00 : f32
      %72 = vector.broadcast %cst_24 : f32 to vector<2x8xf32>
      %73 = arith.addf %72, %70 : vector<2x8xf32>
      %74 = arith.divf %71, %73 : vector<2x8xf32>
      %cst_25 = arith.constant dense<0.000000e+00> : vector<72x8xf32>
      %75 = tpu.matmul %54, %74, %cst_25 {dimension_numbers = #tpu.dot_dimension_numbers<[1], [0], [0], [1], [0, 0, 1, 1], [], []>} : vector<72x2xf32>, vector<2x8xf32>, vector<72x8xf32> -> vector<72x8xf32>
      %cst_26 = arith.constant dense<0.000000e+00> : vector<72x256xf32>
      %76 = tpu.matmul %75, %41, %cst_26 {dimension_numbers = #tpu.dot_dimension_numbers<[1], [0], [0], [1], [0, 0, 1, 1], [], []>} : vector<72x8xf32>, vector<8x256xf32>, vector<72x256xf32> -> vector<72x256xf32>
      %77 = arith.mulf %15, %76 : vector<72x256xf32>
      %c0_27 = arith.constant 0 : index
      %c0_28 = arith.constant 0 : index
      %78 = vector.load %arg4[%c0_27, %c0_28] : memref<72x256xf32, #tpu.memory_space<vmem>>, vector<72x256xf32>
      tpu.vector_store %arg4[%c0_27, %c0_28], %77 {strides = array<i32>} : memref<72x256xf32, #tpu.memory_space<vmem>>, vector<72x256xf32>,
    } else {
    }
    return
  }
  func.func @transform_0(%arg0: i32) -> (i32, i32) {
    %c0_i32 = arith.constant 0 : i32
    %c0_i32_0 = arith.constant 0 : i32
    return %c0_i32, %arg0 : i32, i32
  }
  func.func @transform_1(%arg0: i32) -> (i32, i32) {
    %c0_i32 = arith.constant 0 : i32
    %c0_i32_0 = arith.constant 0 : i32
    return %arg0, %c0_i32 : i32, i32
  }
  func.func @transform_2(%arg0: i32) -> (i32, i32) {
    %c0_i32 = arith.constant 0 : i32
    %c0_i32_0 = arith.constant 0 : i32
    %c0_i32_1 = arith.constant 0 : i32
    return %c0_i32, %c0_i32_0 : i32, i32
  }
  func.func @transform_3(%arg0: i32) -> (i32, i32) {
    %c0_i32 = arith.constant 0 : i32
    %c0_i32_0 = arith.constant 0 : i32
    %c0_i32_1 = arith.constant 0 : i32
    return %c0_i32, %c0_i32_0 : i32, i32
  }
}

</mosaic_0001>

<bundles_post_ra>
// kernel: primary_caps_forward.1
= control target key start
LH: loop header
LB: loop body
LE: loop exit
PB: predicated region body
PF: predicated region fallthrough
CT: control target
= control target key end

     0   :  { %8 = vsyncpa [#allocation3], 0  ;;  %s9141_s0 = inlined_call_operand.hbm [shape: bf16[72,20736], index: 0, kind: input, shape index: {}]   ;;  %s9142_s1 = inlined_call_operand.vmem [shape: bf16[20736,256], index: 1, kind: input, shape index: {}]   ;;  %s9143_s2 = inlined_call_operand.vmem [shape: f32[1,256], index: 2, kind: input, shape index: {}]   ;;  %s9144_s3 = inlined_call_operand.vmem [shape: f32[72,256], index: 3, kind: output, shape index: {}]  }
   0x1   :  { %10 = vsyncpa [#allocation3 + $0x1], 0  ;;  %s7722_s12 = smov 0   ;;  %s7724_s13 = smov 0  }
   0x2   :  { %s7726_s14 = smov 0   ;;  %s7728_s15 = smov 0  }
   0x3 LB: > { %s7741_s16 = sadd.s32 4294967295, %s7689_s15   ;;  %s7744_s17 = sadd.s32 1, %s7689_s15   ;;  %s7689_s15 = sphi %s7728_s15, %s9158_s15   ;;  %s7685_s14 = sphi %s7726_s14, %s9157_s14   ;;  %s7681_s13 = sphi %s7724_s13, %s9156_s13   ;;  %s7677_s12 = sphi %s7722_s12, %s9155_s12  }
   0x4   : > { %s20_s18 = ssub.s32 %s7689_s15, %s7744_s17  ;;  %s23_s19 = sadd.s32 1, %s7685_s14 }
   0x5   : > { %p21_p0 = scmp.eq.s32.totalorder %s20_s18, 0  ;;  %p30_p1 = scmp.ne.s32.totalorder %s7685_s14, %s7681_s13 }
   0x6   : > { %p31_p2 = scmp.eq.s32.totalorder %s7689_s15, 0  ;;  %p36_p3 = scmp.ne.s32.totalorder %s7681_s13, %s7677_s12 }
   0x7   : > { %s7754_s20 = scalar_select %p21_p0, %s7685_s14, %s23_s19  }
   0x8   : > { %p32_p4 = por %p31_p2, %p30_p1  ;;  %p37_p5 = scmp.eq.s32.totalorder %s7741_s16, 0 }
   0x9   : > { %p6743_p6 = scmp.lt.s32.totalorder %s7689_s15, 6  ;;  %s131_s22 = sand.u32 1, %s7685_s14  }
   0xa   : > { %p7758_p7 = por %p37_p5, %p36_p3  ;;  %s6735_s23 = smul.u32 972, %s131_s22 }
   0xb   : > { %s6352_s24 = smul.u32 1728, %s7689_s15  ;;  %p7764_p8 = pnand %p6743_p6, %p32_p4 }
   0xc   : > { %s135_s29 = scalar_lea.vmem [#allocation2], %s6735_s23  ;;  %s7775_s4 = scalar_lea.sflag [#allocation3], %s131_s22 }
   0xd   : > { %s7771_s28 = scalar_lea.hbm %s9141_s0, %s6352_s24  ;;  %s142_s30 = sshll.u32 %s135_s29, 4  ;;  %s7773_s30 = int_to_ptr.vmem [resolvable:$true] %s142_s30 }
   0xe   : > { %s7625_s5 = scalar_lea.hbm %s7771_s28, 15552  ;;  %p7627_p10 = pneg %p7764_p8 }
   0xf   : > { %p7626_p9 = scmp.ne.s32.totalorder %s7771_s28, %s7625_s5  ;;  %s7630_s8 = scalar_lea.hbm %s9141_s0, 93312 }
  0x10   : > { %p7631_p13 = scmp.lt.u32.totalorder %s7771_s28, %s9141_s0  ;;  %p7632_p0 = scmp.lt.u32.totalorder %s7630_s8, %s7625_s5 }
  0x11   : > { %p7628_p11 = pnand %p7627_p10, %p7626_p9  ;;  %p7634_p2 = scmp.lt.u32.totalorder %s7625_s5, %s7771_s28 }
  0x12   : > { %p7633_p1 = por %p7632_p0, %p7631_p13 }
  0x13   : > { %p7629_p12 = pneg %p7628_p11 }
  0x14   : > { %p7635_p3 = por %p7634_p2, %p7633_p1 }
  0x16   : > { %p7636_p4 = pnand %p7635_p3, %p7629_p12 }
  0x18   : > { %7639 = shalt.err (!%p7636_p4)
}
  0x19   : > { %s7640_s11 = scalar_lea.vmem %s7773_s30, 15552  ;;  %s7691_s12 = smov [#allocation2]  }
  0x1a   : > { %p7641_p5 = scmp.ne.s32.totalorder %s7773_s30, %s7640_s11  ;;  %s7645_s18 = sshll.u32 %s7691_s12, 4  ;;  %s7646_s18 = int_to_ptr.vmem [resolvable:$false] %s7645_s18 }
  0x1b   : > { %s7647_s19 = scalar_lea.vmem %s7646_s18, 31104  ;;  %p7648_p11 = scmp.lt.s32.totalorder %s7773_s30, %s7646_s18 }
  0x1c   : > { %p7643_p6 = pnand %p7641_p5, %p7627_p10  ;;  %p7649_p13 = scmp.lt.s32.totalorder %s7647_s19, %s7640_s11 }
  0x1e   : > { %p7644_p9 = pneg %p7643_p6  ;;  %p7650_p0 = por %p7649_p13, %p7648_p11 }
  0x20   : > { %p7651_p1 = pnand %p7650_p0, %p7644_p9 }
  0x22   : > { %7654 = shalt.err (!%p7651_p1)
}
  0x23   : > { %s7692_s22 = smov 10368   ;;  %s7693_s23 = smov 1728  }
  0x24   : > { %s7694_s24 = smov 108   ;;  %p5680_p10 = scmp.ge.s32.totalorder %s7689_s15, 1 }
  0x25   : > { %6742 = dma.hbm_to_vmem [thread:$0]  (!%p7764_p8), %s7771_s28, 15552, %s7773_s30, %s7775_s4, %s7692_s22, %s7693_s23, %s7694_s24  }
  0x26   : > { %p160_p12 = scmp.lt.s32.totalorder %s7689_s15, 7 }
  0x28   : > { %p161_p2 = pnand %p5680_p10, %p160_p12 }
  0x29   : > { %s166_s26 = sand.u32 (!%p161_p2), 1, %s7681_s13  }
  0x2a   : > { %164 = sbr.rel (%p161_p2) target bundleno = 1764 (0x6e4), region = 32  ;;  %s167_s29 = scalar_lea.sflag (!%p161_p2), [#allocation3], %s166_s26 }
  0x2b   : > { %s6736_s27 = smul.u32 (!%p161_p2), 972, %s166_s26 }
  0x2d   : > { %s7806_s5 = scalar_lea.vmem (!%p161_p2), [#allocation2], %s6736_s27 }
  0x31   : > { %7672 = dma.done.wait (%p7758_p7), %s167_s29, 15552  }
  0x32   : > { %7674 = vsyncadd (%p7758_p7), %s167_s29, 4294951744  ;;  %s195_s6 = smul.u32 432, %s7741_s16  ;;  %p5683_p8 = scmp.ne.s32.totalorder %s7741_s16, 0 }
  0x33   : > { %v7695_v0 = vmov (!%p5683_p8), 0.0  }
  0x34   : > { %p196_p3 = scmp.lt.s32.totalorder %s195_s6, 2591  ;;  %206 = sbr.rel (%p5683_p8) target bundleno = 61 (0x3d), region = 40  ;;  %207 = vst [vmem:[%s9144_s3] sm:$0xff] (!%p5683_p8), %v7695_v0  ;;  %208 = vst [vmem:[%s9144_s3 + $0x8] sm:$0xff] (!%p5683_p8), %v7695_v0 }
  0x35   : > { %209 = vst [vmem:[%s9144_s3 + $0x10] sm:$0xff] (!%p5683_p8), %v7695_v0  ;;  %210 = vst [vmem:[%s9144_s3 + $0x18] sm:$0xff] (!%p5683_p8), %v7695_v0 }
  0x36   : > { %s9160_s6 = smov (!%p196_p3, %s195_s6), 2591  ;;  %211 = vst [vmem:[%s9144_s3 + $0x20] sm:$0xff] (!%p5683_p8), %v7695_v0  ;;  %212 = vst [vmem:[%s9144_s3 + $0x28] sm:$0xff] (!%p5683_p8), %v7695_v0 }
  0x37   : > { %s6353_s25 = sshll.u32 %s9160_s6, 3  ;;  %213 = vst [vmem:[%s9144_s3 + $0x30] sm:$0xff] (!%p5683_p8), %v7695_v0  ;;  %214 = vst [vmem:[%s9144_s3 + $0x38] sm:$0xff] (!%p5683_p8), %v7695_v0 }
  0x38   : > { %s7816_s30 = scalar_lea.vmem %s9142_s1, %s6353_s25  ;;  %215 = vst [vmem:[%s9144_s3 + $0x40] sm:$0xff] (!%p5683_p8), %v7695_v0  ;;  %216 = vst [vmem:[%s9144_s3 + $0x48] sm:$0xff] (!%p5683_p8), %v7695_v0 }
  0x39   : > { %217 = vst [vmem:[%s9144_s3 + $0x50] sm:$0xff] (!%p5683_p8), %v7695_v0  ;;  %218 = vst [vmem:[%s9144_s3 + $0x58] sm:$0xff] (!%p5683_p8), %v7695_v0 }
  0x3a   : > { %219 = vst [vmem:[%s9144_s3 + $0x60] sm:$0xff] (!%p5683_p8), %v7695_v0  ;;  %220 = vst [vmem:[%s9144_s3 + $0x68] sm:$0xff] (!%p5683_p8), %v7695_v0 }
  0x3b   : > { %221 = vst [vmem:[%s9144_s3 + $0x70] sm:$0xff] %v7695_v0  ;;  %222 = vst [vmem:[%s9144_s3 + $0x78] sm:$0xff] %v7695_v0 }
  0x3c   : > { %223 = vst [vmem:[%s9144_s3 + $0x80] sm:$0xff] %v7695_v0  ;;  %224 = vst [vmem:[%s9144_s3 + $0x88] sm:$0xff] %v7695_v0 }
  0x3d PF: > { %v6786_v1 = vld [vmem:[%s7816_s30 + $0x4] ss:$8 sps:$4 sm:$0xff]   ;;  %v6790_v3 = vld [vmem:[%s7816_s30] ss:$8 sps:$4 sm:$0xff]   ;;  %v6792_v5 = vld [vmem:[%s7816_s30 + $0x14] ss:$8 sps:$4 sm:$0xff]  }
  0x3e   : > { %v6788_v2 = vld [vmem:[%s7816_s30 + $0x704] ss:$8 sps:$4 sm:$0xff]   ;;  %3600 = vmatprep.subr.bf16.mxu1 %v6786_v1  ;;  %v6791_v4 = vld [vmem:[%s7816_s30 + $0x700] ss:$8 sps:$4 sm:$0xff]   ;;  %v6794_v6 = vld [vmem:[%s7816_s30 + $0x714] ss:$8 sps:$4 sm:$0xff]  }
  0x3f   : > { %4167 = vmatprep.subr.bf16.mxu0 %v6788_v2  ;;  %3601 = vmatpush1.bf16.msra.mxu1 %v6790_v3  ;;  %v6796_v7 = vld [vmem:[%s7816_s30 + $0x10] ss:$8 sps:$4 sm:$0xff]   ;;  %v6798_v9 = vld [vmem:[%s7816_s30 + $0x24] ss:$8 sps:$4 sm:$0xff]   ;;  %v6802_v11 = vld [vmem:[%s7816_s30 + $0x20] ss:$8 sps:$4 sm:$0xff]  }
  0x40   : > { %4168 = vmatpush1.bf16.msra.mxu0 %v6791_v4  ;;  %3602 = vmatprep.subr.bf16.mxu1 %v6792_v5  ;;  %v6797_v8 = vld [vmem:[%s7816_s30 + $0x710] ss:$8 sps:$4 sm:$0xff]   ;;  %v6800_v10 = vld [vmem:[%s7816_s30 + $0x724] ss:$8 sps:$4 sm:$0xff]   ;;  %v6803_v12 = vld [vmem:[%s7816_s30 + $0x720] ss:$8 sps:$4 sm:$0xff]  }
  0x41   : > { %4169 = vmatprep.subr.bf16.mxu0 %v6794_v6  ;;  %v6804_v13 = vld [vmem:[%s7816_s30 + $0x34] ss:$8 sps:$4 sm:$0xff]   ;;  %v6808_v15 = vld [vmem:[%s7816_s30 + $0x30] ss:$8 sps:$4 sm:$0xff]   ;;  %v6810_v17 = vld [vmem:[%s7816_s30 + $0x44] ss:$8 sps:$4 sm:$0xff]  }
  0x42   : > { %v6806_v14 = vld [vmem:[%s7816_s30 + $0x734] ss:$8 sps:$4 sm:$0xff]   ;;  %v6809_v16 = vld [vmem:[%s7816_s30 + $0x730] ss:$8 sps:$4 sm:$0xff]   ;;  %v6812_v18 = vld [vmem:[%s7816_s30 + $0x744] ss:$8 sps:$4 sm:$0xff]  }
  0x43   : > { %3603 = vmatpush1.bf16.msra.mxu1 %v6796_v7  ;;  %v6814_v19 = vld [vmem:[%s7816_s30 + $0x40] ss:$8 sps:$4 sm:$0xff]   ;;  %v6816_v21 = vld [vmem:[%s7816_s30 + $0x54] ss:$8 sps:$4 sm:$0xff]   ;;  %v6820_v23 = vld [vmem:[%s7816_s30 + $0x50] ss:$8 sps:$4 sm:$0xff]  }
  0x44   : > { %4170 = vmatpush1.bf16.msra.mxu0 %v6797_v8  ;;  %3604 = vmatprep.subr.bf16.mxu1 %v6798_v9  ;;  %v6815_v20 = vld [vmem:[%s7816_s30 + $0x740] ss:$8 sps:$4 sm:$0xff]   ;;  %v6818_v22 = vld [vmem:[%s7816_s30 + $0x754] ss:$8 sps:$4 sm:$0xff]   ;;  %v6821_v24 = vld [vmem:[%s7816_s30 + $0x750] ss:$8 sps:$4 sm:$0xff]  }
  0x45   : > { %4171 = vmatprep.subr.bf16.mxu0 %v6800_v10  ;;  %v6822_v25 = vld [vmem:[%s7816_s30 + $0x64] ss:$8 sps:$4 sm:$0xff]   ;;  %v6826_v27 = vld [vmem:[%s7816_s30 + $0x60] ss:$8 sps:$4 sm:$0xff]   ;;  %v6828_v29 = vld [vmem:[%s7816_s30 + $0x74] ss:$8 sps:$4 sm:$0xff]  }
  0x46   : > { %v6824_v26 = vld [vmem:[%s7816_s30 + $0x764] ss:$8 sps:$4 sm:$0xff]   ;;  %v6827_v28 = vld [vmem:[%s7816_s30 + $0x760] ss:$8 sps:$4 sm:$0xff]   ;;  %v6830_v30 = vld [vmem:[%s7816_s30 + $0x774] ss:$8 sps:$4 sm:$0xff]  }
  0x47   : > { %3605 = vmatpush1.bf16.msra.mxu1 %v6802_v11  ;;  %v6832_v31 = vld [vmem:[%s7816_s30 + $0x70] ss:$8 sps:$4 sm:$0xff]   ;;  %v6834_v33 = vld [vmem:[%s7816_s30 + $0x84] ss:$8 sps:$4 sm:$0xff]   ;;  %v6838_v35 = vld [vmem:[%s7816_s30 + $0x80] ss:$8 sps:$4 sm:$0xff]  }
  0x48   : > { %4172 = vmatpush1.bf16.msra.mxu0 %v6803_v12  ;;  %3606 = vmatprep.subr.bf16.mxu1 %v6804_v13  ;;  %v6833_v32 = vld [vmem:[%s7816_s30 + $0x770] ss:$8 sps:$4 sm:$0xff]   ;;  %v6836_v34 = vld [vmem:[%s7816_s30 + $0x784] ss:$8 sps:$4 sm:$0xff]   ;;  %v6839_v36 = vld [vmem:[%s7816_s30 + $0x780] ss:$8 sps:$4 sm:$0xff]  }
  0x49   : > { %4173 = vmatprep.subr.bf16.mxu0 %v6806_v14  ;;  %v6840_v37 = vld [vmem:[%s7816_s30 + $0x94] ss:$8 sps:$4 sm:$0xff]   ;;  %v6844_v39 = vld [vmem:[%s7816_s30 + $0x90] ss:$8 sps:$4 sm:$0xff]   ;;  %v6846_v41 = vld [vmem:[%s7816_s30 + $0xa4] ss:$8 sps:$4 sm:$0xff]  }
  0x4a   : > { %v6842_v38 = vld [vmem:[%s7816_s30 + $0x794] ss:$8 sps:$4 sm:$0xff]   ;;  %v6845_v40 = vld [vmem:[%s7816_s30 + $0x790] ss:$8 sps:$4 sm:$0xff]   ;;  %v6848_v42 = vld [vmem:[%s7816_s30 + $0x7a4] ss:$8 sps:$4 sm:$0xff]  }
  0x4b   : > { %3607 = vmatpush1.bf16.msra.mxu1 %v6808_v15  ;;  %v6850_v43 = vld [vmem:[%s7816_s30 + $0xa0] ss:$8 sps:$4 sm:$0xff]   ;;  %v6852_v45 = vld [vmem:[%s7816_s30 + $0xb4] ss:$8 sps:$4 sm:$0xff]   ;;  %v6856_v47 = vld [vmem:[%s7816_s30 + $0xb0] ss:$8 sps:$4 sm:$0xff]  }
  0x4c   : > { %4174 = vmatpush1.bf16.msra.mxu0 %v6809_v16  ;;  %3608 = vmatprep.subr.bf16.mxu1 %v6810_v17  ;;  %v6851_v44 = vld [vmem:[%s7816_s30 + $0x7a0] ss:$8 sps:$4 sm:$0xff]   ;;  %v6854_v46 = vld [vmem:[%s7816_s30 + $0x7b4] ss:$8 sps:$4 sm:$0xff]   ;;  %v6857_v48 = vld [vmem:[%s7816_s30 + $0x7b0] ss:$8 sps:$4 sm:$0xff]  }
  0x4d   : > { %4175 = vmatprep.subr.bf16.mxu0 %v6812_v18  ;;  %v6884_v49 = vld [vmem:[%s7806_s5 + $0x4] ss:$108 sps:$4 sm:$0xff]   ;;  %v6890_v52 = vld [vmem:[%s7806_s5 + $0x3c] ss:$108 sps:$4 sm:$0xff]   ;;  %v6882_v5 = vld [vmem:[%s7806_s5] ss:$108 sps:$4 sm:$0xff]  }
  0x4e   : > { %v6858_v50 = vld [vmem:[%s7816_s30 + $0xc4] ss:$8 sps:$4 sm:$0xff]   ;;  %3632 = vmatprep.mubr.bf16.mxu1 %v6884_v49  ;;  %v6862_v53 = vld [vmem:[%s7816_s30 + $0xc0] ss:$8 sps:$4 sm:$0xff]   ;;  %v6864_v55 = vld [vmem:[%s7816_s30 + $0xd4] ss:$8 sps:$4 sm:$0xff]   ;;  %4199 = vmatprep.mubr.bf16.mxu0 %v6890_v52 }
  0x4f   : > { %3609 = vmatpush1.bf16.msra.mxu1 %v6814_v19  ;;  %v6860_v51 = vld [vmem:[%s7816_s30 + $0x7c4] ss:$8 sps:$4 sm:$0xff]   ;;  %v6863_v54 = vld [vmem:[%s7816_s30 + $0x7c0] ss:$8 sps:$4 sm:$0xff]   ;;  %v6866_v56 = vld [vmem:[%s7816_s30 + $0x7d4] ss:$8 sps:$4 sm:$0xff]  }
  0x50   : > { %4176 = vmatpush1.bf16.msra.mxu0 %v6815_v20  ;;  %3610 = vmatprep.subr.bf16.mxu1 %v6816_v21  ;;  %v6868_v57 = vld [vmem:[%s7816_s30 + $0xd0] ss:$8 sps:$4 sm:$0xff]   ;;  %v6870_v59 = vld [vmem:[%s7816_s30 + $0xe4] ss:$8 sps:$4 sm:$0xff]   ;;  %v6874_v61 = vld [vmem:[%s7816_s30 + $0xe0] ss:$8 sps:$4 sm:$0xff]  }
  0x51   : > { %4177 = vmatprep.subr.bf16.mxu0 %v6818_v22  ;;  %v6869_v58 = vld [vmem:[%s7816_s30 + $0x7d0] ss:$8 sps:$4 sm:$0xff]   ;;  %v6872_v60 = vld [vmem:[%s7816_s30 + $0x7e4] ss:$8 sps:$4 sm:$0xff]   ;;  %v6875_v62 = vld [vmem:[%s7816_s30 + $0x7e0] ss:$8 sps:$4 sm:$0xff]  }
  0x52   : > { %v6876_v63 = vld [vmem:[%s7816_s30 + $0xf4] ss:$8 sps:$4 sm:$0xff]   ;;  %v6880_v1 = vld [vmem:[%s7816_s30 + $0xf0] ss:$8 sps:$4 sm:$0xff]   ;;  %v6887_v3 = vld [vmem:[%s7816_s30 + $0x104] ss:$8 sps:$4 sm:$0xff]  }
  0x53   : > { %3611 = vmatpush1.bf16.msra.mxu1 %v6820_v23  ;;  %v6878_v0 = vld [vmem:[%s7816_s30 + $0x7f4] ss:$8 sps:$4 sm:$0xff]   ;;  %v6881_v2 = vld [vmem:[%s7816_s30 + $0x7f0] ss:$8 sps:$4 sm:$0xff]   ;;  %v6893_v4 = vld [vmem:[%s7816_s30 + $0x804] ss:$8 sps:$4 sm:$0xff]  }
  0x54   : > { %4178 = vmatpush1.bf16.msra.mxu0 %v6821_v24  ;;  %3612 = vmatprep.subr.bf16.mxu1 %v6822_v25  ;;  %v6885_v6 = vld [vmem:[%s7816_s30 + $0x100] ss:$8 sps:$4 sm:$0xff]   ;;  %v6888_v7 = vld [vmem:[%s7806_s5 + $0x38] ss:$108 sps:$4 sm:$0xff]   ;;  %v6896_v9 = vld [vmem:[%s7816_s30 + $0x114] ss:$8 sps:$4 sm:$0xff]  }
  0x55   : > { %4179 = vmatprep.subr.bf16.mxu0 %v6824_v26  ;;  %v6891_v8 = vld [vmem:[%s7816_s30 + $0x800] ss:$8 sps:$4 sm:$0xff]   ;;  %v6899_v10 = vld [vmem:[%s7816_s30 + $0x814] ss:$8 sps:$4 sm:$0xff]   ;;  %v6894_v11 = vld [vmem:[%s7816_s30 + $0x110] ss:$8 sps:$4 sm:$0xff]  }
  0x56   : > { %v6897_v12 = vld [vmem:[%s7816_s30 + $0x810] ss:$8 sps:$4 sm:$0xff]   ;;  %v6936_v13 = vld [vmem:[%s7806_s5 + $0xdc] ss:$108 sps:$4 sm:$0xff]   ;;  %v6902_v14 = vld [vmem:[%s7816_s30 + $0x124] ss:$8 sps:$4 sm:$0xff]  }
  0x57   : > { %3613 = vmatpush1.bf16.msra.mxu1 %v6826_v27  ;;  %v6905_v15 = vld [vmem:[%s7816_s30 + $0x824] ss:$8 sps:$4 sm:$0xff]   ;;  %v6900_v16 = vld [vmem:[%s7816_s30 + $0x120] ss:$8 sps:$4 sm:$0xff]   ;;  %v6908_v21 = vld [vmem:[%s7816_s30 + $0x134] ss:$8 sps:$4 sm:$0xff]  }
  0x58   : > { %4180 = vmatpush1.bf16.msra.mxu0 %v6827_v28  ;;  %3614 = vmatprep.subr.bf16.mxu1 %v6828_v29  ;;  %v6942_v17 = vld [vmem:[%s7806_s5 + $0x114] ss:$108 sps:$4 sm:$0xff]   ;;  %v6938_v19 = vld [vmem:[%s7806_s5 + $0xd8] ss:$108 sps:$4 sm:$0xff]   ;;  %v6947_v20 = vld [vmem:[%s7806_s5 + $0x110] ss:$108 sps:$4 sm:$0xff]  }
  0x59   : > { %4181 = vmatprep.subr.bf16.mxu0 %v6830_v30  ;;  %v6903_v18 = vld [vmem:[%s7816_s30 + $0x820] ss:$8 sps:$4 sm:$0xff]   ;;  %v6911_v22 = vld [vmem:[%s7816_s30 + $0x834] ss:$8 sps:$4 sm:$0xff]   ;;  %v6906_v23 = vld [vmem:[%s7816_s30 + $0x130] ss:$8 sps:$4 sm:$0xff]  }
  0x5a   : > { %v6909_v24 = vld [vmem:[%s7816_s30 + $0x830] ss:$8 sps:$4 sm:$0xff]   ;;  %v6954_v25 = vld [vmem:[%s7806_s5 + $0x1b4] ss:$108 sps:$4 sm:$0xff]   ;;  %p6251_p7 = scmp.ne.s32.totalorder %s7741_s16, 5 }
  0x5b   : > { %3615 = vmatpush1.bf16.msra.mxu1 %v6832_v31  ;;  %v6914_v26 = vld [vmem:[%s7816_s30 + $0x144] ss:$8 sps:$4 sm:$0xff]   ;;  %v6912_v28 = vld [vmem:[%s7816_s30 + $0x140] ss:$8 sps:$4 sm:$0xff]  }
  0x5c   : > { %4182 = vmatpush1.bf16.msra.mxu0 %v6833_v32  ;;  %3616 = vmatprep.subr.bf16.mxu1 %v6834_v33  ;;  %v6917_v27 = vld [vmem:[%s7816_s30 + $0x844] ss:$8 sps:$4 sm:$0xff]   ;;  %v6915_v30 = vld [vmem:[%s7816_s30 + $0x840] ss:$8 sps:$4 sm:$0xff]   ;;  %v6920_v33 = vld [vmem:[%s7816_s30 + $0x154] ss:$8 sps:$4 sm:$0xff]  }
  0x5d   : > { %4183 = vmatprep.subr.bf16.mxu0 %v6836_v34  ;;  %v6960_v29 = vld [vmem:[%s7806_s5 + $0x1ec] ss:$108 sps:$4 sm:$0xff]   ;;  %v6956_v31 = vld [vmem:[%s7806_s5 + $0x1b0] ss:$108 sps:$4 sm:$0xff]   ;;  %v6965_v32 = vld [vmem:[%s7806_s5 + $0x1e8] ss:$108 sps:$4 sm:$0xff]  }
  0x5e   : > { %v6923_v34 = vld [vmem:[%s7816_s30 + $0x854] ss:$8 sps:$4 sm:$0xff]   ;;  %v6941_v52 = vld [vmem:[%s7816_s30 + $0x184] ss:$8 sps:$4 sm:$0xff]  }
  0x5f   : > { %3617 = vmatpush1.bf16.msra.mxu1 %v6838_v35  ;;  %v6918_v35 = vld [vmem:[%s7816_s30 + $0x150] ss:$8 sps:$4 sm:$0xff]  }
  0x60   : > { %4184 = vmatpush1.bf16.msra.mxu0 %v6839_v36  ;;  %3618 = vmatprep.subr.bf16.mxu1 %v6840_v37  ;;  %v6921_v36 = vld [vmem:[%s7816_s30 + $0x850] ss:$8 sps:$4 sm:$0xff]  }
  0x61   : > { %4185 = vmatprep.subr.bf16.mxu0 %v6842_v38  ;;  %v6972_v37 = vld [vmem:[%s7806_s5 + $0x28c] ss:$108 sps:$4 sm:$0xff]  }
  0x62   : > { %v6926_v38 = vld [vmem:[%s7816_s30 + $0x164] ss:$8 sps:$4 sm:$0xff]  }
  0x63   : > { %3619 = vmatpush1.bf16.msra.mxu1 %v6844_v39  ;;  %v6929_v39 = vld [vmem:[%s7816_s30 + $0x864] ss:$8 sps:$4 sm:$0xff]  }
  0x64   : > { %4186 = vmatpush1.bf16.msra.mxu0 %v6845_v40  ;;  %3620 = vmatprep.subr.bf16.mxu1 %v6846_v41  ;;  %v6924_v40 = vld [vmem:[%s7816_s30 + $0x160] ss:$8 sps:$4 sm:$0xff]   ;;  %v6978_v41 = vld [vmem:[%s7806_s5 + $0x2c4] ss:$108 sps:$4 sm:$0xff]  }
  0x65   : > { %4187 = vmatprep.subr.bf16.mxu0 %v6848_v42  ;;  %v6927_v42 = vld [vmem:[%s7816_s30 + $0x860] ss:$8 sps:$4 sm:$0xff]  }
  0x67   : > { %3621 = vmatpush1.bf16.msra.mxu1 %v6850_v43  ;;  %v6974_v43 = vld [vmem:[%s7806_s5 + $0x288] ss:$108 sps:$4 sm:$0xff]  }
  0x68   : > { %4188 = vmatpush1.bf16.msra.mxu0 %v6851_v44  ;;  %3622 = vmatprep.subr.bf16.mxu1 %v6852_v45  ;;  %v6983_v44 = vld [vmem:[%s7806_s5 + $0x2c0] ss:$108 sps:$4 sm:$0xff]   ;;  %v6932_v45 = vld [vmem:[%s7816_s30 + $0x174] ss:$8 sps:$4 sm:$0xff]  }
  0x69   : > { %4189 = vmatprep.subr.bf16.mxu0 %v6854_v46  ;;  %v6935_v46 = vld [vmem:[%s7816_s30 + $0x874] ss:$8 sps:$4 sm:$0xff]  }
  0x6b   : > { %3623 = vmatpush1.bf16.msra.mxu1 %v6856_v47  ;;  %v355_v47 = vld [vmem:[%s7806_s5 + $0x360] sm:$0xff] }
  0x6c   : > { %4190 = vmatpush1.bf16.msra.mxu0 %v6857_v48  ;;  %3624 = vmatprep.subr.bf16.mxu1 %v6858_v50  ;;  %v6930_v48 = vld [vmem:[%s7816_s30 + $0x170] ss:$8 sps:$4 sm:$0xff]   ;;  %v5793_v49 = vcombine.high %v355_v47, %v355_v47 }
  0x6d   : > { %4191 = vmatprep.subr.bf16.mxu0 %v6860_v51  ;;  %v6933_v50 = vld [vmem:[%s7816_s30 + $0x870] ss:$8 sps:$4 sm:$0xff]  }
  0x6e   : > { %v362_v51 = vld [vmem:[%s7806_s5 + $0x398] sm:$0xff] }
  0x6f   : > { %3625 = vmatpush1.bf16.msra.mxu1 %v6862_v53  ;;  %v6946_v53 = vld [vmem:[%s7816_s30 + $0x884] ss:$8 sps:$4 sm:$0xff]  }
  0x70   : > { %4192 = vmatpush1.bf16.msra.mxu0 %v6863_v54  ;;  %3626 = vmatprep.subr.bf16.mxu1 %v6864_v55  ;;  %v5807_v54 = vcombine.high %v362_v51, %v362_v51  ;;  %v5792_v55 = vcombine.low %v355_v47, %v355_v47  ;;  %v7033_v47 = vld [vmem:[%s7816_s30 + $0x230] ss:$8 sps:$4 sm:$0xff]  }
  0x71   : > { %4193 = vmatprep.subr.bf16.mxu0 %v6866_v56  ;;  %v5806_v56 = vcombine.low %v362_v51, %v362_v51  ;;  %v7041_v51 = vld [vmem:[%s7806_s5 + $0x1b8] ss:$108 sps:$4 sm:$0xff]  }
  0x73   : > { %3627 = vmatpush1.bf16.msra.mxu1 %v6868_v57  ;;  %v6939_v57 = vld [vmem:[%s7816_s30 + $0x180] ss:$8 sps:$4 sm:$0xff]  }
  0x74   : > { %4194 = vmatpush1.bf16.msra.mxu0 %v6869_v58  ;;  %3628 = vmatprep.subr.bf16.mxu1 %v6870_v59  ;;  %v6944_v58 = vld [vmem:[%s7816_s30 + $0x880] ss:$8 sps:$4 sm:$0xff]   ;;  %v6950_v59 = vld [vmem:[%s7816_s30 + $0x194] ss:$8 sps:$4 sm:$0xff]  }
  0x75   : > { %4195 = vmatprep.subr.bf16.mxu0 %v6872_v60  ;;  %v6953_v60 = vld [vmem:[%s7816_s30 + $0x894] ss:$8 sps:$4 sm:$0xff]  }
  0x77   : > { %3629 = vmatpush1.bf16.msra.mxu1 %v6874_v61  ;;  %v7008_v61 = vld [vmem:[%s7806_s5 + $0xc] ss:$108 sps:$4 sm:$0xff]  }
  0x78   : > { %4196 = vmatpush1.bf16.msra.mxu0 %v6875_v62  ;;  %3630 = vmatprep.subr.bf16.mxu1 %v6876_v63  ;;  %v6948_v62 = vld [vmem:[%s7816_s30 + $0x190] ss:$8 sps:$4 sm:$0xff]  }
  0x79   : > { %4197 = vmatprep.subr.bf16.mxu0 %v6878_v0  ;;  %v6951_v63 = vld [vmem:[%s7816_s30 + $0x890] ss:$8 sps:$4 sm:$0xff]  }
  0x7a   : > { %v7014_v0 = vld [vmem:[%s7806_s5 + $0x44] ss:$108 sps:$4 sm:$0xff]  }
  0x7b   : > { %3631 = vmatpush1.bf16.msra.mxu1 %v6880_v1  ;;  %v6959_v1 = vld [vmem:[%s7816_s30 + $0x1a4] ss:$8 sps:$4 sm:$0xff]  }
  0x7c   : > { %4198 = vmatpush1.bf16.msra.mxu0 %v6881_v2  ;;  %3681 = vmatprep.subr.bf16.mxu1 %v6887_v3  ;;  %v6964_v2 = vld [vmem:[%s7816_s30 + $0x8a4] ss:$8 sps:$4 sm:$0xff]   ;;  %v6957_v3 = vld [vmem:[%s7816_s30 + $0x1a0] ss:$8 sps:$4 sm:$0xff]  }
  0x7d   : > { %4248 = vmatprep.subr.bf16.mxu0 %v6893_v4  ;;  %v6962_v4 = vld [vmem:[%s7816_s30 + $0x8a0] ss:$8 sps:$4 sm:$0xff]  }
  0x7e   : > { %3633 = vmatmul.mubr.bf16.vlgmr.msra.gmra.mrb[0].mxu1 %v6882_v5  ;;  %v6968_v5 = vld [vmem:[%s7816_s30 + $0x1b4] ss:$8 sps:$4 sm:$0xff]  }
  0x7f   : > { %4200 = vmatmul.mubr.bf16.vlgmr.msra.gmra.mrb[0].mxu0 %v6888_v7  ;;  %3682 = vmatpush1.bf16.msra.mxu1 %v6885_v6  ;;  %v6971_v6 = vld [vmem:[%s7816_s30 + $0x8b4] ss:$8 sps:$4 sm:$0xff]   ;;  %v6966_v7 = vld [vmem:[%s7816_s30 + $0x1b0] ss:$8 sps:$4 sm:$0xff]  }
  0x80   : > { %4249 = vmatpush1.bf16.msra.mxu0 %v6891_v8  ;;  %3683 = vmatprep.subr.bf16.mxu1 %v6896_v9  ;;  %v6969_v8 = vld [vmem:[%s7816_s30 + $0x8b0] ss:$8 sps:$4 sm:$0xff]   ;;  %v6977_v9 = vld [vmem:[%s7816_s30 + $0x1c4] ss:$8 sps:$4 sm:$0xff]  }
  0x81   : > { %4250 = vmatprep.subr.bf16.mxu0 %v6899_v10  ;;  %3642 = vmatprep.mubr.bf16.mxu1 %v6936_v13  ;;  %v6982_v10 = vld [vmem:[%s7816_s30 + $0x8c4] ss:$8 sps:$4 sm:$0xff]   ;;  %v6986_v13 = vld [vmem:[%s7816_s30 + $0x1d4] ss:$8 sps:$4 sm:$0xff]  }
  0x82   : > { %4209 = vmatprep.mubr.bf16.mxu0 %v6942_v17  ;;  %v6994_v17 = vld [vmem:[%s7816_s30 + $0x1e4] ss:$8 sps:$4 sm:$0xff]  }
  0x83   : > { %3684 = vmatpush1.bf16.msra.mxu1 %v6894_v11  ;;  %v6975_v11 = vld [vmem:[%s7816_s30 + $0x1c0] ss:$8 sps:$4 sm:$0xff]  }
  0x84   : > { %4251 = vmatpush1.bf16.msra.mxu0 %v6897_v12  ;;  %3685 = vmatprep.subr.bf16.mxu1 %v6902_v14  ;;  %v6980_v12 = vld [vmem:[%s7816_s30 + $0x8c0] ss:$8 sps:$4 sm:$0xff]   ;;  %v6989_v14 = vld [vmem:[%s7816_s30 + $0x8d4] ss:$8 sps:$4 sm:$0xff]  }
  0x85   : > { %4252 = vmatprep.subr.bf16.mxu0 %v6905_v15  ;;  %v6984_v15 = vld [vmem:[%s7816_s30 + $0x1d0] ss:$8 sps:$4 sm:$0xff]  }
  0x86   : > { %3643 = vmatmul.mubr.bf16.gmra.mrb[4].mxu1 %v6938_v19  ;;  %v6992_v19 = vld [vmem:[%s7816_s30 + $0x1e0] ss:$8 sps:$4 sm:$0xff]  }
  0x87   : > { %4210 = vmatmul.mubr.bf16.gmra.mrb[4].mxu0 %v6947_v20  ;;  %3686 = vmatpush1.bf16.msra.mxu1 %v6900_v16  ;;  %v6987_v16 = vld [vmem:[%s7816_s30 + $0x8d0] ss:$8 sps:$4 sm:$0xff]   ;;  %v6996_v20 = vld [vmem:[%s7816_s30 + $0x8e0] ss:$8 sps:$4 sm:$0xff]  }
  0x88   : > { %4253 = vmatpush1.bf16.msra.mxu0 %v6903_v18  ;;  %3687 = vmatprep.subr.bf16.mxu1 %v6908_v21  ;;  %v6998_v18 = vld [vmem:[%s7816_s30 + $0x8e4] ss:$8 sps:$4 sm:$0xff]   ;;  %v7002_v21 = vld [vmem:[%s7816_s30 + $0x1f4] ss:$8 sps:$4 sm:$0xff]  }
  0x89   : > { %4254 = vmatprep.subr.bf16.mxu0 %v6911_v22  ;;  %3652 = vmatprep.mubr.bf16.mxu1 %v6954_v25  ;;  %v7005_v22 = vld [vmem:[%s7816_s30 + $0x8f4] ss:$8 sps:$4 sm:$0xff]   ;;  %v7011_v25 = vld [vmem:[%s7816_s30 + $0x204] ss:$8 sps:$4 sm:$0xff]  }
  0x8a   : > { %4219 = vmatprep.mubr.bf16.mxu0 %v6960_v29  ;;  %v7012_v29 = vld [vmem:[%s7806_s5 + $0x40] ss:$108 sps:$4 sm:$0xff]  }
  0x8b   : > { %3688 = vmatpush1.bf16.msra.mxu1 %v6906_v23  ;;  %v7000_v23 = vld [vmem:[%s7816_s30 + $0x1f0] ss:$8 sps:$4 sm:$0xff]  }
  0x8c   : > { %4255 = vmatpush1.bf16.msra.mxu0 %v6909_v24  ;;  %3689 = vmatprep.subr.bf16.mxu1 %v6914_v26  ;;  %v7003_v24 = vld [vmem:[%s7816_s30 + $0x8f0] ss:$8 sps:$4 sm:$0xff]   ;;  %v7006_v26 = vld [vmem:[%s7806_s5 + $0x8] ss:$108 sps:$4 sm:$0xff]  }
  0x8d   : > { %4256 = vmatprep.subr.bf16.mxu0 %v6917_v27  ;;  %v7017_v27 = vld [vmem:[%s7816_s30 + $0x904] ss:$8 sps:$4 sm:$0xff]  }
  0x8e   : > { %3653 = vmatmul.mubr.bf16.gmra.mrb[8].mxu1 %v6956_v31  ;;  %v7020_v31 = vld [vmem:[%s7816_s30 + $0x214] ss:$8 sps:$4 sm:$0xff]  }
  0x8f   : > { %4220 = vmatmul.mubr.bf16.gmra.mrb[8].mxu0 %v6965_v32  ;;  %3690 = vmatpush1.bf16.msra.mxu1 %v6912_v28  ;;  %v7009_v28 = vld [vmem:[%s7816_s30 + $0x200] ss:$8 sps:$4 sm:$0xff]   ;;  %v7023_v32 = vld [vmem:[%s7816_s30 + $0x914] ss:$8 sps:$4 sm:$0xff]  }
  0x90   : > { %4257 = vmatpush1.bf16.msra.mxu0 %v6915_v30  ;;  %3691 = vmatprep.subr.bf16.mxu1 %v6920_v33  ;;  %v7015_v30 = vld [vmem:[%s7816_s30 + $0x900] ss:$8 sps:$4 sm:$0xff]   ;;  %v7024_v33 = vld [vmem:[%s7806_s5 + $0xe4] ss:$108 sps:$4 sm:$0xff]  }
  0x91   : > { %4258 = vmatprep.subr.bf16.mxu0 %v6923_v34  ;;  %3662 = vmatprep.mubr.bf16.mxu1 %v6972_v37  ;;  %v7074_v34 = vld [vmem:[%s7806_s5 + $0x11c] ss:$108 sps:$4 sm:$0xff]   ;;  %v7029_v37 = vld [vmem:[%s7816_s30 + $0x224] ss:$8 sps:$4 sm:$0xff]  }
  0x92   : > { %4229 = vmatprep.mubr.bf16.mxu0 %v6978_v41  ;;  %v7030_v41 = vld [vmem:[%s7816_s30 + $0x920] ss:$8 sps:$4 sm:$0xff]  }
  0x93   : > { %3692 = vmatpush1.bf16.msra.mxu1 %v6918_v35  ;;  %v7018_v35 = vld [vmem:[%s7816_s30 + $0x210] ss:$8 sps:$4 sm:$0xff]  }
  0x94   : > { %4259 = vmatpush1.bf16.msra.mxu0 %v6921_v36  ;;  %3693 = vmatprep.subr.bf16.mxu1 %v6926_v38  ;;  %v7021_v36 = vld [vmem:[%s7816_s30 + $0x910] ss:$8 sps:$4 sm:$0xff]  }
  0x95   : > { %4260 = vmatprep.subr.bf16.mxu0 %v6929_v39  ;;  %v7026_v38 = vld [vmem:[%s7806_s5 + $0xe0] ss:$108 sps:$4 sm:$0xff]  }
  0x96   : > { %3663 = vmatmul.mubr.bf16.gmra.mrb[12].mxu1 %v6974_v43  ;;  %v7032_v39 = vld [vmem:[%s7816_s30 + $0x924] ss:$8 sps:$4 sm:$0xff]   ;;  %v7035_v43 = vld [vmem:[%s7816_s30 + $0x234] ss:$8 sps:$4 sm:$0xff]  }
  0x97   : > { %4230 = vmatmul.mubr.bf16.gmra.mrb[12].mxu0 %v6983_v44  ;;  %3694 = vmatpush1.bf16.msra.mxu1 %v6924_v40  ;;  %v7027_v40 = vld [vmem:[%s7816_s30 + $0x220] ss:$8 sps:$4 sm:$0xff]   ;;  %v7038_v44 = vld [vmem:[%s7816_s30 + $0x934] ss:$8 sps:$4 sm:$0xff]  }
  0x98   : > { %4261 = vmatpush1.bf16.msra.mxu0 %v6927_v42  ;;  %3695 = vmatprep.subr.bf16.mxu1 %v6932_v45  ;;  %v7079_v42 = vld [vmem:[%s7806_s5 + $0x118] ss:$108 sps:$4 sm:$0xff]   ;;  %v7039_v45 = vld [vmem:[%s7806_s5 + $0x1bc] ss:$108 sps:$4 sm:$0xff]  }
  0x99   : > { %4262 = vmatprep.subr.bf16.mxu0 %v6935_v46  ;;  %3672 = vmatprep.mubr.bf16.mxu1 %v5793_v49  ;;  %v7089_v46 = vld [vmem:[%s7806_s5 + $0x1f4] ss:$108 sps:$4 sm:$0xff]  }
  0x9a   : > { %4239 = vmatprep.mubr.bf16.mxu0 %v5807_v54  ;;  %v7044_v49 = vld [vmem:[%s7816_s30 + $0x244] ss:$8 sps:$4 sm:$0xff]   ;;  %v7045_v54 = vld [vmem:[%s7816_s30 + $0x940] ss:$8 sps:$4 sm:$0xff]  }
  0x9b   : > { %3696 = vmatpush1.bf16.msra.mxu1 %v6930_v48  ;;  %v7036_v48 = vld [vmem:[%s7816_s30 + $0x930] ss:$8 sps:$4 sm:$0xff]  }
  0x9c   : > { %4263 = vmatpush1.bf16.msra.mxu0 %v6933_v50  ;;  %3697 = vmatprep.subr.bf16.mxu1 %v6941_v52  ;;  %v7047_v50 = vld [vmem:[%s7816_s30 + $0x944] ss:$8 sps:$4 sm:$0xff]   ;;  %v7042_v52 = vld [vmem:[%s7816_s30 + $0x240] ss:$8 sps:$4 sm:$0xff]  }
  0x9d   : > { %4264 = vmatprep.subr.bf16.mxu0 %v6946_v53  ;;  %v7094_v53 = vld [vmem:[%s7806_s5 + $0x1f0] ss:$108 sps:$4 sm:$0xff]  }
  0x9e   : > { %3673 = vmatmul.mubr.bf16.gmra.mrb[16].mxu1 %v5792_v55  ;;  %v7050_v55 = vld [vmem:[%s7816_s30 + $0x254] ss:$8 sps:$4 sm:$0xff]  }
  0x9f   : > { %4240 = vmatmul.mubr.bf16.gmra.mrb[16].mxu0 %v5806_v56  ;;  %3698 = vmatpush1.bf16.msra.mxu1 %v6939_v57  ;;  %v7053_v56 = vld [vmem:[%s7816_s30 + $0x954] ss:$8 sps:$4 sm:$0xff]  }
  0xa0   : > { %4265 = vmatpush1.bf16.msra.mxu0 %v6944_v58  ;;  %3699 = vmatprep.subr.bf16.mxu1 %v6950_v59  ;;  %v7054_v57 = vld [vmem:[%s7806_s5 + $0x294] ss:$108 sps:$4 sm:$0xff]   ;;  %v7104_v58 = vld [vmem:[%s7806_s5 + $0x2cc] ss:$108 sps:$4 sm:$0xff]  }
  0xa1   : > { %4266 = vmatprep.subr.bf16.mxu0 %v6953_v60  ;;  %3713 = vmatprep.mubr.bf16.mxu1 %v7008_v61  ;;  %v7048_v59 = vld [vmem:[%s7816_s30 + $0x250] ss:$8 sps:$4 sm:$0xff]   ;;  %v7059_v61 = vld [vmem:[%s7816_s30 + $0x264] ss:$8 sps:$4 sm:$0xff]  }
  0xa2   : > { %4280 = vmatprep.mubr.bf16.mxu0 %v7014_v0  ;;  %v7051_v60 = vld [vmem:[%s7816_s30 + $0x950] ss:$8 sps:$4 sm:$0xff]   ;;  %v7057_v0 = vld [vmem:[%s7816_s30 + $0x260] ss:$8 sps:$4 sm:$0xff]  }
  0xa3   : > { %3700 = vmatpush1.bf16.msra.mxu1 %v6948_v62  ;;  %v7056_v62 = vld [vmem:[%s7806_s5 + $0x290] ss:$108 sps:$4 sm:$0xff]  }
  0xa4   : > { %4267 = vmatpush1.bf16.msra.mxu0 %v6951_v63  ;;  %3701 = vmatprep.subr.bf16.mxu1 %v6959_v1  ;;  %v7062_v63 = vld [vmem:[%s7816_s30 + $0x964] ss:$8 sps:$4 sm:$0xff]   ;;  %v7060_v1 = vld [vmem:[%s7816_s30 + $0x960] ss:$8 sps:$4 sm:$0xff]  }
  0xa5   : > { %4268 = vmatprep.subr.bf16.mxu0 %v6964_v2  ;;  %v356_v2 = vld [vmem:[%s7806_s5 + $0x368] sm:$0xff] }
  0xa7   : > { %3702 = vmatpush1.bf16.msra.mxu1 %v6957_v3  ;;  %v7109_v3 = vld [vmem:[%s7806_s5 + $0x2c8] ss:$108 sps:$4 sm:$0xff]  }
  0xa8   : > { %4269 = vmatpush1.bf16.msra.mxu0 %v6962_v4  ;;  %3703 = vmatprep.subr.bf16.mxu1 %v6968_v5  ;;  %v363_v4 = vld [vmem:[%s7806_s5 + $0x3a0] sm:$0xff]  ;;  %v7065_v5 = vld [vmem:[%s7816_s30 + $0x274] ss:$8 sps:$4 sm:$0xff]  }
  0xa9   : > { %4270 = vmatprep.subr.bf16.mxu0 %v6971_v6  ;;  %v7068_v6 = vld [vmem:[%s7816_s30 + $0x974] ss:$8 sps:$4 sm:$0xff]  }
  0xab   : > { %3704 = vmatpush1.bf16.msra.mxu1 %v6966_v7  ;;  %v5795_v7 = vcombine.high %v356_v2, %v356_v2 }
  0xac   : > { %4271 = vmatpush1.bf16.msra.mxu0 %v6969_v8  ;;  %3705 = vmatprep.subr.bf16.mxu1 %v6977_v9  ;;  %v5809_v8 = vcombine.high %v363_v4, %v363_v4  ;;  %v7063_v9 = vld [vmem:[%s7816_s30 + $0x270] ss:$8 sps:$4 sm:$0xff]  }
  0xad   : > { %4272 = vmatprep.subr.bf16.mxu0 %v6982_v10  ;;  %v7066_v10 = vld [vmem:[%s7816_s30 + $0x970] ss:$8 sps:$4 sm:$0xff]  }
  0xaf   : > { %3706 = vmatpush1.bf16.msra.mxu1 %v6975_v11  ;;  %v7073_v11 = vld [vmem:[%s7816_s30 + $0x284] ss:$8 sps:$4 sm:$0xff]  }
  0xb0   : > { %4273 = vmatpush1.bf16.msra.mxu0 %v6980_v12  ;;  %3707 = vmatprep.subr.bf16.mxu1 %v6986_v13  ;;  %v7078_v12 = vld [vmem:[%s7816_s30 + $0x984] ss:$8 sps:$4 sm:$0xff]   ;;  %v5794_v13 = vcombine.low %v356_v2, %v356_v2  ;;  %v7162_v2 = vld [vmem:[%s7816_s30 + $0xa34] ss:$8 sps:$4 sm:$0xff]  }
  0xb1   : > { %4274 = vmatprep.subr.bf16.mxu0 %v6989_v14  ;;  %v7071_v14 = vld [vmem:[%s7816_s30 + $0x280] ss:$8 sps:$4 sm:$0xff]  }
  0xb3   : > { %3708 = vmatpush1.bf16.msra.mxu1 %v6984_v15  ;;  %v7076_v15 = vld [vmem:[%s7816_s30 + $0x980] ss:$8 sps:$4 sm:$0xff]  }
  0xb4   : > { %4275 = vmatpush1.bf16.msra.mxu0 %v6987_v16  ;;  %3709 = vmatprep.subr.bf16.mxu1 %v6994_v17  ;;  %v5808_v16 = vcombine.low %v363_v4, %v363_v4  ;;  %v7082_v17 = vld [vmem:[%s7816_s30 + $0x294] ss:$8 sps:$4 sm:$0xff]  }
  0xb5   : > { %4276 = vmatprep.subr.bf16.mxu0 %v6998_v18  ;;  %v7085_v18 = vld [vmem:[%s7816_s30 + $0x994] ss:$8 sps:$4 sm:$0xff]  }
  0xb6   : > { %v7213_v4 = vld [vmem:[%s7806_s5 + $0x1fc] ss:$108 sps:$4 sm:$0xff]  }
  0xb7   : > { %3710 = vmatpush1.bf16.msra.mxu1 %v6992_v19  ;;  %v7132_v19 = vld [vmem:[%s7806_s5 + $0x14] ss:$108 sps:$4 sm:$0xff]  }
  0xb8   : > { %4277 = vmatpush1.bf16.msra.mxu0 %v6996_v20  ;;  %3711 = vmatprep.subr.bf16.mxu1 %v7002_v21  ;;  %v7138_v20 = vld [vmem:[%s7806_s5 + $0x4c] ss:$108 sps:$4 sm:$0xff]  }
  0xb9   : > { %4278 = vmatprep.subr.bf16.mxu0 %v7005_v22  ;;  %v7080_v21 = vld [vmem:[%s7816_s30 + $0x290] ss:$8 sps:$4 sm:$0xff]  }
  0xba   : > { %v7083_v22 = vld [vmem:[%s7816_s30 + $0x990] ss:$8 sps:$4 sm:$0xff]  }
  0xbb   : > { %3712 = vmatpush1.bf16.msra.mxu1 %v7000_v23  ;;  %v7088_v23 = vld [vmem:[%s7816_s30 + $0x2a4] ss:$8 sps:$4 sm:$0xff]  }
  0xbc   : > { %4279 = vmatpush1.bf16.msra.mxu0 %v7003_v24  ;;  %3762 = vmatprep.subr.bf16.mxu1 %v7011_v25  ;;  %v7093_v24 = vld [vmem:[%s7816_s30 + $0x9a4] ss:$8 sps:$4 sm:$0xff]   ;;  %v7086_v25 = vld [vmem:[%s7816_s30 + $0x2a0] ss:$8 sps:$4 sm:$0xff]  }
  0xbd   : > { %4329 = vmatprep.subr.bf16.mxu0 %v7017_v27  ;;  %v7097_v27 = vld [vmem:[%s7816_s30 + $0x2b4] ss:$8 sps:$4 sm:$0xff]  }
  0xbe   : > { %3714 = vmatmul.mubr.bf16.vlgmr.msra.gmra.mrb[0].mxu1 %v7006_v26  ;;  %v7091_v26 = vld [vmem:[%s7816_s30 + $0x9a0] ss:$8 sps:$4 sm:$0xff]  }
  0xbf   : > { %4281 = vmatmul.mubr.bf16.vlgmr.msra.gmra.mrb[0].mxu0 %v7012_v29  ;;  %3763 = vmatpush1.bf16.msra.mxu1 %v7009_v28  ;;  %v7100_v28 = vld [vmem:[%s7816_s30 + $0x9b4] ss:$8 sps:$4 sm:$0xff]   ;;  %v7095_v29 = vld [vmem:[%s7816_s30 + $0x2b0] ss:$8 sps:$4 sm:$0xff]  }
  0xc0   : > { %4330 = vmatpush1.bf16.msra.mxu0 %v7015_v30  ;;  %3764 = vmatprep.subr.bf16.mxu1 %v7020_v31  ;;  %v7098_v30 = vld [vmem:[%s7816_s30 + $0x9b0] ss:$8 sps:$4 sm:$0xff]   ;;  %v7103_v31 = vld [vmem:[%s7816_s30 + $0x2c4] ss:$8 sps:$4 sm:$0xff]  }
  0xc1   : > { %4331 = vmatprep.subr.bf16.mxu0 %v7023_v32  ;;  %3723 = vmatprep.mubr.bf16.mxu1 %v7024_v33  ;;  %v7108_v32 = vld [vmem:[%s7816_s30 + $0x9c4] ss:$8 sps:$4 sm:$0xff]   ;;  %v7101_v33 = vld [vmem:[%s7816_s30 + $0x2c0] ss:$8 sps:$4 sm:$0xff]  }
  0xc2   : > { %4290 = vmatprep.mubr.bf16.mxu0 %v7074_v34  ;;  %v7106_v34 = vld [vmem:[%s7816_s30 + $0x9c0] ss:$8 sps:$4 sm:$0xff]  }
  0xc3   : > { %3765 = vmatpush1.bf16.msra.mxu1 %v7018_v35  ;;  %v7112_v35 = vld [vmem:[%s7816_s30 + $0x2d4] ss:$8 sps:$4 sm:$0xff]  }
  0xc4   : > { %4332 = vmatpush1.bf16.msra.mxu0 %v7021_v36  ;;  %3766 = vmatprep.subr.bf16.mxu1 %v7029_v37  ;;  %v7115_v36 = vld [vmem:[%s7816_s30 + $0x9d4] ss:$8 sps:$4 sm:$0xff]   ;;  %v7110_v37 = vld [vmem:[%s7816_s30 + $0x2d0] ss:$8 sps:$4 sm:$0xff]  }
  0xc5   : > { %4333 = vmatprep.subr.bf16.mxu0 %v7032_v39  ;;  %v7118_v39 = vld [vmem:[%s7816_s30 + $0x2e4] ss:$8 sps:$4 sm:$0xff]  }
  0xc6   : > { %3724 = vmatmul.mubr.bf16.gmra.mrb[4].mxu1 %v7026_v38  ;;  %v7113_v38 = vld [vmem:[%s7816_s30 + $0x9d0] ss:$8 sps:$4 sm:$0xff]  }
  0xc7   : > { %4291 = vmatmul.mubr.bf16.gmra.mrb[4].mxu0 %v7079_v42  ;;  %3767 = vmatpush1.bf16.msra.mxu1 %v7027_v40  ;;  %v7122_v40 = vld [vmem:[%s7816_s30 + $0x9e4] ss:$8 sps:$4 sm:$0xff]   ;;  %v7120_v42 = vld [vmem:[%s7816_s30 + $0x9e0] ss:$8 sps:$4 sm:$0xff]  }
  0xc8   : > { %4334 = vmatpush1.bf16.msra.mxu0 %v7030_v41  ;;  %3768 = vmatprep.subr.bf16.mxu1 %v7035_v43  ;;  %v7116_v41 = vld [vmem:[%s7816_s30 + $0x2e0] ss:$8 sps:$4 sm:$0xff]   ;;  %v7126_v43 = vld [vmem:[%s7816_s30 + $0x2f4] ss:$8 sps:$4 sm:$0xff]  }
  0xc9   : > { %4335 = vmatprep.subr.bf16.mxu0 %v7038_v44  ;;  %3733 = vmatprep.mubr.bf16.mxu1 %v7039_v45  ;;  %v7129_v44 = vld [vmem:[%s7816_s30 + $0x9f4] ss:$8 sps:$4 sm:$0xff]   ;;  %v7124_v45 = vld [vmem:[%s7816_s30 + $0x2f0] ss:$8 sps:$4 sm:$0xff]  }
  0xca   : > { %4300 = vmatprep.mubr.bf16.mxu0 %v7089_v46  ;;  %v7127_v46 = vld [vmem:[%s7816_s30 + $0x9f0] ss:$8 sps:$4 sm:$0xff]  }
  0xcb   : > { %3769 = vmatpush1.bf16.msra.mxu1 %v7033_v47  ;;  %v7130_v47 = vld [vmem:[%s7806_s5 + $0x10] ss:$108 sps:$4 sm:$0xff]  }
  0xcc   : > { %4336 = vmatpush1.bf16.msra.mxu0 %v7036_v48  ;;  %3770 = vmatprep.subr.bf16.mxu1 %v7044_v49  ;;  %v7135_v48 = vld [vmem:[%s7816_s30 + $0x304] ss:$8 sps:$4 sm:$0xff]  }
  0xcd   : > { %4337 = vmatprep.subr.bf16.mxu0 %v7047_v50  ;;  %v7141_v49 = vld [vmem:[%s7816_s30 + $0xa04] ss:$8 sps:$4 sm:$0xff]   ;;  %v7133_v50 = vld [vmem:[%s7816_s30 + $0x300] ss:$8 sps:$4 sm:$0xff]  }
  0xce   : > { %3734 = vmatmul.mubr.bf16.gmra.mrb[8].mxu1 %v7041_v51  ;;  %v7136_v51 = vld [vmem:[%s7806_s5 + $0x48] ss:$108 sps:$4 sm:$0xff]  }
  0xcf   : > { %4301 = vmatmul.mubr.bf16.gmra.mrb[8].mxu0 %v7094_v53  ;;  %3771 = vmatpush1.bf16.msra.mxu1 %v7042_v52  ;;  %v7139_v52 = vld [vmem:[%s7816_s30 + $0xa00] ss:$8 sps:$4 sm:$0xff]   ;;  %v7144_v53 = vld [vmem:[%s7816_s30 + $0x314] ss:$8 sps:$4 sm:$0xff]  }
  0xd0   : > { %4338 = vmatpush1.bf16.msra.mxu0 %v7045_v54  ;;  %3772 = vmatprep.subr.bf16.mxu1 %v7050_v55  ;;  %v7147_v54 = vld [vmem:[%s7816_s30 + $0xa14] ss:$8 sps:$4 sm:$0xff]   ;;  %v7148_v55 = vld [vmem:[%s7806_s5 + $0xec] ss:$108 sps:$4 sm:$0xff]  }
  0xd1   : > { %4339 = vmatprep.subr.bf16.mxu0 %v7053_v56  ;;  %3743 = vmatprep.mubr.bf16.mxu1 %v7054_v57  ;;  %v7198_v56 = vld [vmem:[%s7806_s5 + $0x124] ss:$108 sps:$4 sm:$0xff]  }
  0xd2   : > { %4310 = vmatprep.mubr.bf16.mxu0 %v7104_v58  ;;  %v7142_v57 = vld [vmem:[%s7816_s30 + $0x310] ss:$8 sps:$4 sm:$0xff]  }
  0xd3   : > { %3773 = vmatpush1.bf16.msra.mxu1 %v7048_v59  ;;  %v7145_v58 = vld [vmem:[%s7816_s30 + $0xa10] ss:$8 sps:$4 sm:$0xff]   ;;  %v7153_v59 = vld [vmem:[%s7816_s30 + $0x324] ss:$8 sps:$4 sm:$0xff]  }
  0xd4   : > { %4340 = vmatpush1.bf16.msra.mxu0 %v7051_v60  ;;  %3774 = vmatprep.subr.bf16.mxu1 %v7059_v61  ;;  %v7156_v60 = vld [vmem:[%s7816_s30 + $0xa24] ss:$8 sps:$4 sm:$0xff]   ;;  %v7150_v61 = vld [vmem:[%s7806_s5 + $0xe8] ss:$108 sps:$4 sm:$0xff]  }
  0xd5   : > { %4341 = vmatprep.subr.bf16.mxu0 %v7062_v63  ;;  %v7203_v63 = vld [vmem:[%s7806_s5 + $0x120] ss:$108 sps:$4 sm:$0xff]  }
  0xd6   : > { %3744 = vmatmul.mubr.bf16.gmra.mrb[12].mxu1 %v7056_v62  ;;  %v7151_v62 = vld [vmem:[%s7816_s30 + $0x320] ss:$8 sps:$4 sm:$0xff]  }
  0xd7   : > { %4311 = vmatmul.mubr.bf16.gmra.mrb[12].mxu0 %v7109_v3  ;;  %3775 = vmatpush1.bf16.msra.mxu1 %v7057_v0  ;;  %v7154_v0 = vld [vmem:[%s7816_s30 + $0xa20] ss:$8 sps:$4 sm:$0xff]   ;;  %v7163_v3 = vld [vmem:[%s7806_s5 + $0x1c4] ss:$108 sps:$4 sm:$0xff]  }
  0xd8   : > { %4342 = vmatpush1.bf16.msra.mxu0 %v7060_v1  ;;  %3776 = vmatprep.subr.bf16.mxu1 %v7065_v5  ;;  %v7159_v1 = vld [vmem:[%s7816_s30 + $0x334] ss:$8 sps:$4 sm:$0xff]   ;;  %v7157_v5 = vld [vmem:[%s7816_s30 + $0x330] ss:$8 sps:$4 sm:$0xff]  }
  0xd9   : > { %4343 = vmatprep.subr.bf16.mxu0 %v7068_v6  ;;  %3753 = vmatprep.mubr.bf16.mxu1 %v5795_v7  ;;  %v7160_v6 = vld [vmem:[%s7816_s30 + $0xa30] ss:$8 sps:$4 sm:$0xff]  }
  0xda   : > { %4320 = vmatprep.mubr.bf16.mxu0 %v5809_v8  ;;  %v7165_v7 = vld [vmem:[%s7806_s5 + $0x1c0] ss:$108 sps:$4 sm:$0xff]  }
  0xdb   : > { %3777 = vmatpush1.bf16.msra.mxu1 %v7063_v9  ;;  %v7168_v8 = vld [vmem:[%s7816_s30 + $0x344] ss:$8 sps:$4 sm:$0xff]  }
  0xdc   : > { %4344 = vmatpush1.bf16.msra.mxu0 %v7066_v10  ;;  %3778 = vmatprep.subr.bf16.mxu1 %v7073_v11  ;;  %v7171_v9 = vld [vmem:[%s7816_s30 + $0xa44] ss:$8 sps:$4 sm:$0xff]   ;;  %v7166_v10 = vld [vmem:[%s7816_s30 + $0x340] ss:$8 sps:$4 sm:$0xff]  }
  0xdd   : > { %4345 = vmatprep.subr.bf16.mxu0 %v7078_v12  ;;  %v7218_v11 = vld [vmem:[%s7806_s5 + $0x1f8] ss:$108 sps:$4 sm:$0xff]   ;;  %v7169_v12 = vld [vmem:[%s7816_s30 + $0xa40] ss:$8 sps:$4 sm:$0xff]  }
  0xde   : > { %3754 = vmatmul.mubr.bf16.gmra.mrb[20].mxu1 %v5794_v13  ;;  %v7174_v13 = vld [vmem:[%s7816_s30 + $0x354] ss:$8 sps:$4 sm:$0xff]  }
  0xdf   : > { %4321 = vmatmul.mubr.bf16.gmra.mrb[20].mxu0 %v5808_v16  ;;  %3779 = vmatpush1.bf16.msra.mxu1 %v7071_v14  ;;  %v7177_v14 = vld [vmem:[%s7816_s30 + $0xa54] ss:$8 sps:$4 sm:$0xff]  }
  0xe0   : > { %4346 = vmatpush1.bf16.msra.mxu0 %v7076_v15  ;;  %3780 = vmatprep.subr.bf16.mxu1 %v7082_v17  ;;  %v7178_v15 = vld [vmem:[%s7806_s5 + $0x29c] ss:$108 sps:$4 sm:$0xff]   ;;  %v7228_v16 = vld [vmem:[%s7806_s5 + $0x2d4] ss:$108 sps:$4 sm:$0xff]   ;;  %v7172_v17 = vld [vmem:[%s7816_s30 + $0x350] ss:$8 sps:$4 sm:$0xff]  }
  0xe1   : > { %4347 = vmatprep.subr.bf16.mxu0 %v7085_v18  ;;  %3794 = vmatprep.mubr.bf16.mxu1 %v7132_v19  ;;  %v7175_v18 = vld [vmem:[%s7816_s30 + $0xa50] ss:$8 sps:$4 sm:$0xff]   ;;  %v7183_v19 = vld [vmem:[%s7816_s30 + $0x364] ss:$8 sps:$4 sm:$0xff]  }
  0xe2   : > { %4361 = vmatprep.mubr.bf16.mxu0 %v7138_v20  ;;  %v7180_v20 = vld [vmem:[%s7806_s5 + $0x298] ss:$108 sps:$4 sm:$0xff]  }
  0xe3   : > { %3781 = vmatpush1.bf16.msra.mxu1 %v7080_v21  ;;  %v7186_v21 = vld [vmem:[%s7816_s30 + $0xa64] ss:$8 sps:$4 sm:$0xff]  }
  0xe4   : > { %4348 = vmatpush1.bf16.msra.mxu0 %v7083_v22  ;;  %3782 = vmatprep.subr.bf16.mxu1 %v7088_v23  ;;  %v357_v22 = vld [vmem:[%s7806_s5 + $0x370] sm:$0xff] }
  0xe5   : > { %4349 = vmatprep.subr.bf16.mxu0 %v7093_v24  ;;  %v7233_v23 = vld [vmem:[%s7806_s5 + $0x2d0] ss:$108 sps:$4 sm:$0xff]   ;;  %v364_v24 = vld [vmem:[%s7806_s5 + $0x3a8] sm:$0xff] }
  0xe7   : > { %3783 = vmatpush1.bf16.msra.mxu1 %v7086_v25  ;;  %v7181_v25 = vld [vmem:[%s7816_s30 + $0x360] ss:$8 sps:$4 sm:$0xff]  }
  0xe8   : > { %4350 = vmatpush1.bf16.msra.mxu0 %v7091_v26  ;;  %3784 = vmatprep.subr.bf16.mxu1 %v7097_v27  ;;  %v7184_v26 = vld [vmem:[%s7816_s30 + $0xa60] ss:$8 sps:$4 sm:$0xff]   ;;  %v7189_v27 = vld [vmem:[%s7816_s30 + $0x374] ss:$8 sps:$4 sm:$0xff]  }
  0xe9   : > { %4351 = vmatprep.subr.bf16.mxu0 %v7100_v28  ;;  %v7192_v28 = vld [vmem:[%s7816_s30 + $0xa74] ss:$8 sps:$4 sm:$0xff]  }
  0xeb   : > { %3785 = vmatpush1.bf16.msra.mxu1 %v7095_v29  ;;  %v5797_v29 = vcombine.high %v357_v22, %v357_v22 }
  0xec   : > { %4352 = vmatpush1.bf16.msra.mxu0 %v7098_v30  ;;  %3786 = vmatprep.subr.bf16.mxu1 %v7103_v31  ;;  %v5811_v30 = vcombine.high %v364_v24, %v364_v24  ;;  %v7187_v31 = vld [vmem:[%s7816_s30 + $0x370] ss:$8 sps:$4 sm:$0xff]  }
  0xed   : > { %4353 = vmatprep.subr.bf16.mxu0 %v7108_v32  ;;  %v7190_v32 = vld [vmem:[%s7816_s30 + $0xa70] ss:$8 sps:$4 sm:$0xff]  }
  0xef   : > { %3787 = vmatpush1.bf16.msra.mxu1 %v7101_v33  ;;  %v7197_v33 = vld [vmem:[%s7816_s30 + $0x384] ss:$8 sps:$4 sm:$0xff]  }
  0xf0   : > { %4354 = vmatpush1.bf16.msra.mxu0 %v7106_v34  ;;  %3788 = vmatprep.subr.bf16.mxu1 %v7112_v35  ;;  %v7202_v34 = vld [vmem:[%s7816_s30 + $0xa84] ss:$8 sps:$4 sm:$0xff]   ;;  %v5796_v35 = vcombine.low %v357_v22, %v357_v22  ;;  %v7327_v22 = vld [vmem:[%s7806_s5 + $0x128] ss:$108 sps:$4 sm:$0xff]  }
  0xf1   : > { %4355 = vmatprep.subr.bf16.mxu0 %v7115_v36  ;;  %v7195_v36 = vld [vmem:[%s7816_s30 + $0x380] ss:$8 sps:$4 sm:$0xff]  }
  0xf3   : > { %3789 = vmatpush1.bf16.msra.mxu1 %v7110_v37  ;;  %v5810_v37 = vcombine.low %v364_v24, %v364_v24  ;;  %v7286_v24 = vld [vmem:[%s7816_s30 + $0xb34] ss:$8 sps:$4 sm:$0xff]  }
  0xf4   : > { %4356 = vmatpush1.bf16.msra.mxu0 %v7113_v38  ;;  %3790 = vmatprep.subr.bf16.mxu1 %v7118_v39  ;;  %v7200_v38 = vld [vmem:[%s7816_s30 + $0xa80] ss:$8 sps:$4 sm:$0xff]   ;;  %v7206_v39 = vld [vmem:[%s7816_s30 + $0x394] ss:$8 sps:$4 sm:$0xff]  }
  0xf5   : > { %4357 = vmatprep.subr.bf16.mxu0 %v7122_v40  ;;  %v7209_v40 = vld [vmem:[%s7816_s30 + $0xa94] ss:$8 sps:$4 sm:$0xff]  }
  0xf7   : > { %3791 = vmatpush1.bf16.msra.mxu1 %v7116_v41  ;;  %v7256_v41 = vld [vmem:[%s7806_s5 + $0x1c] ss:$108 sps:$4 sm:$0xff]  }
  0xf8   : > { %4358 = vmatpush1.bf16.msra.mxu0 %v7120_v42  ;;  %3792 = vmatprep.subr.bf16.mxu1 %v7126_v43  ;;  %v7262_v42 = vld [vmem:[%s7806_s5 + $0x54] ss:$108 sps:$4 sm:$0xff]   ;;  %v7204_v43 = vld [vmem:[%s7816_s30 + $0x390] ss:$8 sps:$4 sm:$0xff]  }
  0xf9   : > { %4359 = vmatprep.subr.bf16.mxu0 %v7129_v44  ;;  %v7207_v44 = vld [vmem:[%s7816_s30 + $0xa90] ss:$8 sps:$4 sm:$0xff]  }
  0xfb   : > { %3793 = vmatpush1.bf16.msra.mxu1 %v7124_v45  ;;  %v7212_v45 = vld [vmem:[%s7816_s30 + $0x3a4] ss:$8 sps:$4 sm:$0xff]  }
  0xfc   : > { %4360 = vmatpush1.bf16.msra.mxu0 %v7127_v46  ;;  %3843 = vmatprep.subr.bf16.mxu1 %v7135_v48  ;;  %v7217_v46 = vld [vmem:[%s7816_s30 + $0xaa4] ss:$8 sps:$4 sm:$0xff]   ;;  %v7215_v48 = vld [vmem:[%s7816_s30 + $0xaa0] ss:$8 sps:$4 sm:$0xff]  }
  0xfd   : > { %4410 = vmatprep.subr.bf16.mxu0 %v7141_v49  ;;  %v7221_v49 = vld [vmem:[%s7816_s30 + $0x3b4] ss:$8 sps:$4 sm:$0xff]  }
  0xfe   : > { %3795 = vmatmul.mubr.bf16.vlgmr.msra.gmra.mrb[0].mxu1 %v7130_v47  ;;  %v7210_v47 = vld [vmem:[%s7816_s30 + $0x3a0] ss:$8 sps:$4 sm:$0xff]  }
  0xff   : > { %4362 = vmatmul.mubr.bf16.vlgmr.msra.gmra.mrb[0].mxu0 %v7136_v51  ;;  %3844 = vmatpush1.bf16.msra.mxu1 %v7133_v50  ;;  %v7224_v50 = vld [vmem:[%s7816_s30 + $0xab4] ss:$8 sps:$4 sm:$0xff]   ;;  %v7219_v51 = vld [vmem:[%s7816_s30 + $0x3b0] ss:$8 sps:$4 sm:$0xff]  }
 0x100   : > { %4411 = vmatpush1.bf16.msra.mxu0 %v7139_v52  ;;  %3845 = vmatprep.subr.bf16.mxu1 %v7144_v53  ;;  %v7222_v52 = vld [vmem:[%s7816_s30 + $0xab0] ss:$8 sps:$4 sm:$0xff]   ;;  %v7227_v53 = vld [vmem:[%s7816_s30 + $0x3c4] ss:$8 sps:$4 sm:$0xff]  }
 0x101   : > { %4412 = vmatprep.subr.bf16.mxu0 %v7147_v54  ;;  %3804 = vmatprep.mubr.bf16.mxu1 %v7148_v55  ;;  %v7232_v54 = vld [vmem:[%s7816_s30 + $0xac4] ss:$8 sps:$4 sm:$0xff]   ;;  %v7225_v55 = vld [vmem:[%s7816_s30 + $0x3c0] ss:$8 sps:$4 sm:$0xff]  }
 0x102   : > { %4371 = vmatprep.mubr.bf16.mxu0 %v7198_v56  ;;  %v7230_v56 = vld [vmem:[%s7816_s30 + $0xac0] ss:$8 sps:$4 sm:$0xff]  }
 0x103   : > { %3846 = vmatpush1.bf16.msra.mxu1 %v7142_v57  ;;  %v7236_v57 = vld [vmem:[%s7816_s30 + $0x3d4] ss:$8 sps:$4 sm:$0xff]  }
 0x104   : > { %4413 = vmatpush1.bf16.msra.mxu0 %v7145_v58  ;;  %3847 = vmatprep.subr.bf16.mxu1 %v7153_v59  ;;  %v7239_v58 = vld [vmem:[%s7816_s30 + $0xad4] ss:$8 sps:$4 sm:$0xff]   ;;  %v7234_v59 = vld [vmem:[%s7816_s30 + $0x3d0] ss:$8 sps:$4 sm:$0xff]  }
 0x105   : > { %4414 = vmatprep.subr.bf16.mxu0 %v7156_v60  ;;  %v7237_v60 = vld [vmem:[%s7816_s30 + $0xad0] ss:$8 sps:$4 sm:$0xff]  }
 0x106   : > { %3805 = vmatmul.mubr.bf16.gmra.mrb[4].mxu1 %v7150_v61  ;;  %v7242_v61 = vld [vmem:[%s7816_s30 + $0x3e4] ss:$8 sps:$4 sm:$0xff]  }
 0x107   : > { %4372 = vmatmul.mubr.bf16.gmra.mrb[4].mxu0 %v7203_v63  ;;  %3848 = vmatpush1.bf16.msra.mxu1 %v7151_v62  ;;  %v7246_v62 = vld [vmem:[%s7816_s30 + $0xae4] ss:$8 sps:$4 sm:$0xff]   ;;  %v7240_v63 = vld [vmem:[%s7816_s30 + $0x3e0] ss:$8 sps:$4 sm:$0xff]  }
 0x108   : > { %4415 = vmatpush1.bf16.msra.mxu0 %v7154_v0  ;;  %3849 = vmatprep.subr.bf16.mxu1 %v7159_v1  ;;  %v7244_v0 = vld [vmem:[%s7816_s30 + $0xae0] ss:$8 sps:$4 sm:$0xff]   ;;  %v7250_v1 = vld [vmem:[%s7816_s30 + $0x3f4] ss:$8 sps:$4 sm:$0xff]  }
 0x109   : > { %4416 = vmatprep.subr.bf16.mxu0 %v7162_v2  ;;  %3814 = vmatprep.mubr.bf16.mxu1 %v7163_v3  ;;  %v7253_v2 = vld [vmem:[%s7816_s30 + $0xaf4] ss:$8 sps:$4 sm:$0xff]   ;;  %v7248_v3 = vld [vmem:[%s7816_s30 + $0x3f0] ss:$8 sps:$4 sm:$0xff]  }
 0x10a   : > { %4381 = vmatprep.mubr.bf16.mxu0 %v7213_v4  ;;  %v7251_v4 = vld [vmem:[%s7816_s30 + $0xaf0] ss:$8 sps:$4 sm:$0xff]  }
 0x10b   : > { %3850 = vmatpush1.bf16.msra.mxu1 %v7157_v5  ;;  %v7259_v5 = vld [vmem:[%s7816_s30 + $0x404] ss:$8 sps:$4 sm:$0xff]  }
 0x10c   : > { %4417 = vmatpush1.bf16.msra.mxu0 %v7160_v6  ;;  %3851 = vmatprep.subr.bf16.mxu1 %v7168_v8  ;;  %v7265_v6 = vld [vmem:[%s7816_s30 + $0xb04] ss:$8 sps:$4 sm:$0xff]   ;;  %v7257_v8 = vld [vmem:[%s7816_s30 + $0x400] ss:$8 sps:$4 sm:$0xff]  }
 0x10d   : > { %4418 = vmatprep.subr.bf16.mxu0 %v7171_v9  ;;  %v7260_v9 = vld [vmem:[%s7806_s5 + $0x50] ss:$108 sps:$4 sm:$0xff]  }
 0x10e   : > { %3815 = vmatmul.mubr.bf16.gmra.mrb[8].mxu1 %v7165_v7  ;;  %v7254_v7 = vld [vmem:[%s7806_s5 + $0x18] ss:$108 sps:$4 sm:$0xff]  }
 0x10f   : > { %4382 = vmatmul.mubr.bf16.gmra.mrb[8].mxu0 %v7218_v11  ;;  %3852 = vmatpush1.bf16.msra.mxu1 %v7166_v10  ;;  %v7263_v10 = vld [vmem:[%s7816_s30 + $0xb00] ss:$8 sps:$4 sm:$0xff]   ;;  %v7268_v11 = vld [vmem:[%s7816_s30 + $0x414] ss:$8 sps:$4 sm:$0xff]  }
 0x110   : > { %4419 = vmatpush1.bf16.msra.mxu0 %v7169_v12  ;;  %3853 = vmatprep.subr.bf16.mxu1 %v7174_v13  ;;  %v7271_v12 = vld [vmem:[%s7816_s30 + $0xb14] ss:$8 sps:$4 sm:$0xff]  }
 0x111   : > { %4420 = vmatprep.subr.bf16.mxu0 %v7177_v14  ;;  %3824 = vmatprep.mubr.bf16.mxu1 %v7178_v15  ;;  %v7272_v13 = vld [vmem:[%s7806_s5 + $0xf4] ss:$108 sps:$4 sm:$0xff]   ;;  %v7322_v14 = vld [vmem:[%s7806_s5 + $0x12c] ss:$108 sps:$4 sm:$0xff]  }
 0x112   : > { %4391 = vmatprep.mubr.bf16.mxu0 %v7228_v16  ;;  %v7266_v15 = vld [vmem:[%s7816_s30 + $0x410] ss:$8 sps:$4 sm:$0xff]  }
 0x113   : > { %3854 = vmatpush1.bf16.msra.mxu1 %v7172_v17  ;;  %v7269_v16 = vld [vmem:[%s7816_s30 + $0xb10] ss:$8 sps:$4 sm:$0xff]   ;;  %v7277_v17 = vld [vmem:[%s7816_s30 + $0x424] ss:$8 sps:$4 sm:$0xff]  }
 0x114   : > { %4421 = vmatpush1.bf16.msra.mxu0 %v7175_v18  ;;  %3855 = vmatprep.subr.bf16.mxu1 %v7183_v19  ;;  %v7280_v18 = vld [vmem:[%s7816_s30 + $0xb24] ss:$8 sps:$4 sm:$0xff]   ;;  %v7274_v19 = vld [vmem:[%s7806_s5 + $0xf0] ss:$108 sps:$4 sm:$0xff]  }
 0x115   : > { %4422 = vmatprep.subr.bf16.mxu0 %v7186_v21  ;;  %v7278_v21 = vld [vmem:[%s7816_s30 + $0xb20] ss:$8 sps:$4 sm:$0xff]  }
 0x116   : > { %3825 = vmatmul.mubr.bf16.gmra.mrb[12].mxu1 %v7180_v20  ;;  %v7275_v20 = vld [vmem:[%s7816_s30 + $0x420] ss:$8 sps:$4 sm:$0xff]  }
 0x117   : > { %4392 = vmatmul.mubr.bf16.gmra.mrb[12].mxu0 %v7233_v23  ;;  %3856 = vmatpush1.bf16.msra.mxu1 %v7181_v25  ;;  %v7283_v23 = vld [vmem:[%s7816_s30 + $0x434] ss:$8 sps:$4 sm:$0xff]   ;;  %v7287_v25 = vld [vmem:[%s7806_s5 + $0x1cc] ss:$108 sps:$4 sm:$0xff]  }
 0x118   : > { %4423 = vmatpush1.bf16.msra.mxu0 %v7184_v26  ;;  %3857 = vmatprep.subr.bf16.mxu1 %v7189_v27  ;;  %v7337_v26 = vld [vmem:[%s7806_s5 + $0x204] ss:$108 sps:$4 sm:$0xff]  }
 0x119   : > { %4424 = vmatprep.subr.bf16.mxu0 %v7192_v28  ;;  %3834 = vmatprep.mubr.bf16.mxu1 %v5797_v29  ;;  %v7281_v27 = vld [vmem:[%s7816_s30 + $0x430] ss:$8 sps:$4 sm:$0xff]   ;;  %v7292_v29 = vld [vmem:[%s7816_s30 + $0x444] ss:$8 sps:$4 sm:$0xff]  }
 0x11a   : > { %4401 = vmatprep.mubr.bf16.mxu0 %v5811_v30  ;;  %v7284_v28 = vld [vmem:[%s7816_s30 + $0xb30] ss:$8 sps:$4 sm:$0xff]   ;;  %v7295_v30 = vld [vmem:[%s7816_s30 + $0xb44] ss:$8 sps:$4 sm:$0xff]  }
 0x11b   : > { %3858 = vmatpush1.bf16.msra.mxu1 %v7187_v31  ;;  %v7289_v31 = vld [vmem:[%s7806_s5 + $0x1c8] ss:$108 sps:$4 sm:$0xff]  }
 0x11c   : > { %4425 = vmatpush1.bf16.msra.mxu0 %v7190_v32  ;;  %3859 = vmatprep.subr.bf16.mxu1 %v7197_v33  ;;  %v7290_v32 = vld [vmem:[%s7816_s30 + $0x440] ss:$8 sps:$4 sm:$0xff]  }
 0x11d   : > { %4426 = vmatprep.subr.bf16.mxu0 %v7202_v34  ;;  %v7293_v33 = vld [vmem:[%s7816_s30 + $0xb40] ss:$8 sps:$4 sm:$0xff]  }
 0x11e   : > { %3835 = vmatmul.mubr.bf16.gmra.mrb[24].mxu1 %v5796_v35  ;;  %v7342_v34 = vld [vmem:[%s7806_s5 + $0x200] ss:$108 sps:$4 sm:$0xff]   ;;  %v7298_v35 = vld [vmem:[%s7816_s30 + $0x454] ss:$8 sps:$4 sm:$0xff]  }
 0x11f   : > { %4402 = vmatmul.mubr.bf16.gmra.mrb[24].mxu0 %v5810_v37  ;;  %3860 = vmatpush1.bf16.msra.mxu1 %v7195_v36  ;;  %v7301_v36 = vld [vmem:[%s7816_s30 + $0xb54] ss:$8 sps:$4 sm:$0xff]  }
 0x120   : > { %4427 = vmatpush1.bf16.msra.mxu0 %v7200_v38  ;;  %3861 = vmatprep.subr.bf16.mxu1 %v7206_v39  ;;  %v7302_v37 = vld [vmem:[%s7806_s5 + $0x2a4] ss:$108 sps:$4 sm:$0xff]   ;;  %v7352_v38 = vld [vmem:[%s7806_s5 + $0x2dc] ss:$108 sps:$4 sm:$0xff]  }
 0x121   : > { %4428 = vmatprep.subr.bf16.mxu0 %v7209_v40  ;;  %3875 = vmatprep.mubr.bf16.mxu1 %v7256_v41  ;;  %v7296_v39 = vld [vmem:[%s7816_s30 + $0x450] ss:$8 sps:$4 sm:$0xff]   ;;  %v7307_v41 = vld [vmem:[%s7816_s30 + $0x464] ss:$8 sps:$4 sm:$0xff]  }
 0x122   : > { %4442 = vmatprep.mubr.bf16.mxu0 %v7262_v42  ;;  %v7299_v40 = vld [vmem:[%s7816_s30 + $0xb50] ss:$8 sps:$4 sm:$0xff]  }
 0x123   : > { %3862 = vmatpush1.bf16.msra.mxu1 %v7204_v43  ;;  %v7304_v42 = vld [vmem:[%s7806_s5 + $0x2a0] ss:$108 sps:$4 sm:$0xff]  }
 0x124   : > { %4429 = vmatpush1.bf16.msra.mxu0 %v7207_v44  ;;  %3863 = vmatprep.subr.bf16.mxu1 %v7212_v45  ;;  %v7310_v43 = vld [vmem:[%s7816_s30 + $0xb64] ss:$8 sps:$4 sm:$0xff]   ;;  %v7305_v44 = vld [vmem:[%s7816_s30 + $0x460] ss:$8 sps:$4 sm:$0xff]  }
 0x125   : > { %4430 = vmatprep.subr.bf16.mxu0 %v7217_v46  ;;  %v7308_v45 = vld [vmem:[%s7816_s30 + $0xb60] ss:$8 sps:$4 sm:$0xff]  }
 0x126   : > { %v358_v46 = vld [vmem:[%s7806_s5 + $0x378] sm:$0xff] }
 0x127   : > { %3864 = vmatpush1.bf16.msra.mxu1 %v7210_v47  ;;  %v7357_v47 = vld [vmem:[%s7806_s5 + $0x2d8] ss:$108 sps:$4 sm:$0xff]  }
 0x128   : > { %4431 = vmatpush1.bf16.msra.mxu0 %v7215_v48  ;;  %3865 = vmatprep.subr.bf16.mxu1 %v7221_v49  ;;  %v365_v48 = vld [vmem:[%s7806_s5 + $0x3b0] sm:$0xff] }
 0x129   : > { %4432 = vmatprep.subr.bf16.mxu0 %v7224_v50  ;;  %v7313_v49 = vld [vmem:[%s7816_s30 + $0x474] ss:$8 sps:$4 sm:$0xff]  }
 0x12a   : > { %v7316_v50 = vld [vmem:[%s7816_s30 + $0xb74] ss:$8 sps:$4 sm:$0xff]  }
 0x12b   : > { %3866 = vmatpush1.bf16.msra.mxu1 %v7219_v51  ;;  %v5799_v51 = vcombine.high %v358_v46, %v358_v46 }
 0x12c   : > { %4433 = vmatpush1.bf16.msra.mxu0 %v7222_v52  ;;  %3867 = vmatprep.subr.bf16.mxu1 %v7227_v53  ;;  %v5813_v52 = vcombine.high %v365_v48, %v365_v48  ;;  %v7311_v53 = vld [vmem:[%s7816_s30 + $0x470] ss:$8 sps:$4 sm:$0xff]  }
 0x12d   : > { %4434 = vmatprep.subr.bf16.mxu0 %v7232_v54  ;;  %v7314_v54 = vld [vmem:[%s7816_s30 + $0xb70] ss:$8 sps:$4 sm:$0xff]  }
 0x12f   : > { %3868 = vmatpush1.bf16.msra.mxu1 %v7225_v55  ;;  %v7321_v55 = vld [vmem:[%s7816_s30 + $0x484] ss:$8 sps:$4 sm:$0xff]  }
 0x130   : > { %4435 = vmatpush1.bf16.msra.mxu0 %v7230_v56  ;;  %3869 = vmatprep.subr.bf16.mxu1 %v7236_v57  ;;  %v7326_v56 = vld [vmem:[%s7816_s30 + $0xb84] ss:$8 sps:$4 sm:$0xff]   ;;  %v5798_v57 = vcombine.low %v358_v46, %v358_v46  ;;  %v7393_v46 = vld [vmem:[%s7816_s30 + $0xc10] ss:$8 sps:$4 sm:$0xff]  }
 0x131   : > { %4436 = vmatprep.subr.bf16.mxu0 %v7239_v58  ;;  %v7319_v58 = vld [vmem:[%s7816_s30 + $0x480] ss:$8 sps:$4 sm:$0xff]  }
 0x133   : > { %3870 = vmatpush1.bf16.msra.mxu1 %v7234_v59  ;;  %v5812_v59 = vcombine.low %v365_v48, %v365_v48  ;;  %v7398_v48 = vld [vmem:[%s7806_s5 + $0xf8] ss:$108 sps:$4 sm:$0xff]  }
 0x134   : > { %4437 = vmatpush1.bf16.msra.mxu0 %v7237_v60  ;;  %3871 = vmatprep.subr.bf16.mxu1 %v7242_v61  ;;  %v7324_v60 = vld [vmem:[%s7816_s30 + $0xb80] ss:$8 sps:$4 sm:$0xff]   ;;  %v7330_v61 = vld [vmem:[%s7816_s30 + $0x494] ss:$8 sps:$4 sm:$0xff]  }
 0x135   : > { %4438 = vmatprep.subr.bf16.mxu0 %v7246_v62  ;;  %v7333_v62 = vld [vmem:[%s7816_s30 + $0xb94] ss:$8 sps:$4 sm:$0xff]  }
 0x137   : > { %3872 = vmatpush1.bf16.msra.mxu1 %v7240_v63  ;;  %v7380_v63 = vld [vmem:[%s7806_s5 + $0x24] ss:$108 sps:$4 sm:$0xff]  }
 0x138   : > { %4439 = vmatpush1.bf16.msra.mxu0 %v7244_v0  ;;  %3873 = vmatprep.subr.bf16.mxu1 %v7250_v1  ;;  %v7386_v0 = vld [vmem:[%s7806_s5 + $0x5c] ss:$108 sps:$4 sm:$0xff]   ;;  %v7328_v1 = vld [vmem:[%s7816_s30 + $0x490] ss:$8 sps:$4 sm:$0xff]  }
 0x139   : > { %4440 = vmatprep.subr.bf16.mxu0 %v7253_v2  ;;  %v7331_v2 = vld [vmem:[%s7816_s30 + $0xb90] ss:$8 sps:$4 sm:$0xff]  }
 0x13b   : > { %3874 = vmatpush1.bf16.msra.mxu1 %v7248_v3  ;;  %v7336_v3 = vld [vmem:[%s7816_s30 + $0x4a4] ss:$8 sps:$4 sm:$0xff]  }
 0x13c   : > { %4441 = vmatpush1.bf16.msra.mxu0 %v7251_v4  ;;  %3924 = vmatprep.subr.bf16.mxu1 %v7259_v5  ;;  %v7341_v4 = vld [vmem:[%s7816_s30 + $0xba4] ss:$8 sps:$4 sm:$0xff]   ;;  %v7334_v5 = vld [vmem:[%s7816_s30 + $0x4a0] ss:$8 sps:$4 sm:$0xff]  }
 0x13d   : > { %4491 = vmatprep.subr.bf16.mxu0 %v7265_v6  ;;  %v7339_v6 = vld [vmem:[%s7816_s30 + $0xba0] ss:$8 sps:$4 sm:$0xff]  }
 0x13e   : > { %3876 = vmatmul.mubr.bf16.vlgmr.msra.gmra.mrb[0].mxu1 %v7254_v7  ;;  %v7345_v7 = vld [vmem:[%s7816_s30 + $0x4b4] ss:$8 sps:$4 sm:$0xff]  }
 0x13f   : > { %4443 = vmatmul.mubr.bf16.vlgmr.msra.gmra.mrb[0].mxu0 %v7260_v9  ;;  %3925 = vmatpush1.bf16.msra.mxu1 %v7257_v8  ;;  %v7348_v8 = vld [vmem:[%s7816_s30 + $0xbb4] ss:$8 sps:$4 sm:$0xff]   ;;  %v7343_v9 = vld [vmem:[%s7816_s30 + $0x4b0] ss:$8 sps:$4 sm:$0xff]  }
 0x140   : > { %4492 = vmatpush1.bf16.msra.mxu0 %v7263_v10  ;;  %3926 = vmatprep.subr.bf16.mxu1 %v7268_v11  ;;  %v7346_v10 = vld [vmem:[%s7816_s30 + $0xbb0] ss:$8 sps:$4 sm:$0xff]   ;;  %v7351_v11 = vld [vmem:[%s7816_s30 + $0x4c4] ss:$8 sps:$4 sm:$0xff]  }
 0x141   : > { %4493 = vmatprep.subr.bf16.mxu0 %v7271_v12  ;;  %3885 = vmatprep.mubr.bf16.mxu1 %v7272_v13  ;;  %v7356_v12 = vld [vmem:[%s7816_s30 + $0xbc4] ss:$8 sps:$4 sm:$0xff]   ;;  %v7349_v13 = vld [vmem:[%s7816_s30 + $0x4c0] ss:$8 sps:$4 sm:$0xff]  }
 0x142   : > { %4452 = vmatprep.mubr.bf16.mxu0 %v7322_v14  ;;  %v7354_v14 = vld [vmem:[%s7816_s30 + $0xbc0] ss:$8 sps:$4 sm:$0xff]  }
 0x143   : > { %3927 = vmatpush1.bf16.msra.mxu1 %v7266_v15  ;;  %v7360_v15 = vld [vmem:[%s7816_s30 + $0x4d4] ss:$8 sps:$4 sm:$0xff]  }
 0x144   : > { %4494 = vmatpush1.bf16.msra.mxu0 %v7269_v16  ;;  %3928 = vmatprep.subr.bf16.mxu1 %v7277_v17  ;;  %v7363_v16 = vld [vmem:[%s7816_s30 + $0xbd4] ss:$8 sps:$4 sm:$0xff]   ;;  %v7358_v17 = vld [vmem:[%s7816_s30 + $0x4d0] ss:$8 sps:$4 sm:$0xff]  }
 0x145   : > { %4495 = vmatprep.subr.bf16.mxu0 %v7280_v18  ;;  %v7361_v18 = vld [vmem:[%s7816_s30 + $0xbd0] ss:$8 sps:$4 sm:$0xff]  }
 0x146   : > { %3886 = vmatmul.mubr.bf16.gmra.mrb[4].mxu1 %v7274_v19  ;;  %v7366_v19 = vld [vmem:[%s7816_s30 + $0x4e4] ss:$8 sps:$4 sm:$0xff]  }
 0x147   : > { %4453 = vmatmul.mubr.bf16.gmra.mrb[4].mxu0 %v7327_v22  ;;  %3929 = vmatpush1.bf16.msra.mxu1 %v7275_v20  ;;  %v7370_v20 = vld [vmem:[%s7816_s30 + $0xbe4] ss:$8 sps:$4 sm:$0xff]  }
 0x148   : > { %4496 = vmatpush1.bf16.msra.mxu0 %v7278_v21  ;;  %3930 = vmatprep.subr.bf16.mxu1 %v7283_v23  ;;  %v7364_v23 = vld [vmem:[%s7816_s30 + $0x4e0] ss:$8 sps:$4 sm:$0xff]  }
 0x149   : > { %4497 = vmatprep.subr.bf16.mxu0 %v7286_v24  ;;  %3895 = vmatprep.mubr.bf16.mxu1 %v7287_v25 }
 0x14a   : > { %4462 = vmatprep.mubr.bf16.mxu0 %v7337_v26  ;;  %v7368_v26 = vld [vmem:[%s7816_s30 + $0xbe0] ss:$8 sps:$4 sm:$0xff]  }
 0x14b   : > { %3931 = vmatpush1.bf16.msra.mxu1 %v7281_v27  ;;  %v7374_v27 = vld [vmem:[%s7816_s30 + $0x4f4] ss:$8 sps:$4 sm:$0xff]  }
 0x14c   : > { %4498 = vmatpush1.bf16.msra.mxu0 %v7284_v28  ;;  %3932 = vmatprep.subr.bf16.mxu1 %v7292_v29 }
 0x14d   : > { %4499 = vmatprep.subr.bf16.mxu0 %v7295_v30  ;;  %v7377_v30 = vld [vmem:[%s7816_s30 + $0xbf4] ss:$8 sps:$4 sm:$0xff]  }
 0x14e   : > { %3896 = vmatmul.mubr.bf16.gmra.mrb[8].mxu1 %v7289_v31 }
 0x14f   : > { %4463 = vmatmul.mubr.bf16.gmra.mrb[8].mxu0 %v7342_v34  ;;  %3933 = vmatpush1.bf16.msra.mxu1 %v7290_v32  ;;  %v7375_v34 = vld [vmem:[%s7816_s30 + $0xbf0] ss:$8 sps:$4 sm:$0xff]  }
 0x150   : > { %4500 = vmatpush1.bf16.msra.mxu0 %v7293_v33  ;;  %3934 = vmatprep.subr.bf16.mxu1 %v7298_v35  ;;  %v7372_v33 = vld [vmem:[%s7816_s30 + $0x4f0] ss:$8 sps:$4 sm:$0xff]   ;;  %v7383_v35 = vld [vmem:[%s7816_s30 + $0x504] ss:$8 sps:$4 sm:$0xff]  }
 0x151   : > { %4501 = vmatprep.subr.bf16.mxu0 %v7301_v36  ;;  %3905 = vmatprep.mubr.bf16.mxu1 %v7302_v37  ;;  %v7378_v36 = vld [vmem:[%s7806_s5 + $0x20] ss:$108 sps:$4 sm:$0xff]  }
 0x152   : > { %4472 = vmatprep.mubr.bf16.mxu0 %v7352_v38  ;;  %v7389_v37 = vld [vmem:[%s7816_s30 + $0xc04] ss:$8 sps:$4 sm:$0xff]   ;;  %v7381_v38 = vld [vmem:[%s7816_s30 + $0x500] ss:$8 sps:$4 sm:$0xff]  }
 0x153   : > { %3935 = vmatpush1.bf16.msra.mxu1 %v7296_v39  ;;  %v7384_v39 = vld [vmem:[%s7806_s5 + $0x58] ss:$108 sps:$4 sm:$0xff]  }
 0x154   : > { %4502 = vmatpush1.bf16.msra.mxu0 %v7299_v40  ;;  %3936 = vmatprep.subr.bf16.mxu1 %v7307_v41  ;;  %v7387_v40 = vld [vmem:[%s7816_s30 + $0xc00] ss:$8 sps:$4 sm:$0xff]   ;;  %v7392_v41 = vld [vmem:[%s7816_s30 + $0x514] ss:$8 sps:$4 sm:$0xff]  }
 0x155   : > { %4503 = vmatprep.subr.bf16.mxu0 %v7310_v43  ;;  %v7396_v43 = vld [vmem:[%s7806_s5 + $0xfc] ss:$108 sps:$4 sm:$0xff]  }
 0x156   : > { %3906 = vmatmul.mubr.bf16.gmra.mrb[12].mxu1 %v7304_v42  ;;  %v7395_v42 = vld [vmem:[%s7816_s30 + $0xc14] ss:$8 sps:$4 sm:$0xff]  }
 0x157   : > { %4473 = vmatmul.mubr.bf16.gmra.mrb[12].mxu0 %v7357_v47  ;;  %3937 = vmatpush1.bf16.msra.mxu1 %v7305_v44  ;;  %v7442_v44 = vld [vmem:[%s7806_s5 + $0x134] ss:$108 sps:$4 sm:$0xff]  }
 0x158   : > { %4504 = vmatpush1.bf16.msra.mxu0 %v7308_v45  ;;  %3938 = vmatprep.subr.bf16.mxu1 %v7313_v49  ;;  %v7390_v45 = vld [vmem:[%s7816_s30 + $0x510] ss:$8 sps:$4 sm:$0xff]   ;;  %v7401_v47 = vld [vmem:[%s7816_s30 + $0x524] ss:$8 sps:$4 sm:$0xff]  }
 0x159   : > { %4505 = vmatprep.subr.bf16.mxu0 %v7316_v50  ;;  %3915 = vmatprep.mubr.bf16.mxu1 %v5799_v51  ;;  %v7404_v49 = vld [vmem:[%s7816_s30 + $0xc24] ss:$8 sps:$4 sm:$0xff]   ;;  %v7399_v50 = vld [vmem:[%s7816_s30 + $0x520] ss:$8 sps:$4 sm:$0xff]  }
 0x15a   : > { %4482 = vmatprep.mubr.bf16.mxu0 %v5813_v52  ;;  %v7448_v51 = vld [vmem:[%s7806_s5 + $0x130] ss:$108 sps:$4 sm:$0xff]  }
 0x15b   : > { %3939 = vmatpush1.bf16.msra.mxu1 %v7311_v53  ;;  %v7402_v52 = vld [vmem:[%s7816_s30 + $0xc20] ss:$8 sps:$4 sm:$0xff]   ;;  %v7407_v53 = vld [vmem:[%s7816_s30 + $0x534] ss:$8 sps:$4 sm:$0xff]  }
 0x15c   : > { %4506 = vmatpush1.bf16.msra.mxu0 %v7314_v54  ;;  %3940 = vmatprep.subr.bf16.mxu1 %v7321_v55  ;;  %v7410_v54 = vld [vmem:[%s7816_s30 + $0xc34] ss:$8 sps:$4 sm:$0xff]  }
 0x15d   : > { %4507 = vmatprep.subr.bf16.mxu0 %v7326_v56  ;;  %v7411_v55 = vld [vmem:[%s7806_s5 + $0x1d4] ss:$108 sps:$4 sm:$0xff]   ;;  %v7458_v56 = vld [vmem:[%s7806_s5 + $0x20c] ss:$108 sps:$4 sm:$0xff]  }
 0x15e   : > { %3916 = vmatmul.mubr.bf16.gmra.mrb[28].mxu1 %v5798_v57  ;;  %v7405_v57 = vld [vmem:[%s7816_s30 + $0x530] ss:$8 sps:$4 sm:$0xff]  }
 0x15f   : > { %4483 = vmatmul.mubr.bf16.gmra.mrb[28].mxu0 %v5812_v59  ;;  %3941 = vmatpush1.bf16.msra.mxu1 %v7319_v58  ;;  %v7408_v58 = vld [vmem:[%s7816_s30 + $0xc30] ss:$8 sps:$4 sm:$0xff]   ;;  %v7416_v59 = vld [vmem:[%s7816_s30 + $0x544] ss:$8 sps:$4 sm:$0xff]  }
 0x160   : > { %4508 = vmatpush1.bf16.msra.mxu0 %v7324_v60  ;;  %3942 = vmatprep.subr.bf16.mxu1 %v7330_v61  ;;  %v7413_v60 = vld [vmem:[%s7806_s5 + $0x1d0] ss:$108 sps:$4 sm:$0xff]   ;;  %v7419_v61 = vld [vmem:[%s7816_s30 + $0xc44] ss:$8 sps:$4 sm:$0xff]  }
 0x161   : > { %4509 = vmatprep.subr.bf16.mxu0 %v7333_v62  ;;  %3956 = vmatprep.mubr.bf16.mxu1 %v7380_v63  ;;  %v7414_v62 = vld [vmem:[%s7816_s30 + $0x540] ss:$8 sps:$4 sm:$0xff]  }
 0x162   : > { %4523 = vmatprep.mubr.bf16.mxu0 %v7386_v0  ;;  %v7463_v63 = vld [vmem:[%s7806_s5 + $0x208] ss:$108 sps:$4 sm:$0xff]  }
 0x163   : > { %3943 = vmatpush1.bf16.msra.mxu1 %v7328_v1  ;;  %v7417_v0 = vld [vmem:[%s7816_s30 + $0xc40] ss:$8 sps:$4 sm:$0xff]   ;;  %v7422_v1 = vld [vmem:[%s7816_s30 + $0x554] ss:$8 sps:$4 sm:$0xff]  }
 0x164   : > { %4510 = vmatpush1.bf16.msra.mxu0 %v7331_v2  ;;  %3944 = vmatprep.subr.bf16.mxu1 %v7336_v3  ;;  %v7425_v2 = vld [vmem:[%s7816_s30 + $0xc54] ss:$8 sps:$4 sm:$0xff]   ;;  %v7426_v3 = vld [vmem:[%s7806_s5 + $0x2ac] ss:$108 sps:$4 sm:$0xff]  }
 0x165   : > { %4511 = vmatprep.subr.bf16.mxu0 %v7341_v4  ;;  %v7473_v4 = vld [vmem:[%s7806_s5 + $0x2e4] ss:$108 sps:$4 sm:$0xff]  }
 0x167   : > { %3945 = vmatpush1.bf16.msra.mxu1 %v7334_v5  ;;  %v7420_v5 = vld [vmem:[%s7816_s30 + $0x550] ss:$8 sps:$4 sm:$0xff]  }
 0x168   : > { %4512 = vmatpush1.bf16.msra.mxu0 %v7339_v6  ;;  %3946 = vmatprep.subr.bf16.mxu1 %v7345_v7  ;;  %v7423_v6 = vld [vmem:[%s7816_s30 + $0xc50] ss:$8 sps:$4 sm:$0xff]   ;;  %v7431_v7 = vld [vmem:[%s7816_s30 + $0x564] ss:$8 sps:$4 sm:$0xff]  }
 0x169   : > { %4513 = vmatprep.subr.bf16.mxu0 %v7348_v8  ;;  %v7428_v8 = vld [vmem:[%s7806_s5 + $0x2a8] ss:$108 sps:$4 sm:$0xff]  }
 0x16b   : > { %3947 = vmatpush1.bf16.msra.mxu1 %v7343_v9  ;;  %v7434_v9 = vld [vmem:[%s7816_s30 + $0xc64] ss:$8 sps:$4 sm:$0xff]  }
 0x16c   : > { %4514 = vmatpush1.bf16.msra.mxu0 %v7346_v10  ;;  %3948 = vmatprep.subr.bf16.mxu1 %v7351_v11  ;;  %v7429_v10 = vld [vmem:[%s7816_s30 + $0x560] ss:$8 sps:$4 sm:$0xff]  }
 0x16d   : > { %4515 = vmatprep.subr.bf16.mxu0 %v7356_v12  ;;  %v359_v11 = vld [vmem:[%s7806_s5 + $0x380] sm:$0xff] }
 0x16e   : > { %v7478_v12 = vld [vmem:[%s7806_s5 + $0x2e0] ss:$108 sps:$4 sm:$0xff]  }
 0x16f   : > { %3949 = vmatpush1.bf16.msra.mxu1 %v7349_v13  ;;  %v366_v13 = vld [vmem:[%s7806_s5 + $0x3b8] sm:$0xff] }
 0x170   : > { %4516 = vmatpush1.bf16.msra.mxu0 %v7354_v14  ;;  %3950 = vmatprep.subr.bf16.mxu1 %v7360_v15  ;;  %v7432_v14 = vld [vmem:[%s7816_s30 + $0xc60] ss:$8 sps:$4 sm:$0xff]   ;;  %v7437_v15 = vld [vmem:[%s7816_s30 + $0x574] ss:$8 sps:$4 sm:$0xff]  }
 0x171   : > { %4517 = vmatprep.subr.bf16.mxu0 %v7363_v16  ;;  %v8261_v21 = vpop.f32.mrb[16].mxu1  ;;  %v7440_v16 = vld [vmem:[%s7816_s30 + $0xc74] ss:$8 sps:$4 sm:$0xff]  }
 0x172   : > { %v8263_v22 = vpop.f32.mrb[16].mxu0  ;;  %v8266_v24 = vpop.f32.mrb[17].mxu1 }
 0x173   : > { %v8268_v25 = vpop.f32.mrb[17].mxu0  ;;  %3951 = vmatpush1.bf16.msra.mxu1 %v7358_v17  ;;  %v3678_v28 = vpop.f32.mrb[18].mxu1  ;;  %v5801_v17 = vcombine.high %v359_v11, %v359_v11 }
 0x174   : > { %4518 = vmatpush1.bf16.msra.mxu0 %v7361_v18  ;;  %v4245_v29 = vpop.f32.mrb[18].mxu0  ;;  %3952 = vmatprep.subr.bf16.mxu1 %v7366_v19  ;;  %v3679_v31 = vpop.f32.mrb[19].mxu1  ;;  %v5815_v18 = vcombine.high %v366_v13, %v366_v13  ;;  %v7435_v19 = vld [vmem:[%s7816_s30 + $0x570] ss:$8 sps:$4 sm:$0xff]   ;;  %v5800_v28 = vcombine.low %v359_v11, %v359_v11  ;;  %v7513_v11 = vld [vmem:[%s7816_s30 + $0x614] ss:$8 sps:$4 sm:$0xff]  }
 0x175   : > { %4519 = vmatprep.subr.bf16.mxu0 %v7370_v20  ;;  %v4246_v32 = vpop.f32.mrb[19].mxu0  ;;  %v7438_v20 = vld [vmem:[%s7816_s30 + $0xc70] ss:$8 sps:$4 sm:$0xff]   ;;  %v7449_v29 = vld [vmem:[%s7816_s30 + $0xc80] ss:$8 sps:$4 sm:$0xff]   ;;  %v5814_v31 = vcombine.low %v366_v13, %v366_v13 }
 0x176   : > { %v7457_v32 = vld [vmem:[%s7816_s30 + $0xc94] ss:$8 sps:$4 sm:$0xff]   ;;  %v7523_v13 = vld [vmem:[%s7816_s30 + $0xd00] ss:$8 sps:$4 sm:$0xff]  }
 0x177   : > { %3953 = vmatpush1.bf16.msra.mxu1 %v7364_v23  ;;  %v7447_v23 = vld [vmem:[%s7816_s30 + $0x584] ss:$8 sps:$4 sm:$0xff]  }
 0x178   : > { %4520 = vmatpush1.bf16.msra.mxu0 %v7368_v26  ;;  %3954 = vmatprep.subr.bf16.mxu1 %v7374_v27  ;;  %v7451_v26 = vld [vmem:[%s7816_s30 + $0xc84] ss:$8 sps:$4 sm:$0xff]   ;;  %v7445_v27 = vld [vmem:[%s7816_s30 + $0x580] ss:$8 sps:$4 sm:$0xff]  }
 0x179   : > { %4521 = vmatprep.subr.bf16.mxu0 %v7377_v30  ;;  %v7454_v30 = vld [vmem:[%s7816_s30 + $0x594] ss:$8 sps:$4 sm:$0xff]  }
 0x17b   : > { %3955 = vmatpush1.bf16.msra.mxu1 %v7372_v33  ;;  %v7504_v33 = vld [vmem:[%s7806_s5 + $0x2c] ss:$108 sps:$4 sm:$0xff]  }
 0x17c   : > { %4522 = vmatpush1.bf16.msra.mxu0 %v7375_v34  ;;  %4005 = vmatprep.subr.bf16.mxu1 %v7383_v35  ;;  %v7507_v34 = vld [vmem:[%s7806_s5 + $0x64] ss:$108 sps:$4 sm:$0xff]  }
 0x17d   : > { %4572 = vmatprep.subr.bf16.mxu0 %v7389_v37  ;;  %v7452_v35 = vld [vmem:[%s7816_s30 + $0x590] ss:$8 sps:$4 sm:$0xff]   ;;  %v7462_v37 = vld [vmem:[%s7816_s30 + $0x5a4] ss:$8 sps:$4 sm:$0xff]  }
 0x17e   : > { %3957 = vmatmul.mubr.bf16.vlgmr.msra.gmra.mrb[0].mxu1 %v7378_v36  ;;  %v7455_v36 = vld [vmem:[%s7816_s30 + $0xc90] ss:$8 sps:$4 sm:$0xff]  }
 0x17f   : > { %4524 = vmatmul.mubr.bf16.vlgmr.msra.gmra.mrb[0].mxu0 %v7384_v39  ;;  %4006 = vmatpush1.bf16.msra.mxu1 %v7381_v38  ;;  %v7466_v38 = vld [vmem:[%s7816_s30 + $0xca4] ss:$8 sps:$4 sm:$0xff]   ;;  %v7460_v39 = vld [vmem:[%s7816_s30 + $0x5a0] ss:$8 sps:$4 sm:$0xff]  }
 0x180   : > { %4573 = vmatpush1.bf16.msra.mxu0 %v7387_v40  ;;  %4007 = vmatprep.subr.bf16.mxu1 %v7392_v41  ;;  %v7464_v40 = vld [vmem:[%s7816_s30 + $0xca0] ss:$8 sps:$4 sm:$0xff]   ;;  %v7469_v41 = vld [vmem:[%s7816_s30 + $0x5b4] ss:$8 sps:$4 sm:$0xff]  }
 0x181   : > { %4574 = vmatprep.subr.bf16.mxu0 %v7395_v42  ;;  %3966 = vmatprep.mubr.bf16.mxu1 %v7396_v43  ;;  %v7472_v42 = vld [vmem:[%s7816_s30 + $0xcb4] ss:$8 sps:$4 sm:$0xff]   ;;  %v7467_v43 = vld [vmem:[%s7816_s30 + $0x5b0] ss:$8 sps:$4 sm:$0xff]  }
 0x182   : > { %4533 = vmatprep.mubr.bf16.mxu0 %v7442_v44  ;;  %v7470_v44 = vld [vmem:[%s7816_s30 + $0xcb0] ss:$8 sps:$4 sm:$0xff]  }
 0x183   : > { %4008 = vmatpush1.bf16.msra.mxu1 %v7390_v45  ;;  %v7477_v45 = vld [vmem:[%s7816_s30 + $0x5c4] ss:$8 sps:$4 sm:$0xff]  }
 0x184   : > { %4575 = vmatpush1.bf16.msra.mxu0 %v7393_v46  ;;  %4009 = vmatprep.subr.bf16.mxu1 %v7401_v47  ;;  %v7481_v46 = vld [vmem:[%s7816_s30 + $0xcc4] ss:$8 sps:$4 sm:$0xff]   ;;  %v7475_v47 = vld [vmem:[%s7816_s30 + $0x5c0] ss:$8 sps:$4 sm:$0xff]  }
 0x185   : > { %4576 = vmatprep.subr.bf16.mxu0 %v7404_v49  ;;  %v7484_v49 = vld [vmem:[%s7816_s30 + $0x5d4] ss:$8 sps:$4 sm:$0xff]  }
 0x186   : > { %3967 = vmatmul.mubr.bf16.gmra.mrb[4].mxu1 %v7398_v48  ;;  %v7479_v48 = vld [vmem:[%s7816_s30 + $0xcc0] ss:$8 sps:$4 sm:$0xff]  }
 0x187   : > { %4534 = vmatmul.mubr.bf16.gmra.mrb[4].mxu0 %v7448_v51  ;;  %4010 = vmatpush1.bf16.msra.mxu1 %v7399_v50  ;;  %v7487_v50 = vld [vmem:[%s7816_s30 + $0xcd4] ss:$8 sps:$4 sm:$0xff]   ;;  %v7482_v51 = vld [vmem:[%s7816_s30 + $0x5d0] ss:$8 sps:$4 sm:$0xff]  }
 0x188   : > { %4577 = vmatpush1.bf16.msra.mxu0 %v7402_v52  ;;  %4011 = vmatprep.subr.bf16.mxu1 %v7407_v53  ;;  %v7485_v52 = vld [vmem:[%s7816_s30 + $0xcd0] ss:$8 sps:$4 sm:$0xff]   ;;  %v7491_v53 = vld [vmem:[%s7816_s30 + $0x5e4] ss:$8 sps:$4 sm:$0xff]  }
 0x189   : > { %4578 = vmatprep.subr.bf16.mxu0 %v7410_v54  ;;  %3976 = vmatprep.mubr.bf16.mxu1 %v7411_v55  ;;  %v7495_v54 = vld [vmem:[%s7816_s30 + $0xce4] ss:$8 sps:$4 sm:$0xff]  }
 0x18a   : > { %4543 = vmatprep.mubr.bf16.mxu0 %v7458_v56 }
 0x18b   : > { %4012 = vmatpush1.bf16.msra.mxu1 %v7405_v57 }
 0x18c   : > { %4579 = vmatpush1.bf16.msra.mxu0 %v7408_v58  ;;  %4013 = vmatprep.subr.bf16.mxu1 %v7416_v59 }
 0x18d   : > { %4580 = vmatprep.subr.bf16.mxu0 %v7419_v61  ;;  %v7489_v61 = vld [vmem:[%s7816_s30 + $0x5e0] ss:$8 sps:$4 sm:$0xff]  }
 0x18e   : > { %3977 = vmatmul.mubr.bf16.gmra.mrb[8].mxu1 %v7413_v60 }
 0x18f   : > { %4544 = vmatmul.mubr.bf16.gmra.mrb[8].mxu0 %v7463_v63  ;;  %4014 = vmatpush1.bf16.msra.mxu1 %v7414_v62  ;;  %v7493_v62 = vld [vmem:[%s7816_s30 + $0xce0] ss:$8 sps:$4 sm:$0xff]  }
 0x190   : > { %4581 = vmatpush1.bf16.msra.mxu0 %v7417_v0  ;;  %4015 = vmatprep.subr.bf16.mxu1 %v7422_v1  ;;  %v7501_v1 = vld [vmem:[%s7816_s30 + $0xcf4] ss:$8 sps:$4 sm:$0xff]  }
 0x191   : > { %4582 = vmatprep.subr.bf16.mxu0 %v7425_v2  ;;  %3986 = vmatprep.mubr.bf16.mxu1 %v7426_v3  ;;  %v7496_v3 = vld [vmem:[%s7816_s30 + $0x5f0] ss:$8 sps:$4 sm:$0xff]  }
 0x192   : > { %4553 = vmatprep.mubr.bf16.mxu0 %v7473_v4  ;;  %v7499_v4 = vld [vmem:[%s7816_s30 + $0xcf0] ss:$8 sps:$4 sm:$0xff]  }
 0x193   : > { %4016 = vmatpush1.bf16.msra.mxu1 %v7420_v5  ;;  %v7510_v5 = vld [vmem:[%s7816_s30 + $0x604] ss:$8 sps:$4 sm:$0xff]  }
 0x194   : > { %4583 = vmatpush1.bf16.msra.mxu0 %v7423_v6  ;;  %4017 = vmatprep.subr.bf16.mxu1 %v7431_v7  ;;  %v7525_v6 = vld [vmem:[%s7816_s30 + $0xd04] ss:$8 sps:$4 sm:$0xff]   ;;  %v7502_v7 = vld [vmem:[%s7806_s5 + $0x28] ss:$108 sps:$4 sm:$0xff]  }
 0x195   : > { %4584 = vmatprep.subr.bf16.mxu0 %v7434_v9  ;;  %v7508_v9 = vld [vmem:[%s7816_s30 + $0x600] ss:$8 sps:$4 sm:$0xff]  }
 0x196   : > { %3987 = vmatmul.mubr.bf16.gmra.mrb[12].mxu1 %v7428_v8  ;;  %v7505_v8 = vld [vmem:[%s7806_s5 + $0x60] ss:$108 sps:$4 sm:$0xff]  }
 0x197   : > { %4554 = vmatmul.mubr.bf16.gmra.mrb[12].mxu0 %v7478_v12  ;;  %4018 = vmatpush1.bf16.msra.mxu1 %v7429_v10  ;;  %v7514_v10 = vld [vmem:[%s7806_s5 + $0x104] ss:$108 sps:$4 sm:$0xff]   ;;  %v7516_v12 = vld [vmem:[%s7806_s5 + $0x13c] ss:$108 sps:$4 sm:$0xff]  }
 0x198   : > { %4585 = vmatpush1.bf16.msra.mxu0 %v7432_v14  ;;  %4019 = vmatprep.subr.bf16.mxu1 %v7437_v15  ;;  %v7531_v14 = vld [vmem:[%s7816_s30 + $0xd14] ss:$8 sps:$4 sm:$0xff]   ;;  %v7511_v15 = vld [vmem:[%s7816_s30 + $0x610] ss:$8 sps:$4 sm:$0xff]  }
 0x199   : > { %4586 = vmatprep.subr.bf16.mxu0 %v7440_v16  ;;  %3996 = vmatprep.mubr.bf16.mxu1 %v5801_v17  ;;  %v7521_v16 = vld [vmem:[%s7816_s30 + $0x624] ss:$8 sps:$4 sm:$0xff]   ;;  %v7529_v17 = vld [vmem:[%s7816_s30 + $0xd10] ss:$8 sps:$4 sm:$0xff]  }
 0x19a   : > { %4563 = vmatprep.mubr.bf16.mxu0 %v5815_v18  ;;  %v7518_v18 = vld [vmem:[%s7806_s5 + $0x100] ss:$108 sps:$4 sm:$0xff]  }
 0x19b   : > { %4020 = vmatpush1.bf16.msra.mxu1 %v7435_v19  ;;  %v7522_v19 = vld [vmem:[%s7806_s5 + $0x138] ss:$108 sps:$4 sm:$0xff]  }
 0x19c   : > { %4587 = vmatpush1.bf16.msra.mxu0 %v7438_v20  ;;  %4021 = vmatprep.subr.bf16.mxu1 %v7447_v23  ;;  %v7519_v20 = vld [vmem:[%s7816_s30 + $0x620] ss:$8 sps:$4 sm:$0xff]  }
 0x19d   : > { %4588 = vmatprep.subr.bf16.mxu0 %v7451_v26  ;;  %v7532_v23 = vld [vmem:[%s7806_s5 + $0x1dc] ss:$108 sps:$4 sm:$0xff]  }
 0x19e   : > { %3997 = vmatmul.mubr.bf16.gmra.mrb[32].mxu1 %v5800_v28  ;;  %v7528_v26 = vld [vmem:[%s7816_s30 + $0x634] ss:$8 sps:$4 sm:$0xff]   ;;  %v7543_v28 = vld [vmem:[%s7816_s30 + $0xd24] ss:$8 sps:$4 sm:$0xff]  }
 0x19f   : > { %4564 = vmatmul.mubr.bf16.gmra.mrb[32].mxu0 %v5814_v31  ;;  %4022 = vmatpush1.bf16.msra.mxu1 %v7445_v27  ;;  %v7534_v27 = vld [vmem:[%s7806_s5 + $0x214] ss:$108 sps:$4 sm:$0xff]  }
 0x1a0   : > { %4589 = vmatpush1.bf16.msra.mxu0 %v7449_v29  ;;  %4023 = vmatprep.subr.bf16.mxu1 %v7454_v30  ;;  %v7541_v29 = vld [vmem:[%s7816_s30 + $0xd20] ss:$8 sps:$4 sm:$0xff]   ;;  %v7526_v30 = vld [vmem:[%s7816_s30 + $0x630] ss:$8 sps:$4 sm:$0xff]   ;;  %v7549_v31 = vld [vmem:[%s7816_s30 + $0xd34] ss:$8 sps:$4 sm:$0xff]  }
 0x1a1   : > { %4590 = vmatprep.subr.bf16.mxu0 %v7457_v32  ;;  %4037 = vmatprep.mubr.bf16.mxu1 %v7504_v33  ;;  %v7539_v32 = vld [vmem:[%s7816_s30 + $0x644] ss:$8 sps:$4 sm:$0xff]  }
 0x1a2   : > { %4604 = vmatprep.mubr.bf16.mxu0 %v7507_v34  ;;  %v7536_v33 = vld [vmem:[%s7806_s5 + $0x1d8] ss:$108 sps:$4 sm:$0xff]   ;;  %v7540_v34 = vld [vmem:[%s7806_s5 + $0x210] ss:$108 sps:$4 sm:$0xff]  }
 0x1a3   : > { %4024 = vmatpush1.bf16.msra.mxu1 %v7452_v35  ;;  %v7537_v35 = vld [vmem:[%s7816_s30 + $0x640] ss:$8 sps:$4 sm:$0xff]  }
 0x1a4   : > { %4591 = vmatpush1.bf16.msra.mxu0 %v7455_v36  ;;  %4025 = vmatprep.subr.bf16.mxu1 %v7462_v37  ;;  %v7547_v36 = vld [vmem:[%s7816_s30 + $0xd30] ss:$8 sps:$4 sm:$0xff]   ;;  %v7546_v37 = vld [vmem:[%s7816_s30 + $0x654] ss:$8 sps:$4 sm:$0xff]  }
 0x1a5   : > { %4592 = vmatprep.subr.bf16.mxu0 %v7466_v38  ;;  %v7550_v38 = vld [vmem:[%s7806_s5 + $0x2b4] ss:$108 sps:$4 sm:$0xff]  }
 0x1a7   : > { %4026 = vmatpush1.bf16.msra.mxu1 %v7460_v39  ;;  %v7552_v39 = vld [vmem:[%s7806_s5 + $0x2ec] ss:$108 sps:$4 sm:$0xff]  }
 0x1a8   : > { %4593 = vmatpush1.bf16.msra.mxu0 %v7464_v40  ;;  %4027 = vmatprep.subr.bf16.mxu1 %v7469_v41  ;;  %v7561_v40 = vld [vmem:[%s7816_s30 + $0xd44] ss:$8 sps:$4 sm:$0xff]   ;;  %v7544_v41 = vld [vmem:[%s7816_s30 + $0x650] ss:$8 sps:$4 sm:$0xff]  }
 0x1a9   : > { %4594 = vmatprep.subr.bf16.mxu0 %v7472_v42  ;;  %v7559_v42 = vld [vmem:[%s7816_s30 + $0xd40] ss:$8 sps:$4 sm:$0xff]  }
 0x1ab   : > { %4028 = vmatpush1.bf16.msra.mxu1 %v7467_v43  ;;  %v7557_v43 = vld [vmem:[%s7816_s30 + $0x664] ss:$8 sps:$4 sm:$0xff]  }
 0x1ac   : > { %4595 = vmatpush1.bf16.msra.mxu0 %v7470_v44  ;;  %4029 = vmatprep.subr.bf16.mxu1 %v7477_v45  ;;  %v7567_v44 = vld [vmem:[%s7816_s30 + $0xd54] ss:$8 sps:$4 sm:$0xff]  }
 0x1ad   : > { %4596 = vmatprep.subr.bf16.mxu0 %v7481_v46  ;;  %v360_v45 = vld [vmem:[%s7806_s5 + $0x388] sm:$0xff]  ;;  %v7554_v46 = vld [vmem:[%s7806_s5 + $0x2b0] ss:$108 sps:$4 sm:$0xff]  }
 0x1af   : > { %4030 = vmatpush1.bf16.msra.mxu1 %v7475_v47  ;;  %v7558_v47 = vld [vmem:[%s7806_s5 + $0x2e8] ss:$108 sps:$4 sm:$0xff]  }
 0x1b0   : > { %4597 = vmatpush1.bf16.msra.mxu0 %v7479_v48  ;;  %4031 = vmatprep.subr.bf16.mxu1 %v7484_v49  ;;  %v367_v48 = vld [vmem:[%s7806_s5 + $0x3c0] sm:$0xff] }
 0x1b1   : > { %4598 = vmatprep.subr.bf16.mxu0 %v7487_v50  ;;  %v3755_v55 = vpop.f32.mrb[20].mxu1  ;;  %v7555_v49 = vld [vmem:[%s7816_s30 + $0x660] ss:$8 sps:$4 sm:$0xff]   ;;  %v7565_v50 = vld [vmem:[%s7816_s30 + $0xd50] ss:$8 sps:$4 sm:$0xff]  }
 0x1b2   : > { %v8351_v56 = vpop.f32.mrb[20].mxu0  ;;  %v8354_v57 = vadd.f32 %v3755_v55, %v8261_v21  ;;  %v3757_v58 = vpop.f32.mrb[21].mxu1  ;;  %v7498_v21 = vld [vmem:[%s7816_s30 + $0x5f4] ss:$8 sps:$4 sm:$0xff]   ;;  %v7562_v55 = vld [vmem:[%s7816_s30 + $0x670] ss:$8 sps:$4 sm:$0xff]  }
 0x1b3   : > { %v8356_v59 = vpop.f32.mrb[21].mxu0  ;;  %v8359_v60 = vadd.f32 %v3757_v58, %v8266_v24  ;;  %4032 = vmatpush1.bf16.msra.mxu1 %v7482_v51  ;;  %v3759_v63 = vpop.f32.mrb[22].mxu1  ;;  %v7564_v51 = vld [vmem:[%s7816_s30 + $0x674] ss:$8 sps:$4 sm:$0xff]   ;;  %v7575_v58 = vld [vmem:[%s7816_s30 + $0xd60] ss:$8 sps:$4 sm:$0xff]  }
 0x1b4   : > { %4599 = vmatpush1.bf16.msra.mxu0 %v7485_v52  ;;  %v4326_v0 = vpop.f32.mrb[22].mxu0  ;;  %4033 = vmatprep.subr.bf16.mxu1 %v7491_v53  ;;  %v3760_v2 = vpop.f32.mrb[23].mxu1  ;;  %v5803_v52 = vcombine.high %v360_v45, %v360_v45  ;;  %v5817_v53 = vcombine.high %v367_v48, %v367_v48  ;;  %v5802_v63 = vcombine.low %v360_v45, %v360_v45 }
 0x1b5   : > { %4600 = vmatprep.subr.bf16.mxu0 %v7495_v54  ;;  %v4327_v24 = vpop.f32.mrb[23].mxu0  ;;  %v7577_v54 = vld [vmem:[%s7816_s30 + $0xd64] ss:$8 sps:$4 sm:$0xff]   ;;  %v5816_v0 = vcombine.low %v367_v48, %v367_v48  ;;  %v7580_v2 = vld [vmem:[%s7816_s30 + $0x694] ss:$8 sps:$4 sm:$0xff]  }
 0x1b6   : > { %v7607_v24 = vld [vmem:[%s7806_s5 + $0x34] ss:$108 sps:$4 sm:$0xff]  }
 0x1b7   : > { %4034 = vmatpush1.bf16.msra.mxu1 %v7489_v61  ;;  %v7573_v61 = vld [vmem:[%s7816_s30 + $0x684] ss:$8 sps:$4 sm:$0xff]  }
 0x1b8   : > { %4601 = vmatpush1.bf16.msra.mxu0 %v7493_v62  ;;  %4035 = vmatprep.subr.bf16.mxu1 %v7498_v21  ;;  %v7583_v62 = vld [vmem:[%s7816_s30 + $0xd74] ss:$8 sps:$4 sm:$0xff]   ;;  %v7571_v21 = vld [vmem:[%s7816_s30 + $0x680] ss:$8 sps:$4 sm:$0xff]  }
 0x1b9   : > { %4602 = vmatprep.subr.bf16.mxu0 %v7501_v1  ;;  %v7581_v1 = vld [vmem:[%s7816_s30 + $0xd70] ss:$8 sps:$4 sm:$0xff]  }
 0x1bb   : > { %4036 = vmatpush1.bf16.msra.mxu1 %v7496_v3  ;;  %v7578_v3 = vld [vmem:[%s7816_s30 + $0x690] ss:$8 sps:$4 sm:$0xff]  }
 0x1bc   : > { %4603 = vmatpush1.bf16.msra.mxu0 %v7499_v4  ;;  %4086 = vmatprep.subr.bf16.mxu1 %v7510_v5  ;;  %v7696_v4 = vmov 0   ;;  %v7586_v5 = vld [vmem:[%s7816_s30 + $0x6a4] ss:$8 sps:$4 sm:$0xff]  }
 0x1bd   : > { %4653 = vmatprep.subr.bf16.mxu0 %v7525_v6  ;;  %v7587_v6 = vld [vmem:[%s7806_s5 + $0x68] ss:$108 sps:$4 sm:$0xff]  }
 0x1be   : > { %4038 = vmatmul.mubr.bf16.vlgmr.msra.gmra.mrb[0].mxu1 %v7502_v7  ;;  %v7584_v7 = vld [vmem:[%s7816_s30 + $0x6a0] ss:$8 sps:$4 sm:$0xff]  }
 0x1bf   : > { %4605 = vmatmul.mubr.bf16.vlgmr.msra.gmra.mrb[0].mxu0 %v7505_v8  ;;  %4087 = vmatpush1.bf16.msra.mxu1 %v7508_v9  ;;  %v7590_v8 = vld [vmem:[%s7816_s30 + $0x6b4] ss:$8 sps:$4 sm:$0xff]   ;;  %v7588_v9 = vld [vmem:[%s7816_s30 + $0x6b0] ss:$8 sps:$4 sm:$0xff]  }
 0x1c0   : > { %4047 = vmatprep.mubr.bf16.mxu1 %v7514_v10  ;;  %4088 = vmatprep.subr.bf16.mxu1 %v7513_v11  ;;  %v7593_v10 = vld [vmem:[%s7816_s30 + $0x6c4] ss:$8 sps:$4 sm:$0xff]  }
 0x1c1   : > { %4614 = vmatprep.mubr.bf16.mxu0 %v7516_v12  ;;  %4654 = vmatpush1.bf16.msra.mxu0 %v7523_v13  ;;  %v7594_v11 = vld [vmem:[%s7806_s5 + $0x140] ss:$108 sps:$4 sm:$0xff]   ;;  %v7597_v13 = vld [vmem:[%s7816_s30 + $0x6d4] ss:$8 sps:$4 sm:$0xff]  }
 0x1c2   : > { %4655 = vmatprep.subr.bf16.mxu0 %v7531_v14  ;;  %v7591_v12 = vld [vmem:[%s7816_s30 + $0x6c0] ss:$8 sps:$4 sm:$0xff]   ;;  %v7595_v14 = vld [vmem:[%s7816_s30 + $0x6d0] ss:$8 sps:$4 sm:$0xff]  }
 0x1c3   : > { %4089 = vmatpush1.bf16.msra.mxu1 %v7511_v15  ;;  %v7600_v15 = vld [vmem:[%s7816_s30 + $0x6e4] ss:$8 sps:$4 sm:$0xff]  }
 0x1c4   : > { %4090 = vmatprep.subr.bf16.mxu1 %v7521_v16 }
 0x1c5   : > { %4656 = vmatpush1.bf16.msra.mxu0 %v7529_v17 }
 0x1c6   : > { %4048 = vmatmul.mubr.bf16.gmra.mrb[4].mxu1 %v7518_v18  ;;  %4657 = vmatprep.subr.bf16.mxu0 %v7543_v28 }
 0x1c7   : > { %4615 = vmatmul.mubr.bf16.gmra.mrb[4].mxu0 %v7522_v19  ;;  %4091 = vmatpush1.bf16.msra.mxu1 %v7519_v20  ;;  %v7601_v20 = vld [vmem:[%s7806_s5 + $0x218] ss:$108 sps:$4 sm:$0xff]  }
 0x1c8   : > { %4057 = vmatprep.mubr.bf16.mxu1 %v7532_v23  ;;  %4092 = vmatprep.subr.bf16.mxu1 %v7528_v26 }
 0x1c9   : > { %4624 = vmatprep.mubr.bf16.mxu0 %v7534_v27  ;;  %4658 = vmatpush1.bf16.msra.mxu0 %v7541_v29  ;;  %v7598_v27 = vld [vmem:[%s7816_s30 + $0x6e0] ss:$8 sps:$4 sm:$0xff]  }
 0x1ca   : > { %4659 = vmatprep.subr.bf16.mxu0 %v7549_v31 }
 0x1cb   : > { %4093 = vmatpush1.bf16.msra.mxu1 %v7526_v30  ;;  %v7604_v30 = vld [vmem:[%s7816_s30 + $0x6f4] ss:$8 sps:$4 sm:$0xff]  }
 0x1cc   : > { %4094 = vmatprep.subr.bf16.mxu1 %v7539_v32 }
 0x1cd   : > { %4660 = vmatpush1.bf16.msra.mxu0 %v7547_v36  ;;  %v7620_v36 = vld [vmem:[%s7806_s5 + $0x3c8] ss:$0 sps:$4 sm:$0xff]  }
 0x1ce   : > { %4058 = vmatmul.mubr.bf16.gmra.mrb[8].mxu1 %v7536_v33  ;;  %4661 = vmatprep.subr.bf16.mxu0 %v7561_v40  ;;  %v7608_v33 = vld [vmem:[%s7806_s5 + $0x2f0] ss:$108 sps:$4 sm:$0xff]  }
 0x1cf   : > { %4625 = vmatmul.mubr.bf16.gmra.mrb[8].mxu0 %v7540_v34  ;;  %4095 = vmatpush1.bf16.msra.mxu1 %v7537_v35  ;;  %v7609_v34 = vld [vmem:[%s7806_s5 + $0x10c] ss:$108 sps:$4 sm:$0xff]   ;;  %v7611_v35 = vld [vmem:[%s7806_s5 + $0x108] ss:$108 sps:$4 sm:$0xff]  }
 0x1d0   : > { %4096 = vmatprep.subr.bf16.mxu1 %v7546_v37  ;;  %4067 = vmatprep.mubr.bf16.mxu1 %v7550_v38  ;;  %v7612_v37 = vld [vmem:[%s7806_s5 + $0x1e4] ss:$108 sps:$4 sm:$0xff]   ;;  %v7614_v38 = vld [vmem:[%s7806_s5 + $0x1e0] ss:$108 sps:$4 sm:$0xff]  }
 0x1d1   : > { %4634 = vmatprep.mubr.bf16.mxu0 %v7552_v39  ;;  %4662 = vmatpush1.bf16.msra.mxu0 %v7559_v42  ;;  %v7615_v39 = vld [vmem:[%s7806_s5 + $0x2bc] ss:$108 sps:$4 sm:$0xff]   ;;  %v361_v40 = vld [vmem:[%s7806_s5 + $0x390] sm:$0xff] }
 0x1d2   : > { %4663 = vmatprep.subr.bf16.mxu0 %v7567_v44  ;;  %v5805_v42 = vcombine.high %v361_v40, %v361_v40 }
 0x1d3   : > { %4097 = vmatpush1.bf16.msra.mxu1 %v7544_v41  ;;  %v7617_v41 = vld [vmem:[%s7806_s5 + $0x2b8] ss:$108 sps:$4 sm:$0xff]  }
 0x1d4   : > { %4098 = vmatprep.subr.bf16.mxu1 %v7557_v43  ;;  %v5804_v43 = vcombine.low %v361_v40, %v361_v40 }
 0x1d5   : > { %4664 = vmatpush1.bf16.msra.mxu0 %v7565_v50 }
 0x1d6   : > { %4068 = vmatmul.mubr.bf16.gmra.mrb[12].mxu1 %v7554_v46  ;;  %4665 = vmatprep.subr.bf16.mxu0 %v7577_v54 }
 0x1d7   : > { %4635 = vmatmul.mubr.bf16.gmra.mrb[12].mxu0 %v7558_v47  ;;  %4099 = vmatpush1.bf16.msra.mxu1 %v7555_v49 }
 0x1d8   : > { %4100 = vmatprep.subr.bf16.mxu1 %v7564_v51  ;;  %4077 = vmatprep.mubr.bf16.mxu1 %v5803_v52 }
 0x1d9   : > { %4644 = vmatprep.mubr.bf16.mxu0 %v5817_v53  ;;  %4666 = vmatpush1.bf16.msra.mxu0 %v7575_v58 }
 0x1da   : > { %4667 = vmatprep.subr.bf16.mxu0 %v7583_v62 }
 0x1db   : > { %4101 = vmatpush1.bf16.msra.mxu1 %v7562_v55 }
 0x1dc   : > { %4102 = vmatprep.subr.bf16.mxu1 %v7573_v61 }
 0x1dd   : > { %4668 = vmatpush1.bf16.msra.mxu0 %v7581_v1 }
 0x1de   : > { %4078 = vmatmul.mubr.bf16.gmra.mrb[36].mxu1 %v5802_v63 }
 0x1df   : > { %4645 = vmatmul.mubr.bf16.gmra.mrb[36].mxu0 %v5816_v0  ;;  %4103 = vmatpush1.bf16.msra.mxu1 %v7571_v21 }
 0x1e0   : > { %4104 = vmatprep.subr.bf16.mxu1 %v7580_v2  ;;  %4685 = vmatprep.mubr.bf16.mxu0 %v7696_v4 }
 0x1e1   : > { %4118 = vmatprep.mubr.bf16.mxu1 %v7607_v24 }
 0x1e3   : > { %4105 = vmatpush1.bf16.msra.mxu1 %v7578_v3 }
 0x1e4   : > { %4106 = vmatprep.subr.bf16.mxu1 %v7586_v5 }
 0x1e7   : > { %4686 = vmatmul.mubr.bf16.vlgmr.msra.gmra.mrb[0].mxu0 %v7587_v6  ;;  %4107 = vmatpush1.bf16.msra.mxu1 %v7584_v7 }
 0x1e8   : > { %4695 = vmatprep.mubr.bf16.mxu0 %v7696_v4  ;;  %4108 = vmatprep.subr.bf16.mxu1 %v7590_v8 }
 0x1eb   : > { %4109 = vmatpush1.bf16.msra.mxu1 %v7588_v9 }
 0x1ec   : > { %4110 = vmatprep.subr.bf16.mxu1 %v7593_v10 }
 0x1ef   : > { %4696 = vmatmul.mubr.bf16.gmra.mrb[4].mxu0 %v7594_v11  ;;  %4111 = vmatpush1.bf16.msra.mxu1 %v7591_v12 }
 0x1f0   : > { %4705 = vmatprep.mubr.bf16.mxu0 %v7696_v4  ;;  %4112 = vmatprep.subr.bf16.mxu1 %v7597_v13 }
 0x1f1   : > { %v3836_v16 = vpop.f32.mrb[24].mxu1 }
 0x1f2   : > { %v8431_v17 = vpop.f32.mrb[24].mxu0  ;;  %v3837_v18 = vadd.f32 %v3836_v16, %v8354_v57  ;;  %v3838_v19 = vpop.f32.mrb[25].mxu1  ;;  %v7602_v57 = vld [vmem:[%s7816_s30 + $0x6f0] ss:$8 sps:$4 sm:$0xff]  }
 0x1f3   : > { %v8435_v23 = vpop.f32.mrb[25].mxu0  ;;  %v3839_v26 = vadd.f32 %v3838_v19, %v8359_v60  ;;  %4113 = vmatpush1.bf16.msra.mxu1 %v7595_v14  ;;  %v3840_v28 = vpop.f32.mrb[26].mxu1  ;;  %v7605_v60 = vld [vmem:[%s7806_s5 + $0x30] ss:$108 sps:$4 sm:$0xff]  }
 0x1f4   : > { %v4407_v29 = vpop.f32.mrb[26].mxu0  ;;  %4114 = vmatprep.subr.bf16.mxu1 %v7600_v15  ;;  %v3841_v31 = vpop.f32.mrb[27].mxu1 }
 0x1f5   : > { %v4408_v32 = vpop.f32.mrb[27].mxu0 }
 0x1f7   : > { %4706 = vmatmul.mubr.bf16.gmra.mrb[8].mxu0 %v7601_v20  ;;  %4115 = vmatpush1.bf16.msra.mxu1 %v7598_v27 }
 0x1f8   : > { %4715 = vmatprep.mubr.bf16.mxu0 %v7696_v4  ;;  %4116 = vmatprep.subr.bf16.mxu1 %v7604_v30  ;;  %v225_v30 = vld [vmem:[%s9144_s3] sm:$0xff] }
 0x1fb   : > { %4117 = vmatpush1.bf16.msra.mxu1 %v7602_v57 }
 0x1fe   : > { %4119 = vmatmul.mubr.bf16.vlgmr.msra.gmra.mrb[0].mxu1 %v7605_v60  ;;  %v226_v60 = vld [vmem:[%s9144_s3 + $0x8] sm:$0xff] }
 0x1ff   : > { %4716 = vmatmul.mubr.bf16.gmra.mrb[12].mxu0 %v7608_v33  ;;  %4128 = vmatprep.mubr.bf16.mxu1 %v7609_v34 }
 0x200   : > { %4725 = vmatprep.mubr.bf16.mxu0 %v7696_v4 }
 0x206   : > { %4129 = vmatmul.mubr.bf16.gmra.mrb[4].mxu1 %v7611_v35 }
 0x207   : > { %4726 = vmatmul.mubr.bf16.gmra.mrb[40].mxu0 %v7620_v36  ;;  %4138 = vmatprep.mubr.bf16.mxu1 %v7612_v37  ;;  %v227_v36 = vld [vmem:[%s9144_s3 + $0x10] sm:$0xff] }
 0x20e   : > { %4139 = vmatmul.mubr.bf16.gmra.mrb[8].mxu1 %v7614_v38 }
 0x20f   : > { %4148 = vmatprep.mubr.bf16.mxu1 %v7615_v39 }
 0x216   : > { %4149 = vmatmul.mubr.bf16.gmra.mrb[12].mxu1 %v7617_v41  ;;  %v228_v41 = vld [vmem:[%s9144_s3 + $0x18] sm:$0xff] }
 0x217   : > { %4158 = vmatprep.mubr.bf16.mxu1 %v5805_v42 }
 0x21e   : > { %4159 = vmatmul.mubr.bf16.gmra.mrb[40].mxu1 %v5804_v43 }
 0x231   : > { %v3917_v44 = vpop.f32.mrb[28].mxu1 }
 0x232   : > { %v8451_v45 = vpop.f32.mrb[28].mxu0  ;;  %v3918_v46 = vadd.f32 %v3917_v44, %v3837_v18  ;;  %v3919_v47 = vpop.f32.mrb[29].mxu1 }
 0x233   : > { %v8453_v48 = vpop.f32.mrb[29].mxu0  ;;  %v3920_v49 = vadd.f32 %v3919_v47, %v3839_v26  ;;  %v3921_v50 = vpop.f32.mrb[30].mxu1 }
 0x234   : > { %v4488_v51 = vpop.f32.mrb[30].mxu0  ;;  %v3922_v52 = vpop.f32.mrb[31].mxu1  ;;  %v229_v50 = vld [vmem:[%s9144_s3 + $0x20] sm:$0xff] }
 0x235   : > { %v4489_v53 = vpop.f32.mrb[31].mxu0 }
 0x271   : > { %v3998_v54 = vpop.f32.mrb[32].mxu1 }
 0x272   : > { %v8455_v55 = vpop.f32.mrb[32].mxu0  ;;  %v3999_v58 = vadd.f32 %v3998_v54, %v3918_v46  ;;  %v4000_v61 = vpop.f32.mrb[33].mxu1  ;;  %v230_v54 = vld [vmem:[%s9144_s3 + $0x28] sm:$0xff] }
 0x273   : > { %v8457_v62 = vpop.f32.mrb[33].mxu0  ;;  %v4001_v63 = vadd.f32 %v4000_v61, %v3920_v49  ;;  %v4002_v0 = vpop.f32.mrb[34].mxu1 }
 0x274   : > { %v4569_v21 = vpop.f32.mrb[34].mxu0  ;;  %v4003_v1 = vpop.f32.mrb[35].mxu1  ;;  %v231_v0 = vld [vmem:[%s9144_s3 + $0x30] sm:$0xff] }
 0x275   : > { %v4570_v2 = vpop.f32.mrb[35].mxu0 }
 0x2b1   : > { %v4079_v24 = vpop.f32.mrb[36].mxu1 }
 0x2b2   : > { %v8459_v3 = vpop.f32.mrb[36].mxu0  ;;  %v8461_v4 = vadd.f32 %v4079_v24, %v3999_v58  ;;  %v4081_v5 = vpop.f32.mrb[37].mxu1 }
 0x2b3   : > { %v8463_v6 = vpop.f32.mrb[37].mxu0  ;;  %v8465_v7 = vadd.f32 %v4081_v5, %v4001_v63  ;;  %v4083_v9 = vpop.f32.mrb[38].mxu1  ;;  %v232_v5 = vld [vmem:[%s9144_s3 + $0x38] sm:$0xff] }
 0x2b4   : > { %v4650_v8 = vpop.f32.mrb[38].mxu0  ;;  %v4084_v11 = vpop.f32.mrb[39].mxu1 }
 0x2b5   : > { %v4651_v10 = vpop.f32.mrb[39].mxu0 }
 0x2ba   : > { %v4687_v12 = vpop.f32.mrb[0].mxu0 }
 0x2bb   : > { %v4689_v13 = vpop.f32.mrb[1].mxu0 }
 0x2bc   : > { %v4691_v14 = vpop.f32.mrb[2].mxu0 }
 0x2bd   : > { %v4693_v15 = vpop.f32.mrb[3].mxu0 }
 0x2c2   : > { %v4697_v16 = vpop.f32.mrb[4].mxu0 }
 0x2c3   : > { %v4699_v18 = vpop.f32.mrb[5].mxu0 }
 0x2c4   : > { %v4701_v19 = vpop.f32.mrb[6].mxu0 }
 0x2c5   : > { %v4703_v20 = vpop.f32.mrb[7].mxu0 }
 0x2ca   : > { %v4707_v26 = vpop.f32.mrb[8].mxu0 }
 0x2cb   : > { %v4709_v27 = vpop.f32.mrb[9].mxu0 }
 0x2cc   : > { %v4711_v28 = vpop.f32.mrb[10].mxu0 }
 0x2cd   : > { %v4713_v29 = vpop.f32.mrb[11].mxu0 }
 0x2d1   : > { %v4120_v31 = vpop.f32.mrb[0].mxu1 }
 0x2d2   : > { %v8470_v32 = vpop.f32.mrb[12].mxu0  ;;  %v6527_v57 = vadd.f32 %v4687_v12, %v4120_v31  ;;  %v4122_v33 = vpop.f32.mrb[1].mxu1 }
 0x2d3   : > { %v8475_v34 = vpop.f32.mrb[13].mxu0  ;;  %v6528_v35 = vadd.f32 %v4689_v13, %v4122_v33  ;;  %v4124_v37 = vpop.f32.mrb[2].mxu1  ;;  %v236_v33 = vld [vmem:[%s9144_s3 + $0x58] sm:$0xff] }
 0x2d4   : > { %v8480_v38 = vpop.f32.mrb[14].mxu0  ;;  %v4734_v39 = vadd.f32 %v6527_v57, %v225_v30  ;;  %v6529_v40 = vadd.f32 %v4691_v14, %v4124_v37  ;;  %v4126_v42 = vpop.f32.mrb[3].mxu1  ;;  %v233_v14 = vld [vmem:[%s9144_s3 + $0x40] sm:$0xff]  ;;  %v235_v30 = vld [vmem:[%s9144_s3 + $0x50] sm:$0xff] }
 0x2d5   : > { %v8485_v43 = vpop.f32.mrb[15].mxu0  ;;  %v4735_v44 = vadd.f32 %v6528_v35, %v226_v60  ;;  %v6530_v46 = vadd.f32 %v4693_v15, %v4126_v42 }
 0x2d6   : > { %4752 = vst [vmem:[%s9144_s3] sm:$0xff] %v4734_v39  ;;  %v4736_v47 = vadd.f32 %v6529_v40, %v227_v36  ;;  %v238_v40 = vld [vmem:[%s9144_s3 + $0x68] sm:$0xff] }
 0x2d7   : > { %4753 = vst [vmem:[%s9144_s3 + $0x8] sm:$0xff] %v4735_v44  ;;  %v4737_v49 = vadd.f32 %v6530_v46, %v228_v41  ;;  %v239_v44 = vld [vmem:[%s9144_s3 + $0x70] sm:$0xff] }
 0x2d8   : > { %4754 = vst [vmem:[%s9144_s3 + $0x10] sm:$0xff] %v4736_v47 }
 0x2d9   : > { %4755 = vst [vmem:[%s9144_s3 + $0x18] sm:$0xff] %v4737_v49  ;;  %v4130_v51 = vpop.f32.mrb[4].mxu1 }
 0x2da   : > { %v8502_v52 = vpop.f32.mrb[40].mxu0  ;;  %v6531_v53 = vadd.f32 %v4697_v16, %v4130_v51  ;;  %v4132_v58 = vpop.f32.mrb[5].mxu1 }
 0x2db   : > { %v8507_v61 = vpop.f32.mrb[41].mxu0  ;;  %v6532_v63 = vadd.f32 %v4699_v18, %v4132_v58  ;;  %v4134_v21 = vpop.f32.mrb[6].mxu1  ;;  %v234_v18 = vld [vmem:[%s9144_s3 + $0x48] sm:$0xff] }
 0x2dc   : > { %v4731_v1 = vpop.f32.mrb[42].mxu0  ;;  %v4738_v2 = vadd.f32 %v6531_v53, %v229_v50  ;;  %v6533_v24 = vadd.f32 %v4701_v19, %v4134_v21  ;;  %v4136_v8 = vpop.f32.mrb[7].mxu1  ;;  %v240_v50 = vld [vmem:[%s9144_s3 + $0x78] sm:$0xff] }
 0x2dd   : > { %v4732_v9 = vpop.f32.mrb[43].mxu0  ;;  %v4739_v10 = vadd.f32 %v6532_v63, %v230_v54  ;;  %v6534_v11 = vadd.f32 %v4703_v20, %v4136_v8 }
 0x2de   : > { %4756 = vst [vmem:[%s9144_s3 + $0x20] sm:$0xff] %v4738_v2  ;;  %v4740_v12 = vadd.f32 %v6533_v24, %v231_v0 }
 0x2df   : > { %4757 = vst [vmem:[%s9144_s3 + $0x28] sm:$0xff] %v4739_v10  ;;  %v4741_v13 = vadd.f32 %v6534_v11, %v232_v5 }
 0x2e0   : > { %4758 = vst [vmem:[%s9144_s3 + $0x30] sm:$0xff] %v4740_v12 }
 0x2e1   : > { %4759 = vst [vmem:[%s9144_s3 + $0x38] sm:$0xff] %v4741_v13  ;;  %v4140_v15 = vpop.f32.mrb[8].mxu1 }
 0x2e2   : > { %v6535_v16 = vadd.f32 %v4707_v26, %v4140_v15  ;;  %v4142_v19 = vpop.f32.mrb[9].mxu1 }
 0x2e3   : > { %v6536_v20 = vadd.f32 %v4709_v27, %v4142_v19  ;;  %v4144_v31 = vpop.f32.mrb[10].mxu1  ;;  %v7697_v19 = vmov (!%p6251_p7), 1.0|1.0  }
 0x2e4   : > { %v4742_v57 = vadd.f32 %v6535_v16, %v233_v14  ;;  %v6537_v60 = vadd.f32 %v4711_v28, %v4144_v31  ;;  %v4146_v35 = vpop.f32.mrb[11].mxu1  ;;  %v237_v28 = vld [vmem:[%s9144_s3 + $0x60] sm:$0xff] }
 0x2e5   : > { %v4743_v36 = vadd.f32 %v6536_v20, %v234_v18  ;;  %v6538_v26 = vadd.f32 %v4713_v29, %v4146_v35 }
 0x2e6   : > { %4760 = vst [vmem:[%s9144_s3 + $0x40] sm:$0xff] %v4742_v57  ;;  %v4744_v37 = vadd.f32 %v6537_v60, %v235_v30 }
 0x2e7   : > { %4761 = vst [vmem:[%s9144_s3 + $0x48] sm:$0xff] %v4743_v36  ;;  %v4745_v27 = vadd.f32 %v6538_v26, %v236_v33 }
 0x2e8   : > { %4762 = vst [vmem:[%s9144_s3 + $0x50] sm:$0xff] %v4744_v37 }
 0x2e9   : > { %4763 = vst [vmem:[%s9144_s3 + $0x58] sm:$0xff] %v4745_v27  ;;  %v4150_v29 = vpop.f32.mrb[12].mxu1 }
 0x2ea   : > { %v6539_v39 = vadd.f32 %v8470_v32, %v4150_v29  ;;  %v4152_v41 = vpop.f32.mrb[13].mxu1 }
 0x2eb   : > { %v6540_v42 = vadd.f32 %v8475_v34, %v4152_v41  ;;  %v4154_v46 = vpop.f32.mrb[14].mxu1 }
 0x2ec   : > { %v4746_v47 = vadd.f32 %v6539_v39, %v237_v28  ;;  %v6541_v49 = vadd.f32 %v8480_v38, %v4154_v46  ;;  %v4156_v32 = vpop.f32.mrb[15].mxu1  ;;  %v8705_v28 = vld [vmem:[%s9143_s2] sm:$0x3] (!%p6251_p7) }
 0x2ed   : > { %v4747_v51 = vadd.f32 %v6540_v42, %v238_v40  ;;  %v6542_v53 = vadd.f32 %v8485_v43, %v4156_v32  ;;  %v4775_v40 = vld [vmem:[%s9144_s3 + $0x8] sm:$0xff] (!%p6251_p7) }
 0x2ee   : > { %4764 = vst [vmem:[%s9144_s3 + $0x60] sm:$0xff] %v4746_v47  ;;  %v4748_v34 = vadd.f32 %v6541_v49, %v239_v44 }
 0x2ef   : > { %4765 = vst [vmem:[%s9144_s3 + $0x68] sm:$0xff] %v4747_v51  ;;  %v4749_v54 = vadd.f32 %v6542_v53, %v240_v50 }
 0x2f0   : > { %4766 = vst [vmem:[%s9144_s3 + $0x70] sm:$0xff] %v4748_v34 }
 0x2f1   : > { %4767 = vst [vmem:[%s9144_s3 + $0x78] sm:$0xff] %v4749_v54  ;;  %v4160_v38 = vpop.f32.mrb[40].mxu1 }
 0x2f2   : > { %v4161_v43 = vadd.f32 %v4160_v38, %v8461_v4  ;;  %v4162_v58 = vpop.f32.mrb[41].mxu1 }
 0x2f3   : > { %v4163_v63 = vadd.f32 %v4162_v58, %v8465_v7  ;;  %v4164_v0 = vpop.f32.mrb[42].mxu1 }
 0x2f4   : > { %v4242_v21 = vadd.f32 %v8263_v22, %v4161_v43  ;;  %v4165_v1 = vpop.f32.mrb[43].mxu1 }
 0x2f5   : > { %v4244_v2 = vadd.f32 %v8268_v25, %v4163_v63  ;;  %v241_v25 = vld [vmem:[%s9144_s3 + $0x80] sm:$0xff] }
 0x2f6   : > { %v4323_v24 = vadd.f32 %v8351_v56, %v4242_v21  ;;  %v4774_v1 = vld [vmem:[%s9144_s3] sm:$0xff] (!%p6251_p7) }
 0x2f7   : > { %v4325_v5 = vadd.f32 %v8356_v59, %v4244_v2  ;;  %v4777_v2 = vld [vmem:[%s9144_s3 + $0x18] sm:$0xff] (!%p6251_p7) }
 0x2f8   : > { %v4404_v8 = vadd.f32 %v8431_v17, %v4323_v24  ;;  %v242_v17 = vld [vmem:[%s9144_s3 + $0x88] sm:$0xff] }
 0x2f9   : > { %v4406_v9 = vadd.f32 %v8435_v23, %v4325_v5 }
 0x2fa   : > { %v4485_v10 = vadd.f32 %v8451_v45, %v4404_v8  ;;  %v4776_v8 = vld [vmem:[%s9144_s3 + $0x10] sm:$0xff] (!%p6251_p7) }
 0x2fb   : > { %v4487_v4 = vadd.f32 %v8453_v48, %v4406_v9  ;;  %v4779_v9 = vld [vmem:[%s9144_s3 + $0x28] sm:$0xff] (!%p6251_p7) }
 0x2fc   : > { %v4566_v7 = vadd.f32 %v8455_v55, %v4485_v10  ;;  %v4794_v55 = vlaneseq (!%p6251_p7) }
 0x2fd   : > { %v4568_v11 = vadd.f32 %v8457_v62, %v4487_v4 }
 0x2fe   : > { %v4647_v22 = vadd.f32 %v8459_v3, %v4566_v7  ;;  %v8608_v62 = vshrl.u32 (!%p6251_p7), %v4794_v55, 7  ;;  %v8610_v3 = vand.u32 (!%p6251_p7), 127, %v4794_v55 }
 0x2ff   : > { %v4649_v56 = vadd.f32 %v8463_v6, %v4568_v11  ;;  %4773 = sbr.rel (%p6251_p7) target bundleno = 1764 (0x6e4), region = 44 }
 0x300   : > { %v4728_v59 = vadd.f32 %v8502_v52, %v4647_v22  ;;  %v4839_v6 = vadd.s32 (!%p6251_p7), 128, %v8608_v62  ;;  %v4840_v52 = vadd.s32 (!%p6251_p7), 136, %v8608_v62  ;;  %v8618_v12 = vadd.s32 (!%p6251_p7), 1, %v8610_v3  ;;  %v4778_v22 = vld [vmem:[%s9144_s3 + $0x20] sm:$0xff] (!%p6251_p7) }
 0x301   : > { %v4730_v23 = vadd.f32 %v8507_v61, %v4649_v56  ;;  %v8615_v61 = vmul.u32 (!%p6251_p7), 32, %v8610_v3  ;;  %v8625_v14 = vadd.s32 (!%p6251_p7), 8, %v8608_v62  ;;  %v4841_v15 = vadd.s32 (!%p6251_p7), 144, %v8608_v62 }
 0x302   : > { %v4750_v45 = vadd.f32 %v4728_v59, %v241_v25  ;;  %v8622_v13 = vmul.u32 (!%p6251_p7), 32, %v8618_v12  ;;  %v4842_v16 = vadd.s32 (!%p6251_p7), 152, %v8608_v62  ;;  %v8641_v18 = vadd.s32 (!%p6251_p7), 16, %v8608_v62  ;;  %v4781_v25 = vld [vmem:[%s9144_s3 + $0x38] sm:$0xff] (!%p6251_p7) }
 0x303   : > { %v4751_v48 = vadd.f32 %v4730_v23, %v242_v17  ;;  %vm4874_vm0 = vcmp.ge.s32.totalorder (!%p6251_p7), %v4839_v6, %v8615_v61  ;;  %vm4875_vm1 = vcmp.ge.s32.totalorder (!%p6251_p7), %v4840_v52, %v8615_v61  ;;  %vm4858_vm5 = vcmp.ge.s32.totalorder (!%p6251_p7), %v8608_v62, %v8615_v61 }
 0x304   : > { %4768 = vst [vmem:[%s9144_s3 + $0x80] sm:$0xff] %v4750_v45  ;;  %vm4908_vm2 = vcmp.lt.s32.totalorder (!%p6251_p7), %v4839_v6, %v8622_v13  ;;  %vm4909_vm3 = vcmp.lt.s32.totalorder (!%p6251_p7), %v4840_v52, %v8622_v13  ;;  %vm4892_vm6 = vcmp.lt.s32.totalorder (!%p6251_p7), %v8608_v62, %v8622_v13  ;;  %vm4859_vm8 = vcmp.ge.s32.totalorder (!%p6251_p7), %v8625_v14, %v8615_v61  ;;  %v4780_v45 = vld [vmem:[%s9144_s3 + $0x30] sm:$0xff] (!%p6251_p7) }
 0x305   : > { %4769 = vst [vmem:[%s9144_s3 + $0x88] sm:$0xff] %v4751_v48  ;;  %vm4940_vm4 = vmand (!%p6251_p7), %vm4874_vm0, %vm4908_vm2  ;;  %vm4893_vm9 = vcmp.lt.s32.totalorder (!%p6251_p7), %v8625_v14, %v8622_v13  ;;  %vm4876_vm12 = vcmp.ge.s32.totalorder (!%p6251_p7), %v4841_v15, %v8615_v61  ;;  %vm4910_vm13 = vcmp.lt.s32.totalorder (!%p6251_p7), %v4841_v15, %v8622_v13  ;;  %v8647_v20 = vadd.s32 (!%p6251_p7), 24, %v8608_v62  ;;  %v4783_v48 = vld [vmem:[%s9144_s3 + $0x48] sm:$0xff] (!%p6251_p7)  ;;  %v4785_v15 = vld [vmem:[%s9144_s3 + $0x58] sm:$0xff] (!%p6251_p7) }
 0x306   : > { %vm4941_vm7 = vmand %vm4875_vm1, %vm4909_vm3  ;;  %vm4877_vm15 = vcmp.ge.s32.totalorder %v4842_v16, %v8615_v61  ;;  %vm4911_vm0 = vcmp.lt.s32.totalorder %v4842_v16, %v8622_v13  ;;  %v4843_v30 = vadd.s32 160, %v8608_v62  ;;  %vm4860_vm3 = vcmp.ge.s32.totalorder %v8641_v18, %v8615_v61 }
 0x307   : > { %vm6483_vm10 = vmpackc.low %vm4941_vm7, %vm4940_vm4  ;;  %vm4894_vm4 = vcmp.lt.s32.totalorder %v8641_v18, %v8622_v13  ;;  %v4844_v31 = vadd.s32 168, %v8608_v62  ;;  %vm4895_vm7 = vcmp.lt.s32.totalorder %v8647_v20, %v8622_v13  ;;  %v8663_v57 = vadd.s32 32, %v8608_v62 }
 0x308   : > { %6484 = vmatprep.subr.msk.bf16.mxu0 %vm6483_vm10, %v7697_v19  ;;  %vm4924_vm11 = vmand %vm4858_vm5, %vm4892_vm6  ;;  %vm4861_vm6 = vcmp.ge.s32.totalorder %v8647_v20, %v8615_v61  ;;  %vm4878_vm10 = vcmp.ge.s32.totalorder %v4843_v30, %v8615_v61  ;;  %v8669_v60 = vadd.s32 40, %v8608_v62  ;;  %v4845_v33 = vadd.s32 176, %v8608_v62 }
 0x309   : > { %vm4925_vm14 = vmand %vm4859_vm8, %vm4893_vm9  ;;  %v4846_v35 = vadd.s32 184, %v8608_v62  ;;  %v8685_v36 = vadd.s32 48, %v8608_v62  ;;  %v8691_v26 = vadd.s32 56, %v8608_v62  ;;  %v4847_v37 = vadd.s32 192, %v8608_v62 }
 0x30a   : > { %vm6485_vm1 = vmpackc.low %vm4925_vm14, %vm4924_vm11  ;;  %vm4912_vm11 = vcmp.lt.s32.totalorder %v4843_v30, %v8622_v13  ;;  %vm4913_vm14 = vcmp.lt.s32.totalorder %v4844_v31, %v8622_v13  ;;  %v4848_v27 = vadd.s32 200, %v8608_v62  ;;  %v4800_v29 = vsub.s32 1, %v8608_v62 }
 0x30b   : > { %6486 = vmatpush3.bf16.msk.msra.mxu0 %vm6485_vm1, %v7697_v19  ;;  %vm4942_vm2 = vmand %vm4876_vm12, %vm4910_vm13  ;;  %vm4879_vm13 = vcmp.ge.s32.totalorder %v4844_v31, %v8615_v61  ;;  %vm4862_vm1 = vcmp.ge.s32.totalorder %v8663_v57, %v8615_v61  ;;  %v8713_v39 = vadd.s32 64, %v8608_v62  ;;  %v4832_v41 = vadd.s32 72, %v8608_v62 }
 0x30c   : > { %vm4943_vm5 = vmand %vm4877_vm15, %vm4911_vm0  ;;  %v8723_v42 = vrot.slane %v8705_v28, %v4800_v29  ;;  %v4849_v44 = vadd.s32 208, %v8608_v62  ;;  %v4850_v47 = vadd.s32 216, %v8608_v62  ;;  %v4833_v50 = vadd.s32 80, %v8608_v62 }
 0x30d   : > { %vm6487_vm8 = vmpackc.low %vm4943_vm5, %vm4942_vm2  ;;  %vm4896_vm2 = vcmp.lt.s32.totalorder %v8663_v57, %v8622_v13  ;;  %vm4897_vm5 = vcmp.lt.s32.totalorder %v8669_v60, %v8622_v13  ;;  %v4834_v32 = vadd.s32 88, %v8608_v62  ;;  %v4851_v51 = vadd.s32 224, %v8608_v62 }
 0x30e   : > { %6488 = vmatprep.subr.msk.bf16.mxu0 %vm6487_vm8, %v7697_v19  ;;  %vm4926_vm9 = vmand %vm4860_vm3, %vm4894_vm4  ;;  %vm4863_vm4 = vcmp.ge.s32.totalorder %v8669_v60, %v8615_v61  ;;  %vm4880_vm8 = vcmp.ge.s32.totalorder %v4845_v33, %v8615_v61  ;;  %v8729_v46 = vadd.f32 %v8723_v42, %v4775_v40  ;;  %v4852_v53 = vadd.s32 232, %v8608_v62  ;;  %v4786_v40 = vld [vmem:[%s9144_s3 + $0x60] sm:$0xff] }
 0x30f   : > { %vm4927_vm12 = vmand %vm4861_vm6, %vm4895_vm7  ;;  %v4835_v34 = vadd.s32 96, %v8608_v62  ;;  %v4836_v54 = vadd.s32 104, %v8608_v62  ;;  %v4853_v38 = vadd.s32 240, %v8608_v62  ;;  %v4796_v43 = vsub.s32 0, %v8608_v62 }
 0x310   : > { %vm6489_vm15 = vmpackc.low %vm4927_vm12, %vm4926_vm9  ;;  %vm4914_vm9 = vcmp.lt.s32.totalorder %v4845_v33, %v8622_v13  ;;  %vm4915_vm12 = vcmp.lt.s32.totalorder %v4846_v35, %v8622_v13  ;;  %v5089_v49 = vmul.f32 %v8729_v46, %v8729_v46  ;;  %v4854_v58 = vadd.s32 248, %v8608_v62  ;;  %v4784_v33 = vld [vmem:[%s9144_s3 + $0x50] sm:$0xff] }
 0x311   : > { %6490 = vmatpush3.bf16.msk.msra.mxu0 %vm6489_vm15, %v7697_v19  ;;  %vm4944_vm0 = vmand %vm4878_vm10, %vm4912_vm11  ;;  %vm4881_vm11 = vcmp.ge.s32.totalorder %v4846_v35, %v8615_v61  ;;  %vm4864_vm15 = vcmp.ge.s32.totalorder %v8685_v36, %v8615_v61  ;;  %v4837_v63 = vadd.s32 112, %v8608_v62  ;;  %v4838_v0 = vadd.s32 120, %v8608_v62  ;;  %v4787_v35 = vld [vmem:[%s9144_s3 + $0x68] sm:$0xff] }
 0x312   : > { %vm4945_vm3 = vmand %vm4879_vm13, %vm4913_vm14  ;;  %5170 = vmatprep.mubr.f32.mxu0 %v5089_v49  ;;  %v8776_v21 = vrot.slane %v8705_v28, %v4796_v43  ;;  %v8795_v5 = vadd.f32 %v8723_v42, %v4777_v2  ;;  %v8813_v11 = vadd.f32 %v8723_v42, %v4779_v9  ;;  %v8829_v23 = vadd.f32 %v8723_v42, %v4781_v25  ;;  %v4790_v43 = vld [vmem:[%s9144_s3 + $0x80] sm:$0xff] }
 0x313   : > { %vm6491_vm6 = vmpackc.low %vm4945_vm3, %vm4944_vm0  ;;  %vm4898_vm0 = vcmp.lt.s32.totalorder %v8685_v36, %v8622_v13  ;;  %vm4899_vm3 = vcmp.lt.s32.totalorder %v8691_v26, %v8622_v13  ;;  %v8861_v31 = vadd.f32 %v8723_v42, %v4785_v15  ;;  %v8877_v29 = vadd.f32 %v8723_v42, %v4787_v35 }
 0x314   : > { %6492 = vmatprep.subr.msk.bf16.mxu0 %vm6491_vm6, %v7697_v19  ;;  %vm4928_vm7 = vmand %vm4862_vm1, %vm4896_vm2  ;;  %vm4865_vm2 = vcmp.ge.s32.totalorder %v8691_v26, %v8615_v61  ;;  %vm4882_vm6 = vcmp.ge.s32.totalorder %v4847_v37, %v8615_v61  ;;  %v8792_v24 = vadd.f32 %v8776_v21, %v4774_v1  ;;  %v8807_v4 = vadd.f32 %v8776_v21, %v4776_v8 }
 0x315   : > { %vm4929_vm10 = vmand %vm4863_vm4, %vm4897_vm5  ;;  %v5091_v7 = vmul.f32 %v8795_v5, %v8795_v5  ;;  %v8824_v59 = vadd.f32 %v8776_v21, %v4778_v22  ;;  %v5093_v17 = vmul.f32 %v8813_v11, %v8813_v11  ;;  %v8840_v6 = vadd.f32 %v8776_v21, %v4780_v45 }
 0x316   : > { %vm6493_vm13 = vmpackc.low %vm4929_vm10, %vm4928_vm7  ;;  %vm4916_vm7 = vcmp.lt.s32.totalorder %v4847_v37, %v8622_v13  ;;  %vm4917_vm10 = vcmp.lt.s32.totalorder %v4848_v27, %v8622_v13  ;;  %v5088_v10 = vmul.f32 %v8792_v24, %v8792_v24  ;;  %v5090_v56 = vmul.f32 %v8807_v4, %v8807_v4 }
 0x317   : > { %6494 = vmatpush3.bf16.msk.msra.mxu0 %vm6493_vm13, %v7697_v19  ;;  %vm4946_vm14 = vmand %vm4880_vm8, %vm4914_vm9  ;;  %vm4883_vm9 = vcmp.ge.s32.totalorder %v4848_v27, %v8615_v61  ;;  %vm4866_vm13 = vcmp.ge.s32.totalorder %v8713_v39, %v8615_v61  ;;  %v5092_v55 = vmul.f32 %v8824_v59, %v8824_v59  ;;  %v5095_v52 = vmul.f32 %v8829_v23, %v8829_v23 }
 0x318   : > { %vm4947_vm1 = vmand %vm4881_vm11, %vm4915_vm12  ;;  %v5094_v16 = vmul.f32 %v8840_v6, %v8840_v6  ;;  %v8872_v27 = vadd.f32 %v8776_v21, %v4784_v33  ;;  %v5099_v28 = vmul.f32 %v8861_v31, %v8861_v31  ;;  %v5101_v49 = vmul.f32 %v8877_v29, %v8877_v29 }
 0x319   : > { %vm6495_vm4 = vmpackc.low %vm4947_vm1, %vm4946_vm14  ;;  %vm4900_vm14 = vcmp.lt.s32.totalorder %v8713_v39, %v8622_v13  ;;  %vm4901_vm1 = vcmp.lt.s32.totalorder %v4832_v41, %v8622_v13  ;;  %v7698_v1 = vmov 0.0|0.0   ;;  %v7699_v2 = vmov 0.0  }
 0x31a   : > { %6496 = vmatprep.subr.msk.bf16.mxu0 %vm6495_vm4, %v7697_v19  ;;  %vm4930_vm5 = vmand %vm4864_vm15, %vm4898_vm0  ;;  %vm4867_vm0 = vcmp.ge.s32.totalorder %v4832_v41, %v8615_v61  ;;  %vm4884_vm4 = vcmp.ge.s32.totalorder %v4849_v44, %v8615_v61  ;;  %v4789_v41 = vld [vmem:[%s9144_s3 + $0x78] sm:$0xff]  ;;  %6454 = vmatprep.subr.mxu1 %v7699_v2 }
 0x31b   : > { %vm4931_vm8 = vmand %vm4865_vm2, %vm4899_vm3 }
 0x31c   : > { %vm6497_vm11 = vmpackc.low %vm4931_vm8, %vm4930_vm5  ;;  %vm4918_vm5 = vcmp.lt.s32.totalorder %v4849_v44, %v8622_v13  ;;  %vm4919_vm8 = vcmp.lt.s32.totalorder %v4850_v47, %v8622_v13  ;;  %v5098_v44 = vmul.f32 %v8872_v27, %v8872_v27 }
 0x31d   : > { %6498 = vmatpush3.bf16.msk.msra.mxu0 %vm6497_vm11, %v7697_v19  ;;  %vm4948_vm12 = vmand %vm4882_vm6, %vm4916_vm7  ;;  %vm4885_vm7 = vcmp.ge.s32.totalorder %v4850_v47, %v8615_v61  ;;  %vm4868_vm11 = vcmp.ge.s32.totalorder %v4833_v50, %v8615_v61  ;;  %v8888_v47 = vadd.f32 %v8776_v21, %v4786_v40 }
 0x31e   : > { %vm4949_vm15 = vmand %vm4883_vm9, %vm4917_vm10 }
 0x31f   : > { %vm6499_vm2 = vmpackc.low %vm4949_vm15, %vm4948_vm12  ;;  %vm4902_vm12 = vcmp.lt.s32.totalorder %v4833_v50, %v8622_v13  ;;  %vm4903_vm15 = vcmp.lt.s32.totalorder %v4834_v32, %v8622_v13  ;;  %v8893_v50 = vadd.f32 %v8723_v42, %v4789_v41 }
 0x320   : > { %6500 = vmatprep.subr.msk.bf16.mxu0 %vm6499_vm2, %v7697_v19  ;;  %vm4932_vm3 = vmand %vm4866_vm13, %vm4900_vm14  ;;  %vm4869_vm14 = vcmp.ge.s32.totalorder %v4834_v32, %v8615_v61  ;;  %vm4886_vm2 = vcmp.ge.s32.totalorder %v4851_v51, %v8615_v61  ;;  %v4788_v32 = vld [vmem:[%s9144_s3 + $0x70] sm:$0xff] }
 0x321   : > { %vm4933_vm6 = vmand %vm4867_vm0, %vm4901_vm1 }
 0x322   : > { %vm6501_vm9 = vmpackc.low %vm4933_vm6, %vm4932_vm3  ;;  %vm4920_vm3 = vcmp.lt.s32.totalorder %v4851_v51, %v8622_v13  ;;  %vm4921_vm6 = vcmp.lt.s32.totalorder %v4852_v53, %v8622_v13  ;;  %v4791_v51 = vld [vmem:[%s9144_s3 + $0x88] sm:$0xff] }
 0x323   : > { %6502 = vmatpush3.bf16.msk.msra.mxu0 %vm6501_vm9, %v7697_v19  ;;  %vm4950_vm10 = vmand %vm4884_vm4, %vm4918_vm5  ;;  %vm4887_vm5 = vcmp.ge.s32.totalorder %v4852_v53, %v8615_v61  ;;  %vm4870_vm9 = vcmp.ge.s32.totalorder %v4835_v34, %v8615_v61  ;;  %v5100_v53 = vmul.f32 %v8888_v47, %v8888_v47 }
 0x324   : > { %vm4951_vm13 = vmand %vm4885_vm7, %vm4919_vm8 }
 0x325   : > { %vm6503_vm0 = vmpackc.low %vm4951_vm13, %vm4950_vm10  ;;  %vm4904_vm10 = vcmp.lt.s32.totalorder %v4835_v34, %v8622_v13  ;;  %vm4905_vm13 = vcmp.lt.s32.totalorder %v4836_v54, %v8622_v13  ;;  %v8904_v34 = vadd.f32 %v8776_v21, %v4788_v32  ;;  %v5081_v32 = vmul.u32 36, %v8608_v62 }
 0x326   : > { %6504 = vmatprep.subr.msk.bf16.mxu0 %vm6503_vm0, %v7697_v19  ;;  %vm4934_vm1 = vmand %vm4868_vm11, %vm4902_vm12  ;;  %vm4871_vm12 = vcmp.ge.s32.totalorder %v4836_v54, %v8615_v61  ;;  %vm4888_vm0 = vcmp.ge.s32.totalorder %v4853_v38, %v8615_v61  ;;  %v5103_v54 = vmul.f32 %v8893_v50, %v8893_v50 }
 0x327   : > { %vm4935_vm4 = vmand %vm4869_vm14, %vm4903_vm15 }
 0x328   : > { %vm6505_vm7 = vmpackc.low %vm4935_vm4, %vm4934_vm1  ;;  %vm4922_vm1 = vcmp.lt.s32.totalorder %v4853_v38, %v8622_v13  ;;  %vm4923_vm4 = vcmp.lt.s32.totalorder %v4854_v58, %v8622_v13  ;;  %v8909_v38 = vadd.f32 %v8723_v42, %v4791_v51 }
 0x329   : > { %6506 = vmatpush3.bf16.msk.msra.mxu0 %vm6505_vm7, %v7697_v19  ;;  %vm4952_vm8 = vmand %vm4886_vm2, %vm4920_vm3  ;;  %vm4889_vm3 = vcmp.ge.s32.totalorder %v4854_v58, %v8615_v61  ;;  %vm4872_vm7 = vcmp.ge.s32.totalorder %v4837_v63, %v8615_v61  ;;  %v5102_v58 = vmul.f32 %v8904_v34, %v8904_v34 }
 0x32a   : > { %vm4953_vm11 = vmand %vm4887_vm5, %vm4921_vm6 }
 0x32b   : > { %vm6507_vm14 = vmpackc.low %vm4953_vm11, %vm4952_vm8  ;;  %vm4906_vm8 = vcmp.lt.s32.totalorder %v4837_v63, %v8622_v13  ;;  %vm4907_vm11 = vcmp.lt.s32.totalorder %v4838_v0, %v8622_v13  ;;  %v4782_v13 = vld [vmem:[%s9144_s3 + $0x40] sm:$0xff]  ;;  %v8917_v63 = vadd.f32 %v8776_v21, %v4790_v43 }
 0x32c   : > { %6508 = vmatprep.subr.msk.bf16.mxu0 %vm6507_vm14, %v7697_v19  ;;  %vm4936_vm15 = vmand %vm4870_vm9, %vm4904_vm10  ;;  %vm4873_vm10 = vcmp.ge.s32.totalorder %v4838_v0, %v8615_v61  ;;  %v8845_v61 = vadd.f32 %v8723_v42, %v4783_v48  ;;  %v5105_v0 = vmul.f32 %v8909_v38, %v8909_v38 }
 0x32d   : > { %vm4937_vm2 = vmand %vm4871_vm12, %vm4905_vm13  ;;  %v5104_v42 = vmul.f32 %v8917_v63, %v8917_v63 }
 0x32e   : > { %vm6509_vm5 = vmpackc.low %vm4937_vm2, %vm4936_vm15  ;;  %v5097_v30 = vmul.f32 %v8845_v61, %v8845_v61 }
 0x32f   : > { %6510 = vmatpush3.bf16.msk.msra.mxu0 %vm6509_vm5, %v7697_v19  ;;  %vm4954_vm6 = vmand %vm4888_vm0, %vm4922_vm1  ;;  %vm7700_vm0 = vmmov 0   ;;  %vm5082_vm1 = vcmp.ge.s32.totalorder %v8610_v3, %v5081_v32 }
 0x330   : > { %vm4955_vm9 = vmand %vm4889_vm3, %vm4923_vm4  ;;  %6456 = vmatprep.mubr.msk.f32.mxu1 %vm7700_vm0, %v7699_v2  ;;  %vm5216_vm4 = vcmask 588800  }
 0x331   : > { %vm6511_vm12 = vmpackc.low %vm4955_vm9, %vm4954_vm6 }
 0x332   : > { %6512 = vmatprep.subr.msk.bf16.mxu0 %vm6511_vm12, %v7697_v19  ;;  %vm4938_vm13 = vmand %vm4872_vm7, %vm4906_vm8 }
 0x333   : > { %vm4939_vm14 = vmand %vm4873_vm10, %vm4907_vm11 }
 0x334   : > { %vm6513_vm15 = vmpackc.low %vm4939_vm14, %vm4938_vm13 }
 0x335   : > { %6514 = vmatpush3.bf16.msk.msra.mxu0 %vm6513_vm15, %v7697_v19  ;;  %v8856_v19 = vadd.f32 %v8776_v21, %v4782_v13 }
 0x336   : > { %6515 = vmatprep.subr.bf16.mxu0 %v7698_v1 }
 0x337   : > { %v5096_v37 = vmul.f32 %v8856_v19, %v8856_v19 }
 0x338   : > { %5171 = vmatmul.mubr.f32.vlgmr.msra.gmra.mrb[0].mxu0 %v5088_v10 }
 0x339   : > { %5175 = vmatprep.mubr.f32.mxu0 %v5091_v7 }
 0x33c   : > { %5176 = vmatmul.mubr.f32.gmra.mrb[2].mxu0 %v5090_v56 }
 0x33d   : > { %5180 = vmatprep.mubr.f32.mxu0 %v5093_v17 }
 0x340   : > { %5181 = vmatmul.mubr.f32.gmra.mrb[4].mxu0 %v5092_v55 }
 0x341   : > { %5185 = vmatprep.mubr.f32.mxu0 %v5095_v52 }
 0x344   : > { %5186 = vmatmul.mubr.f32.gmra.mrb[6].mxu0 %v5094_v16 }
 0x345   : > { %5190 = vmatprep.mubr.f32.mxu0 %v5097_v30 }
 0x348   : > { %5191 = vmatmul.mubr.f32.gmra.mrb[8].mxu0 %v5096_v37 }
 0x349   : > { %5195 = vmatprep.mubr.f32.mxu0 %v5099_v28  ;;  %v5024_v28 = vadd.s32 1, %v8608_v62 }
 0x34b   : > { %v5083_v51 = vmul.u32 36, %v5024_v28 }
 0x34c   : > { %5196 = vmatmul.mubr.f32.gmra.mrb[10].mxu0 %v5098_v44 }
 0x34d   : > { %5200 = vmatprep.mubr.f32.mxu0 %v5101_v49  ;;  %vm5084_vm2 = vcmp.lt.s32.totalorder %v8610_v3, %v5083_v51 }
 0x34e   : > { %vm5085_vm3 = vmand %vm5082_vm1, %vm5084_vm2  ;;  %vm5328_vm1 = vcmask 1041408  }
 0x350   : > { %5201 = vmatmul.mubr.f32.gmra.mrb[12].mxu0 %v5100_v53 }
 0x351   : > { %5205 = vmatprep.mubr.f32.mxu0 %v5103_v54 }
 0x354   : > { %5206 = vmatmul.mubr.f32.gmra.mrb[14].mxu0 %v5102_v58 }
 0x355   : > { %5210 = vmatprep.mubr.f32.mxu0 %v5105_v0 }
 0x358   : > { %5211 = vmatmul.mubr.f32.gmra.mrb[16].mxu0 %v5104_v42 }
 0x359   : > { %6451 = vmatprep.mubr.msk.f32.mxu0 %vm7700_vm0, %v7699_v2 }
 0x40b   : > { %v6386_v21 = vpop.f32.mrb[0].mxu0 }
 0x40c   : > { %v6387_v8 = vpop.f32.mrb[1].mxu0 }
 0x40d   : > { %v6388_v9 = vadd.f32 %v6387_v8, %v6386_v21  ;;  %v6295_v8 = vsel %vm5085_vm3, 1.0, %v7699_v2  ;;  %vm5300_vm3 = vcmask 15360  }
 0x40f   : > { %v6389_v10 = vpop.f32.mrb[2].mxu0 }
 0x410   : > { %v6390_v7 = vpop.f32.mrb[3].mxu0 }
 0x411   : > { %v6391_v22 = vadd.f32 %v6390_v7, %v6389_v10  ;;  %v8935_v7 = vmul.u32 36, %v8610_v3 }
 0x413   : > { %v6516_v25 = vpack.c.bf16 %v6391_v22, %v6388_v9  ;;  %v6392_v56 = vpop.f32.mrb[4].mxu0  ;;  %v8938_v22 = vmul.u32 36, %v8618_v12  ;;  %vm5035_vm5 = vcmp.ge.s32.totalorder %v8608_v62, %v8935_v7  ;;  %vm5036_vm7 = vcmp.ge.s32.totalorder %v8625_v14, %v8935_v7 }
 0x414   : > { %v6393_v17 = vpop.f32.mrb[5].mxu0 }
 0x415   : > { %v6394_v45 = vadd.f32 %v6393_v17, %v6392_v56  ;;  %6517 = vmatpush3.bf16.msra.mxu0 %v6516_v25  ;;  %v5020_v25 = vadd.s32 128, %v8610_v3  ;;  %v5021_v56 = vmul.u32 32, %v8608_v62  ;;  %v5025_v17 = vmul.u32 32, %v5024_v28 }
 0x416   : > { %6518 = vmatprep.subr.bf16.mxu0 %v7698_v1  ;;  %vm5045_vm6 = vcmp.lt.s32.totalorder %v8608_v62, %v8938_v22  ;;  %vm5046_vm8 = vcmp.lt.s32.totalorder %v8625_v14, %v8938_v22 }
 0x417   : > { %v6395_v48 = vpop.f32.mrb[6].mxu0  ;;  %vm5054_vm10 = vmand %vm5035_vm5, %vm5045_vm6  ;;  %vm8950_vm11 = vcmp.ge.s32.totalorder %v5020_v25, %v5021_v56  ;;  %vm8954_vm12 = vcmp.lt.s32.totalorder %v5020_v25, %v5025_v17  ;;  %vm8959_vm14 = vcmp.ge.s32.totalorder %v8610_v3, %v5021_v56  ;;  %vm8964_vm15 = vcmp.lt.s32.totalorder %v8610_v3, %v5025_v17 }
 0x418   : > { %v6396_v55 = vpop.f32.mrb[7].mxu0  ;;  %vm5055_vm2 = vmand %vm5036_vm7, %vm5046_vm8  ;;  %vm5037_vm6 = vcmp.ge.s32.totalorder %v8641_v18, %v8935_v7  ;;  %vm5047_vm7 = vcmp.lt.s32.totalorder %v8641_v18, %v8938_v22  ;;  %v7701_v3 = vmov 1.0  }
 0x419   : > { %v6397_v52 = vadd.f32 %v6396_v55, %v6395_v48  ;;  %vm5028_vm5 = vmand %vm8959_vm14, %vm8964_vm15  ;;  %vm5040_vm15 = vcmp.ge.s32.totalorder %v8669_v60, %v8935_v7 }
 0x41a   : > { %vm5056_vm8 = vmand %vm5037_vm6, %vm5047_vm7  ;;  %vm5042_vm7 = vcmp.ge.s32.totalorder %v8691_v26, %v8935_v7 }
 0x41b   : > { %v6519_v13 = vpack.c.bf16 %v6397_v52, %v6394_v45  ;;  %v6398_v15 = vpop.f32.mrb[8].mxu0  ;;  %v6288_v18 = vsel %vm5056_vm8, 1.0, %v7699_v2  ;;  %vm5052_vm8 = vcmp.lt.s32.totalorder %v8691_v26, %v8938_v22 }
 0x41c   : > { %v6399_v16 = vpop.f32.mrb[9].mxu0 }
 0x41d   : > { %v6400_v30 = vadd.f32 %v6399_v16, %v6398_v15  ;;  %6520 = vmatpush3.bf16.msra.mxu0 %v6519_v13 }
 0x41e   : > { %6521 = vmatprep.subr.bf16.mxu0 %v7698_v1 }
 0x41f   : > { %v6401_v33 = vpop.f32.mrb[10].mxu0 }
 0x420   : > { %v6402_v35 = vpop.f32.mrb[11].mxu0 }
 0x421   : > { %v6403_v37 = vadd.f32 %v6402_v35, %v6401_v33  ;;  %v6286_v33 = vsel %vm5054_vm10, 1.0, %v7699_v2  ;;  %v6287_v35 = vsel %vm5055_vm2, 1.0, %v7699_v2  ;;  %vm5048_vm10 = vcmp.lt.s32.totalorder %v8647_v20, %v8938_v22 }
 0x423   : > { %v6522_v40 = vpack.c.bf16 %v6403_v37, %v6400_v30  ;;  %v6404_v41 = vpop.f32.mrb[12].mxu0 }
 0x424   : > { %v6405_v44 = vpop.f32.mrb[13].mxu0 }
 0x425   : > { %v6406_v49 = vadd.f32 %v6405_v44, %v6404_v41  ;;  %6523 = vmatpush3.bf16.msra.mxu0 %v6522_v40 }
 0x426   : > { %6524 = vmatprep.subr.bf16.mxu0 %v7698_v1 }
 0x427   : > { %v6407_v53 = vpop.f32.mrb[14].mxu0 }
 0x428   : > { %v6408_v54 = vpop.f32.mrb[15].mxu0 }
 0x429   : > { %v6409_v43 = vadd.f32 %v6408_v54, %v6407_v53 }
 0x42b   : > { %v6525_v58 = vpack.c.bf16 %v6409_v43, %v6406_v49  ;;  %v6410_v0 = vpop.f32.mrb[16].mxu0 }
 0x42c   : > { %v6411_v42 = vpop.f32.mrb[17].mxu0 }
 0x42d   : > { %6526 = vmatpush3.bf16.msra.mxu0 %v6525_v58  ;;  %v6412_v21 = vadd.f32 %v6411_v42, %v6410_v0 }
 0x42e   : > { %6449 = vmatprep.subr.mxu0 %v7699_v2 }
 0x431   : > { %6450 = vmatpush3.msra.mxu0 %v6412_v21 }
 0x432   : > { %6452 = vmatmul.mubr.msk.f32.vlgmr.msra.gmra.mrb[18].mxu0 %vm5216_vm4, %v6295_v8  ;;  %vm5029_vm4 = vmand %vm8950_vm11, %vm8954_vm12  ;;  %vm5039_vm12 = vcmp.ge.s32.totalorder %v8663_v57, %v8935_v7 }
 0x505   : > { %v5286_v1 = vpop.f32.mrb[18].mxu0 }
 0x506   : > { %7621 = vrsqrt.f32 %v5286_v1  ;;  %v6453_v9 = vpop.f32.mrb[19].mxu0  ;;  %v5297_v10 = vadd.f32 1.0, %v5286_v1  ;;  %vm5292_vm9 = vcmp.eq.f32.partialorder %v5286_v1, inf  ;;  %v5295_v12 = vand.u32 2147483648, %v5286_v1 }
 0x507   : > { %vm5294_vm13 = vcmp.eq.f32.partialorder %v5286_v1, 0.0 }
 0x508   : > { %7623 = vrcp.f32 %v5297_v10 }
 0x510   : > { %v7622_v45 = vpop.eup %7621 }
 0x511   : > { %v5291_v48 = vmul.f32 %v7622_v45, %v5286_v1 }
 0x512   : > { %v7624_v15 = vpop.eup %7623 }
 0x513   : > { %v5293_v62 = vsel %vm5292_vm9, %v5286_v1, %v5291_v48  ;;  %vm5038_vm9 = vcmp.ge.s32.totalorder %v8647_v20, %v8935_v7 }
 0x514   : > { %v5296_v16 = vsel %vm5294_vm13, %v5295_v12, %v5293_v62  ;;  %vm5057_vm11 = vmand %vm5038_vm9, %vm5048_vm10  ;;  %vm5049_vm13 = vcmp.lt.s32.totalorder %v8663_v57, %v8938_v22  ;;  %vm5043_vm10 = vcmp.ge.s32.totalorder %v8713_v39, %v8935_v7 }
 0x515   : > { %v5299_v30 = vmul.f32 %v7624_v15, %v5296_v16  ;;  %v6289_v20 = vsel %vm5057_vm11, 1.0, %v7699_v2  ;;  %vm5058_vm14 = vmand %vm5039_vm12, %vm5049_vm13  ;;  %vm5053_vm11 = vcmp.lt.s32.totalorder %v8713_v39, %v8938_v22  ;;  %vm5442_vm13 = vcmask 64512  }
 0x516   : > { %v6290_v57 = vsel %vm5058_vm14, 1.0, %v7699_v2  ;;  %vm5061_vm9 = vmand %vm5042_vm7, %vm5052_vm8 }
 0x517   : > { %6455 = vmatpush3.msk.msra.mxu1 %vm5328_vm1, %v5299_v30  ;;  %vm5050_vm1 = vcmp.lt.s32.totalorder %v8669_v60, %v8938_v22  ;;  %v6293_v26 = vsel %vm5061_vm9, 1.0, %v7699_v2  ;;  %vm5062_vm12 = vmand %vm5043_vm10, %vm5053_vm11 }
 0x518   : > { %6457 = vmatmul.mubr.msk.f32.vlgmr.msra.gmra.mrb[0].mxu1 %vm5300_vm3, %v6286_v33  ;;  %6339 = vmatprep.subr.msk.mxu1 %vm5029_vm4, %v7701_v3  ;;  %vm5059_vm2 = vmand %vm5040_vm15, %vm5050_vm1  ;;  %vm5041_vm4 = vcmp.ge.s32.totalorder %v8685_v36, %v8935_v7  ;;  %v6294_v37 = vsel %vm5062_vm12, 1.0, %v7699_v2 }
 0x519   : > { %6459 = vmatprep.mubr.msk.f32.mxu1 %vm7700_vm0, %v7699_v2  ;;  %6340 = vmatpush1.msk.msra.mxu1 %vm5028_vm5, %v7701_v3  ;;  %vm5051_vm5 = vcmp.lt.s32.totalorder %v8685_v36, %v8938_v22  ;;  %v6291_v60 = vsel %vm5059_vm2, 1.0, %v7699_v2 }
 0x51a   : > { %vm5060_vm6 = vmand %vm5041_vm4, %vm5051_vm5 }
 0x51b   : > { %v6292_v36 = vsel %vm5060_vm6, 1.0, %v7699_v2 }
 0x51c   : > { %6460 = vmatmul.mubr.msk.f32.gmra.mrb[2].mxu1 %vm5300_vm3, %v6287_v35 }
 0x51d   : > { %6462 = vmatprep.mubr.msk.f32.mxu1 %vm7700_vm0, %v7699_v2 }
 0x520   : > { %6463 = vmatmul.mubr.msk.f32.gmra.mrb[4].mxu1 %vm5300_vm3, %v6288_v18 }
 0x521   : > { %6465 = vmatprep.mubr.msk.f32.mxu1 %vm7700_vm0, %v7699_v2 }
 0x524   : > { %6466 = vmatmul.mubr.msk.f32.gmra.mrb[6].mxu1 %vm5300_vm3, %v6289_v20 }
 0x525   : > { %6468 = vmatprep.mubr.msk.f32.mxu1 %vm7700_vm0, %v7699_v2 }
 0x528   : > { %6469 = vmatmul.mubr.msk.f32.gmra.mrb[8].mxu1 %vm5300_vm3, %v6290_v57 }
 0x529   : > { %6471 = vmatprep.mubr.msk.f32.mxu1 %vm7700_vm0, %v7699_v2 }
 0x52c   : > { %6472 = vmatmul.mubr.msk.f32.gmra.mrb[10].mxu1 %vm5300_vm3, %v6291_v60 }
 0x52d   : > { %6474 = vmatprep.mubr.msk.f32.mxu1 %vm7700_vm0, %v7699_v2 }
 0x530   : > { %6475 = vmatmul.mubr.msk.f32.gmra.mrb[12].mxu1 %vm5300_vm3, %v6292_v36 }
 0x531   : > { %6477 = vmatprep.mubr.msk.f32.mxu1 %vm7700_vm0, %v7699_v2 }
 0x534   : > { %6478 = vmatmul.mubr.msk.f32.gmra.mrb[14].mxu1 %vm5300_vm3, %v6293_v26 }
 0x535   : > { %6480 = vmatprep.mubr.msk.f32.mxu1 %vm7700_vm0, %v7699_v2 }
 0x538   : > { %6481 = vmatmul.mubr.msk.f32.gmra.mrb[16].mxu1 %vm5300_vm3, %v6294_v37 }
 0x539   : > { %5534 = vmatprep.mubr.f32.mxu1 %v7699_v2 }
 0x5eb   : > { %v5398_v39 = vpop.f32.mrb[0].mxu1 }
 0x5ec   : > { %v6458_v28 = vpop.f32.mrb[1].mxu1  ;;  %6341 = vmatmul.mubr.msk.f32.vlgmr.msra.gmra.mrb[18].mxu1 %vm5442_vm13, %v5398_v39 }
 0x5ed   : > { %5540 = vmatprep.mubr.f32.mxu1 %v7699_v2 }
 0x5ef   : > { %v5403_v40 = vpop.f32.mrb[2].mxu1 }
 0x5f0   : > { %v6461_v41 = vpop.f32.mrb[3].mxu1  ;;  %6342 = vmatmul.mubr.msk.f32.gmra.mrb[20].mxu1 %vm5442_vm13, %v5403_v40 }
 0x5f1   : > { %5546 = vmatprep.mubr.f32.mxu1 %v7699_v2 }
 0x5f3   : > { %v5408_v44 = vpop.f32.mrb[4].mxu1 }
 0x5f4   : > { %v6464_v49 = vpop.f32.mrb[5].mxu1  ;;  %6343 = vmatmul.mubr.msk.f32.gmra.mrb[22].mxu1 %vm5442_vm13, %v5408_v44 }
 0x5f5   : > { %5552 = vmatprep.mubr.f32.mxu1 %v7699_v2 }
 0x5f7   : > { %v5413_v32 = vpop.f32.mrb[6].mxu1 }
 0x5f8   : > { %v6467_v51 = vpop.f32.mrb[7].mxu1  ;;  %6344 = vmatmul.mubr.msk.f32.gmra.mrb[24].mxu1 %vm5442_vm13, %v5413_v32 }
 0x5f9   : > { %5558 = vmatprep.mubr.f32.mxu1 %v7699_v2 }
 0x5fb   : > { %v5418_v53 = vpop.f32.mrb[8].mxu1 }
 0x5fc   : > { %v6470_v54 = vpop.f32.mrb[9].mxu1  ;;  %6345 = vmatmul.mubr.msk.f32.gmra.mrb[26].mxu1 %vm5442_vm13, %v5418_v53 }
 0x5fd   : > { %5564 = vmatprep.mubr.f32.mxu1 %v7699_v2 }
 0x5ff   : > { %v5423_v43 = vpop.f32.mrb[10].mxu1 }
 0x600   : > { %v6473_v58 = vpop.f32.mrb[11].mxu1  ;;  %6346 = vmatmul.mubr.msk.f32.gmra.mrb[28].mxu1 %vm5442_vm13, %v5423_v43 }
 0x601   : > { %5570 = vmatprep.mubr.f32.mxu1 %v7699_v2 }
 0x603   : > { %v5428_v0 = vpop.f32.mrb[12].mxu1 }
 0x604   : > { %v6476_v42 = vpop.f32.mrb[13].mxu1  ;;  %6347 = vmatmul.mubr.msk.f32.gmra.mrb[30].mxu1 %vm5442_vm13, %v5428_v0 }
 0x605   : > { %5576 = vmatprep.mubr.f32.mxu1 %v7699_v2 }
 0x607   : > { %v5433_v21 = vpop.f32.mrb[14].mxu1 }
 0x608   : > { %v6479_v8 = vpop.f32.mrb[15].mxu1  ;;  %6348 = vmatmul.mubr.msk.f32.gmra.mrb[32].mxu1 %vm5442_vm13, %v5433_v21 }
 0x609   : > { %5582 = vmatprep.mubr.f32.mxu1 %v7699_v2 }
 0x60b   : > { %v5438_v1 = vpop.f32.mrb[16].mxu1 }
 0x60c   : > { %v6482_v9 = vpop.f32.mrb[17].mxu1  ;;  %6349 = vmatmul.mubr.msk.f32.gmra.mrb[34].mxu1 %vm5442_vm13, %v5438_v1 }
 0x6bf   : > { %v5536_v10 = vpop.f32.mrb[18].mxu1 }
 0x6c0   : > { %v5589_v7 = vmul.f32 %v5536_v10, %v8792_v24  ;;  %v5538_v22 = vpop.f32.mrb[19].mxu1 }
 0x6c1   : > { %v5590_v25 = vmul.f32 %v5538_v22, %v8729_v46 }
 0x6c2   : > { %5607 = vst [vmem:[%s9144_s3] sm:$0xff] %v5589_v7 }
 0x6c3   : > { %5608 = vst [vmem:[%s9144_s3 + $0x8] sm:$0xff] %v5590_v25  ;;  %v5542_v56 = vpop.f32.mrb[20].mxu1 }
 0x6c4   : > { %v5591_v2 = vmul.f32 %v5542_v56, %v8807_v4  ;;  %v5544_v17 = vpop.f32.mrb[21].mxu1 }
 0x6c5   : > { %v5592_v45 = vmul.f32 %v5544_v17, %v8795_v5 }
 0x6c6   : > { %5609 = vst [vmem:[%s9144_s3 + $0x10] sm:$0xff] %v5591_v2 }
 0x6c7   : > { %5610 = vst [vmem:[%s9144_s3 + $0x18] sm:$0xff] %v5592_v45  ;;  %v5548_v46 = vpop.f32.mrb[22].mxu1 }
 0x6c8   : > { %v5593_v24 = vmul.f32 %v5548_v46, %v8824_v59  ;;  %v5550_v48 = vpop.f32.mrb[23].mxu1 }
 0x6c9   : > { %v5594_v12 = vmul.f32 %v5550_v48, %v8813_v11 }
 0x6ca   : > { %5611 = vst [vmem:[%s9144_s3 + $0x20] sm:$0xff] %v5593_v24 }
 0x6cb   : > { %5612 = vst [vmem:[%s9144_s3 + $0x28] sm:$0xff] %v5594_v12  ;;  %v5554_v5 = vpop.f32.mrb[24].mxu1 }
 0x6cc   : > { %v5595_v4 = vmul.f32 %v5554_v5, %v8840_v6  ;;  %v5556_v55 = vpop.f32.mrb[25].mxu1 }
 0x6cd   : > { %v5596_v52 = vmul.f32 %v5556_v55, %v8829_v23 }
 0x6ce   : > { %5613 = vst [vmem:[%s9144_s3 + $0x30] sm:$0xff] %v5595_v4 }
 0x6cf   : > { %5614 = vst [vmem:[%s9144_s3 + $0x38] sm:$0xff] %v5596_v52  ;;  %v5560_v11 = vpop.f32.mrb[26].mxu1 }
 0x6d0   : > { %v5597_v59 = vmul.f32 %v5560_v11, %v8856_v19  ;;  %v5562_v62 = vpop.f32.mrb[27].mxu1 }
 0x6d1   : > { %v5598_v13 = vmul.f32 %v5562_v62, %v8845_v61 }
 0x6d2   : > { %5615 = vst [vmem:[%s9144_s3 + $0x40] sm:$0xff] %v5597_v59 }
 0x6d3   : > { %5616 = vst [vmem:[%s9144_s3 + $0x48] sm:$0xff] %v5598_v13  ;;  %v5566_v23 = vpop.f32.mrb[28].mxu1 }
 0x6d4   : > { %v5599_v6 = vmul.f32 %v5566_v23, %v8872_v27  ;;  %v5568_v14 = vpop.f32.mrb[29].mxu1 }
 0x6d5   : > { %v5600_v15 = vmul.f32 %v5568_v14, %v8861_v31 }
 0x6d6   : > { %5617 = vst [vmem:[%s9144_s3 + $0x50] sm:$0xff] %v5599_v6 }
 0x6d7   : > { %5618 = vst [vmem:[%s9144_s3 + $0x58] sm:$0xff] %v5600_v15  ;;  %v5572_v61 = vpop.f32.mrb[30].mxu1 }
 0x6d8   : > { %v5601_v19 = vmul.f32 %v5572_v61, %v8888_v47  ;;  %v5574_v16 = vpop.f32.mrb[31].mxu1 }
 0x6d9   : > { %v5602_v30 = vmul.f32 %v5574_v16, %v8877_v29 }
 0x6da   : > { %5619 = vst [vmem:[%s9144_s3 + $0x60] sm:$0xff] %v5601_v19 }
 0x6db   : > { %5620 = vst [vmem:[%s9144_s3 + $0x68] sm:$0xff] %v5602_v30  ;;  %v5578_v31 = vpop.f32.mrb[32].mxu1 }
 0x6dc   : > { %v5603_v27 = vmul.f32 %v5578_v31, %v8904_v34  ;;  %v5580_v33 = vpop.f32.mrb[33].mxu1 }
 0x6dd   : > { %v5604_v3 = vmul.f32 %v5580_v33, %v8893_v50 }
 0x6de   : > { %5621 = vst [vmem:[%s9144_s3 + $0x70] sm:$0xff] %v5603_v27 }
 0x6df   : > { %5622 = vst [vmem:[%s9144_s3 + $0x78] sm:$0xff] %v5604_v3  ;;  %v5584_v29 = vpop.f32.mrb[34].mxu1 }
 0x6e0   : > { %v5605_v47 = vmul.f32 %v5584_v29, %v8917_v63  ;;  %v5586_v35 = vpop.f32.mrb[35].mxu1 }
 0x6e1   : > { %v5606_v18 = vmul.f32 %v5586_v35, %v8909_v38 }
 0x6e2   : > { %5623 = vst [vmem:[%s9144_s3 + $0x80] sm:$0xff] %v5605_v47 }
 0x6e3   : > { %5624 = vst [vmem:[%s9144_s3 + $0x88] sm:$0xff] %v5606_v18 }
 0x6e4 PF: > { %p13_p4 = scmp.ge.s32.totalorder %s7744_s17, 8   ;;  %s9155_s12 = smov %s7681_s13 }
 0x6e5   : > { %s9156_s13 = smov %s7685_s14  ;;  %s9157_s14 = smov %s7754_s20 }
 0x6e6   : > { %s9158_s15 = smov %s7744_s17  ;;  %15 = sbr.rel (!%p13_p4) target bundleno = 3 (0x3), region = 79 }
 0x6ed   :  { %5636 = vsyncpa [#allocation3], 1 }
 0x6ee   :  { %5638 = vsyncpa [#allocation3 + $0x1], 1 }

</bundles_post_ra>
